<compile_context>
chip_gen: v7x
topology: tpu7x:2x2x1
jax: 0.10.0
libtpu: 0.0.40
codegen_flags: <defaults>
</compile_context>

<pallas_src>
import math
import functools

import numpy as np
import jax
import jax.numpy as jnp
from jax import lax
from jax.experimental import pallas as pl
from jax.experimental.pallas import tpu as pltpu

CFG = dict(dim=32, nheads=4, block_size=16, ngroups=4, dropout=0.0,
           bias=False, pos="learned", nlayers=2)
IDX = 0  # layer index


# ----------------------------- fused Pallas kernel -----------------------------

def _fused_attn_kernel(x_ref, wqkv_ref, wproj_ref, p_ref, r_ref, s_ref,
                       m1_ref, m2_ref, out_ref, y_ref, *, nheads, hsize, scale):
    f32, bf16 = jnp.float32, jnp.bfloat16
    C = nheads * hsize

    xb = x_ref[...].astype(bf16)                       # (Bt*T, C)
    Pb, Rb, Sb = p_ref[...], r_ref[...], s_ref[...]    # block-diag selectors (bf16)
    m1, m2 = m1_ref[...], m2_ref[...]                  # additive masks (f32)

    # Augmented tokens: real tokens plus one per-group mean ("summary") row, for
    # every batch element of this tile (all stacked along sublanes).  The group
    # mean commutes with the bias-free linear c_attn, so it is applied to x once.
    x_aug = jnp.dot(Pb, xb, preferred_element_type=f32).astype(bf16)     # (Bt*GL, C)

    # Fused q|k|v projection for all heads in ONE matmul (heads along lanes).
    qkv = jnp.dot(x_aug, wqkv_ref[...], preferred_element_type=f32)      # (Bt*GL, 3C)
    qkv_bf = qkv.astype(bf16)

    # q/k/v of the summary tokens of groups 0..G-2 (selector matmul, one push).
    sum_qkv = jnp.dot(Sb, qkv_bf, preferred_element_type=f32)            # (Bt*Gm1, 3C)
    sum_bf = sum_qkv.astype(bf16)

    # ---- pass 1: causal attention inside every (batch, group) block ----------
    # One (rows, rows) masked score matmul per head covers all groups and all
    # batch elements of the tile (cross-batch / cross-group entries are masked).
    oh_parts = []
    for h in range(nheads):                            # unrolled, nheads static
        lo = h * hsize
        qa = qkv_bf[:, lo:lo + hsize]
        ka = qkv_bf[:, C + lo:C + lo + hsize]
        va = qkv_bf[:, 2 * C + lo:2 * C + lo + hsize]
        s1 = lax.dot_general(qa, ka, (((1,), (1,)), ((), ())),
                             preferred_element_type=f32) * scale + m1
        p1 = jnp.exp(s1 - jnp.max(s1, axis=-1, keepdims=True))
        p1 = p1 * pl.reciprocal(jnp.sum(p1, axis=-1, keepdims=True), approx=True)
        oh_parts.append(jnp.dot(p1.astype(bf16), va, preferred_element_type=f32))
    oh_all = jnp.concatenate(oh_parts, axis=1)                           # (Bt*GL, C)
    oh_bf = oh_all.astype(bf16)

    # ---- pass 2: causal attention across the group-summary tokens ------------
    xg = jnp.dot(Sb, oh_bf, preferred_element_type=f32).astype(bf16)     # (Bt*Gm1, C)
    vg_parts = []
    for h in range(nheads):
        lo = h * hsize
        qg = sum_bf[:, lo:lo + hsize]
        kg = sum_bf[:, C + lo:C + lo + hsize]
        s2 = lax.dot_general(qg, kg, (((1,), (1,)), ((), ())),
                             preferred_element_type=f32) * scale + m2
        p2 = jnp.exp(s2 - jnp.max(s2, axis=-1, keepdims=True))
        p2 = p2 * pl.reciprocal(jnp.sum(p2, axis=-1, keepdims=True), approx=True)
        vg_parts.append(jnp.dot(p2.astype(bf16), xg[:, lo:lo + hsize],
                                preferred_element_type=f32))
    vg_all = jnp.concatenate(vg_parts, axis=1)                           # (Bt*Gm1, C)

    # Packed summary outputs [q_sum | k_sum | v_sum] -> ONE lane-dense store.
    y_ref[0] = jnp.concatenate([sum_qkv[:, :2 * C], vg_all], axis=1)     # (Bt*Gm1, 3C)

    # Drop summary rows / restore sequence order (selector R) and apply the full
    # c_proj once; one lane-dense store for the whole batch tile.
    real = jnp.dot(Rb, oh_bf, preferred_element_type=f32)                # (Bt*T, C)
    out_ref[...] = jnp.dot(real.astype(bf16), wproj_ref[...],
                           preferred_element_type=f32)                   # (Bt*T, C)


def _selector_constants(T, group_t, n_groups, Bt):
    """Constant operators (block-diagonal over the Bt batch tile)."""
    L = group_t + 1                   # group length incl. the mean "summary" token
    GL = n_groups * L
    Gm1 = n_groups - 1
    P = np.zeros((GL, T), np.float32)             # x -> augmented tokens (+ group means)
    R = np.zeros((T, GL), np.float32)             # augmented tokens -> real tokens
    S = np.zeros((Gm1, GL), np.float32)           # summary rows of groups 0..G-2
    M1 = np.full((GL, GL), -1e30, np.float32)     # intra-group causal mask
    for g in range(n_groups):
        for tg in range(group_t):
            P[g * L + tg, g * group_t + tg] = 1.0
            R[g * group_t + tg, g * L + tg] = 1.0
        P[g * L + group_t, g * group_t:(g + 1) * group_t] = 1.0 / group_t
        for i in range(L):
            M1[g * L + i, g * L:g * L + i + 1] = 0.0
    for g in range(Gm1):
        S[g, g * L + group_t] = 1.0
    M2 = np.full((Gm1, Gm1), -1e30, np.float32)   # causal mask over summary tokens
    for i in range(Gm1):
        M2[i, :i + 1] = 0.0

    def bd(A):                                    # block-diagonal over the batch tile
        r, c = A.shape
        out = np.zeros((Bt * r, Bt * c), A.dtype)
        for b in range(Bt):
            out[b * r:(b + 1) * r, b * c:(b + 1) * c] = A
        return out

    M1b = np.full((Bt * GL, Bt * GL), -1e30, np.float32)
    M2b = np.full((Bt * Gm1, Bt * Gm1), -1e30, np.float32)
    for b in range(Bt):
        M1b[b * GL:(b + 1) * GL, b * GL:(b + 1) * GL] = M1
        M2b[b * Gm1:(b + 1) * Gm1, b * Gm1:(b + 1) * Gm1] = M2
    return bd(P), bd(R), bd(S), M1b, M2b


def _pick_block_batch(B):
    """Batch elements per grid step: as large as possible (<=8) while keeping
    >= 4 grid steps when B allows it (>= 2 steps per TensorCore on v7x)."""
    for bt in (8, 4, 2, 1):
        if B % bt == 0 and B // bt >= 4:
            return bt
    for bt in (8, 4, 2, 1):
        if B % bt == 0:
            return bt
    return 1


def causal_self_attention2(x, w_attn_t, w_proj_t, cfg=CFG, idx=IDX, block_batch=None):
    """Fused Pallas forward of CausalSelfAttention2 (its_time / y=None path)."""
    B, T, C = x.shape
    nheads = cfg["nheads"]
    hsize = C // nheads
    group_t = cfg["block_size"] // cfg["ngroups"]
    n_groups = min(T // group_t, cfg["ngroups"])
    its_time = (cfg["nlayers"] % 2) ^ ((idx + 1) % 2)
    assert its_time == 1 and n_groups == cfg["ngroups"] and T == n_groups * group_t, (
        "fused kernel is specialised to the its_time summary-token path")
    # TODO(synk): pos == 'rope' (apply_rotary_emb), the y!=None do_block_merge branch,
    #             and the non-its_time output-merge path are not implemented
    #             (config uses pos='learned', forward is called with y=None, its_time==1).

    L = group_t + 1
    GL = n_groups * L
    Gm1 = n_groups - 1

    Bt = block_batch if block_batch is not None else _pick_block_batch(B)
    assert B % Bt == 0
    nb = B // Bt

    Pb, Rb, Sb, M1b, M2b = _selector_constants(T, group_t, n_groups, Bt)
    Pb = jnp.asarray(Pb, jnp.bfloat16)
    Rb = jnp.asarray(Rb, jnp.bfloat16)
    Sb = jnp.asarray(Sb, jnp.bfloat16)
    M1b = jnp.asarray(M1b, jnp.float32)
    M2b = jnp.asarray(M2b, jnp.float32)
    Wqkv = w_attn_t.astype(jnp.bfloat16)        # (C, 3C): q|k|v, heads along lanes
    Wp = w_proj_t.astype(jnp.bfloat16)          # (C, C)

    kern = functools.partial(_fused_attn_kernel, nheads=nheads, hsize=hsize,
                             scale=1.0 / math.sqrt(hsize))

    def const_spec(shape):
        n = len(shape)
        return pl.BlockSpec(shape, lambda b, _n=n: (0,) * _n)   # VMEM-resident

    out2d, ypk = pl.pallas_call(
        kern,
        out_shape=(
            jax.ShapeDtypeStruct((B * T, C), jnp.float32),            # main output
            jax.ShapeDtypeStruct((nb, Bt * Gm1, 3 * C), jnp.float32),  # packed q/k/v summary
        ),
        grid=(nb,),
        in_specs=[
            pl.BlockSpec((Bt * T, C), lambda b: (b, 0)),     # x rows of this batch tile
            const_spec((C, 3 * C)),                          # fused qkv weight
            const_spec((C, C)),                              # c_proj weight
            const_spec((Bt * GL, Bt * T)),                   # P  (expand + group means)
            const_spec((Bt * T, Bt * GL)),                   # R  (drop summaries / reorder)
            const_spec((Bt * Gm1, Bt * GL)),                 # S  (pick summary rows)
            const_spec((Bt * GL, Bt * GL)),                  # pass-1 additive causal mask
            const_spec((Bt * Gm1, Bt * Gm1)),                # pass-2 additive causal mask
        ],
        out_specs=(
            pl.BlockSpec((Bt * T, C), lambda b: (b, 0)),
            pl.BlockSpec((1, Bt * Gm1, 3 * C), lambda b: (b, 0, 0)),
        ),
        compiler_params=pltpu.CompilerParams(dimension_semantics=("parallel",)),
    )(x.reshape(B * T, C), Wqkv, Wp, Pb, Rb, Sb, M1b, M2b)

    out = out2d.reshape(B, T, C)
    yp = ypk.reshape(B, Gm1, 3, nheads, hsize)
    yq = yp[:, :, 0].transpose(0, 2, 1, 3)[:, :, :, None, :]   # (B, nheads, Gm1, 1, H)
    yk = yp[:, :, 1].transpose(0, 2, 1, 3)[:, :, :, None, :]
    yv = yp[:, :, 2].transpose(0, 2, 1, 3)[:, :, :, None, :]
    return out, (yq, yk, yv)


# --------------------------- pure-JAX reference ---------------------------

def _ref_causal_attention(q, k, v):
    N, L, H = q.shape
    s = jnp.einsum('nld,nmd->nlm', q, k) * (1.0 / math.sqrt(H))
    mask = jnp.tril(jnp.ones((L, L), dtype=bool))
    s = jnp.where(mask, s, -jnp.inf)
    p = jax.nn.softmax(s, axis=-1)
    return jnp.einsum('nlm,nmd->nld', p, v)


def reference_forward(x, w_attn_t, w_proj_t, cfg=CFG, idx=IDX):
    B, T, C = x.shape
    nheads = cfg["nheads"]
    hsize = C // nheads
    group_t = cfg["block_size"] // cfg["ngroups"]
    n_groups = min(T // group_t, cfg["ngroups"])
    its_time = (cfg["nlayers"] % 2) ^ ((idx + 1) % 2)

    qkv = (x.reshape(B * T, C) @ w_attn_t).reshape(B, T, 3 * C)
    q, k, v = jnp.split(qkv, 3, axis=2)

    def to_groups(t):  # (B,T,C) -> (B, nH, G, Tg, H)
        return t.reshape(B, n_groups, group_t, nheads, hsize).transpose(0, 3, 1, 2, 4)

    q, k, v = to_groups(q), to_groups(k), to_groups(v)
    if its_time and n_groups > 0:
        q = jnp.concatenate([q, q.mean(axis=3, keepdims=True)], axis=3)
        k = jnp.concatenate([k, k.mean(axis=3, keepdims=True)], axis=3)
        v = jnp.concatenate([v, v.mean(axis=3, keepdims=True)], axis=3)

    Bq, nH, G, Lg, H = q.shape
    att = _ref_causal_attention(q.reshape(-1, Lg, H), k.reshape(-1, Lg, H),
                                v.reshape(-1, Lg, H)).reshape(Bq, nH, G, Lg, H)

    if its_time and n_groups > 0:
        qg = q[:, :, :-1, -1]
        kg = k[:, :, :-1, -1]
        xg = att[:, :, :-1, -1]
        Ls = G - 1
        vg = _ref_causal_attention(qg.reshape(-1, Ls, H), kg.reshape(-1, Ls, H),
                                   xg.reshape(-1, Ls, H)).reshape(Bq, nH, Ls, H)
        y = (qg[:, :, :, None, :], kg[:, :, :, None, :], vg[:, :, :, None, :])
        att = att[:, :, :, :-1]
    else:
        y = None

    x_out = att.reshape(B, nH, att.shape[2] * att.shape[3], hsize)
    x_out = x_out.transpose(0, 2, 1, 3).reshape(B, T, C)
    out = (x_out.reshape(B * T, C) @ w_proj_t).reshape(B, T, C)
    return out, y


# --------------------------------- main ---------------------------------

if __name__ == "__main__":
    key = jax.random.PRNGKey(0)
    k1, k2, k3 = jax.random.split(key, 3)

    B, T, C = 16, CFG["block_size"], CFG["dim"]
    x = jax.random.normal(k1, (B, T, C), dtype=jnp.float32)
    # PyTorch stores Linear weight as (out, in) and applies x @ W^T; we directly
    # build the transposed (in, out) matrices, deterministically, bias=False.
    w_attn_t = jax.random.normal(k2, (C, 3 * C), dtype=jnp.float32) * 0.05
    w_proj_t = jax.random.normal(k3, (C, C), dtype=jnp.float32) * 0.05

    out, y = causal_self_attention2(x, w_attn_t, w_proj_t)
    jax.block_until_ready((out, y))

    ref_out, ref_y = reference_forward(x, w_attn_t, w_proj_t)
    np.testing.assert_allclose(np.asarray(out), np.asarray(ref_out),
                               rtol=2e-2, atol=2e-2)
    for a, b in zip(y, ref_y):
        np.testing.assert_allclose(np.asarray(a), np.asarray(b),
                                   rtol=2e-2, atol=2e-2)

    print("KERNEL_OK")
</pallas_src>

<mosaic_0001>
module attributes {stable_mosaic.version = 11 : i64} {
  func.func @_fused_attn_kernel(%arg0: i32, %arg1: memref<64x32xf32, #tpu.memory_space<vmem>>, %arg2: memref<32x96xbf16, #tpu.memory_space<vmem>>, %arg3: memref<32x32xbf16, #tpu.memory_space<vmem>>, %arg4: memref<80x64xbf16, #tpu.memory_space<vmem>>, %arg5: memref<64x80xbf16, #tpu.memory_space<vmem>>, %arg6: memref<12x80xbf16, #tpu.memory_space<vmem>>, %arg7: memref<80x80xf32, #tpu.memory_space<vmem>>, %arg8: memref<12x12xf32, #tpu.memory_space<vmem>>, %arg9: memref<64x32xf32, #tpu.memory_space<vmem>>, %arg10: memref<1x12x96xf32, #tpu.memory_space<vmem>>) attributes {dimension_semantics = [#tpu.dimension_semantics<parallel>], iteration_bounds = array<i64: 4>, scalar_prefetch = 0 : i64, scratch_operands = 0 : i64, tpu.core_type = #tpu.core_type<tc>, window_params = [{transform_indices = @transform_0, window_bounds = array<i64: 64, 32>}, {pipeline_mode = #tpu.pipeline_mode<synchronous>, transform_indices = @transform_1, window_bounds = array<i64: 32, 96>}, {pipeline_mode = #tpu.pipeline_mode<synchronous>, transform_indices = @transform_2, window_bounds = array<i64: 32, 32>}, {pipeline_mode = #tpu.pipeline_mode<synchronous>, transform_indices = @transform_3, window_bounds = array<i64: 80, 64>}, {pipeline_mode = #tpu.pipeline_mode<synchronous>, transform_indices = @transform_4, window_bounds = array<i64: 64, 80>}, {pipeline_mode = #tpu.pipeline_mode<synchronous>, transform_indices = @transform_5, window_bounds = array<i64: 12, 80>}, {pipeline_mode = #tpu.pipeline_mode<synchronous>, transform_indices = @transform_6, window_bounds = array<i64: 80, 80>}, {pipeline_mode = #tpu.pipeline_mode<synchronous>, transform_indices = @transform_7, window_bounds = array<i64: 12, 12>}, {transform_indices = @transform_8, window_bounds = array<i64: 64, 32>}, {transform_indices = @transform_9, window_bounds = array<i64: 1, 12, 96>}]} {
    %c0 = arith.constant 0 : index
    %c0_0 = arith.constant 0 : index
    %0 = vector.load %arg1[%c0, %c0_0] : memref<64x32xf32, #tpu.memory_space<vmem>>, vector<64x32xf32>
    %1 = arith.truncf %0 : vector<64x32xf32> to vector<64x32xbf16>
    %c0_1 = arith.constant 0 : index
    %c0_2 = arith.constant 0 : index
    %2 = vector.load %arg4[%c0_1, %c0_2] : memref<80x64xbf16, #tpu.memory_space<vmem>>, vector<80x64xbf16>
    %c0_3 = arith.constant 0 : index
    %c0_4 = arith.constant 0 : index
    %3 = vector.load %arg5[%c0_3, %c0_4] : memref<64x80xbf16, #tpu.memory_space<vmem>>, vector<64x80xbf16>
    %c0_5 = arith.constant 0 : index
    %c0_6 = arith.constant 0 : index
    %4 = vector.load %arg6[%c0_5, %c0_6] : memref<12x80xbf16, #tpu.memory_space<vmem>>, vector<12x80xbf16>
    %c0_7 = arith.constant 0 : index
    %c0_8 = arith.constant 0 : index
    %5 = vector.load %arg7[%c0_7, %c0_8] : memref<80x80xf32, #tpu.memory_space<vmem>>, vector<80x80xf32>
    %c0_9 = arith.constant 0 : index
    %c0_10 = arith.constant 0 : index
    %6 = vector.load %arg8[%c0_9, %c0_10] : memref<12x12xf32, #tpu.memory_space<vmem>>, vector<12x12xf32>
    %cst = arith.constant dense<0.000000e+00> : vector<80x32xf32>
    %7 = tpu.matmul %2, %1, %cst {dimension_numbers = #tpu.dot_dimension_numbers<[1], [0], [0], [1], [0, 0, 1, 1], [], []>} : vector<80x64xbf16>, vector<64x32xbf16>, vector<80x32xf32> -> vector<80x32xf32>
    %8 = arith.truncf %7 : vector<80x32xf32> to vector<80x32xbf16>
    %c0_11 = arith.constant 0 : index
    %c0_12 = arith.constant 0 : index
    %9 = vector.load %arg2[%c0_11, %c0_12] : memref<32x96xbf16, #tpu.memory_space<vmem>>, vector<32x96xbf16>
    %cst_13 = arith.constant dense<0.000000e+00> : vector<80x96xf32>
    %10 = tpu.matmul %8, %9, %cst_13 {dimension_numbers = #tpu.dot_dimension_numbers<[1], [0], [0], [1], [0, 0, 1, 1], [], []>} : vector<80x32xbf16>, vector<32x96xbf16>, vector<80x96xf32> -> vector<80x96xf32>
    %11 = arith.truncf %10 : vector<80x96xf32> to vector<80x96xbf16>
    %cst_14 = arith.constant dense<0.000000e+00> : vector<12x96xf32>
    %12 = tpu.matmul %4, %11, %cst_14 {dimension_numbers = #tpu.dot_dimension_numbers<[1], [0], [0], [1], [0, 0, 1, 1], [], []>} : vector<12x80xbf16>, vector<80x96xbf16>, vector<12x96xf32> -> vector<12x96xf32>
    %13 = arith.truncf %12 : vector<12x96xf32> to vector<12x96xbf16>
    %14 = vector.extract_strided_slice %11 {offsets = [0, 0], sizes = [80, 8], strides = [1, 1]} : vector<80x96xbf16> to vector<80x8xbf16>
    %15 = vector.extract_strided_slice %11 {offsets = [0, 32], sizes = [80, 8], strides = [1, 1]} : vector<80x96xbf16> to vector<80x8xbf16>
    %16 = vector.extract_strided_slice %11 {offsets = [0, 64], sizes = [80, 8], strides = [1, 1]} : vector<80x96xbf16> to vector<80x8xbf16>
    %cst_15 = arith.constant dense<0.000000e+00> : vector<80x80xf32>
    %17 = tpu.matmul %14, %15, %cst_15 {dimension_numbers = #tpu.dot_dimension_numbers<[1], [1], [0], [0], [0, 0, 1, 0], [], []>} : vector<80x8xbf16>, vector<80x8xbf16>, vector<80x80xf32> -> vector<80x80xf32>
    %cst_16 = arith.constant 0.353553385 : f32
    %18 = vector.broadcast %cst_16 : f32 to vector<80x80xf32>
    %19 = arith.mulf %17, %18 : vector<80x80xf32>
    %20 = arith.addf %19, %5 : vector<80x80xf32>
    %cst_17 = arith.constant dense<0xFF800000> : vector<80xf32>
    %21 = vector.multi_reduction <maximumf>, %20, %cst_17 [1] : vector<80x80xf32> to vector<80xf32>
    %22 = vector.shape_cast %21 : vector<80xf32> to vector<80x1xf32>
    %23 = vector.broadcast %22 : vector<80x1xf32> to vector<80x80xf32>
    %24 = arith.subf %20, %23 : vector<80x80xf32>
    %25 = math.exp %24 : vector<80x80xf32>
    %cst_18 = arith.constant dense<0.000000e+00> : vector<80xf32>
    %26 = vector.multi_reduction <add>, %25, %cst_18 [1] : vector<80x80xf32> to vector<80xf32>
    %27 = vector.shape_cast %26 : vector<80xf32> to vector<80x1xf32>
    %28 = tpu.reciprocal %27 {approx = true} : vector<80x1xf32> -> vector<80x1xf32>
    %29 = vector.broadcast %28 : vector<80x1xf32> to vector<80x80xf32>
    %30 = arith.mulf %25, %29 : vector<80x80xf32>
    %31 = arith.truncf %30 : vector<80x80xf32> to vector<80x80xbf16>
    %cst_19 = arith.constant dense<0.000000e+00> : vector<80x8xf32>
    %32 = tpu.matmul %31, %16, %cst_19 {dimension_numbers = #tpu.dot_dimension_numbers<[1], [0], [0], [1], [0, 0, 1, 1], [], []>} : vector<80x80xbf16>, vector<80x8xbf16>, vector<80x8xf32> -> vector<80x8xf32>
    %33 = vector.extract_strided_slice %11 {offsets = [0, 8], sizes = [80, 8], strides = [1, 1]} : vector<80x96xbf16> to vector<80x8xbf16>
    %34 = vector.extract_strided_slice %11 {offsets = [0, 40], sizes = [80, 8], strides = [1, 1]} : vector<80x96xbf16> to vector<80x8xbf16>
    %35 = vector.extract_strided_slice %11 {offsets = [0, 72], sizes = [80, 8], strides = [1, 1]} : vector<80x96xbf16> to vector<80x8xbf16>
    %cst_20 = arith.constant dense<0.000000e+00> : vector<80x80xf32>
    %36 = tpu.matmul %33, %34, %cst_20 {dimension_numbers = #tpu.dot_dimension_numbers<[1], [1], [0], [0], [0, 0, 1, 0], [], []>} : vector<80x8xbf16>, vector<80x8xbf16>, vector<80x80xf32> -> vector<80x80xf32>
    %cst_21 = arith.constant 0.353553385 : f32
    %37 = vector.broadcast %cst_21 : f32 to vector<80x80xf32>
    %38 = arith.mulf %36, %37 : vector<80x80xf32>
    %39 = arith.addf %38, %5 : vector<80x80xf32>
    %cst_22 = arith.constant dense<0xFF800000> : vector<80xf32>
    %40 = vector.multi_reduction <maximumf>, %39, %cst_22 [1] : vector<80x80xf32> to vector<80xf32>
    %41 = vector.shape_cast %40 : vector<80xf32> to vector<80x1xf32>
    %42 = vector.broadcast %41 : vector<80x1xf32> to vector<80x80xf32>
    %43 = arith.subf %39, %42 : vector<80x80xf32>
    %44 = math.exp %43 : vector<80x80xf32>
    %cst_23 = arith.constant dense<0.000000e+00> : vector<80xf32>
    %45 = vector.multi_reduction <add>, %44, %cst_23 [1] : vector<80x80xf32> to vector<80xf32>
    %46 = vector.shape_cast %45 : vector<80xf32> to vector<80x1xf32>
    %47 = tpu.reciprocal %46 {approx = true} : vector<80x1xf32> -> vector<80x1xf32>
    %48 = vector.broadcast %47 : vector<80x1xf32> to vector<80x80xf32>
    %49 = arith.mulf %44, %48 : vector<80x80xf32>
    %50 = arith.truncf %49 : vector<80x80xf32> to vector<80x80xbf16>
    %cst_24 = arith.constant dense<0.000000e+00> : vector<80x8xf32>
    %51 = tpu.matmul %50, %35, %cst_24 {dimension_numbers = #tpu.dot_dimension_numbers<[1], [0], [0], [1], [0, 0, 1, 1], [], []>} : vector<80x80xbf16>, vector<80x8xbf16>, vector<80x8xf32> -> vector<80x8xf32>
    %52 = vector.extract_strided_slice %11 {offsets = [0, 16], sizes = [80, 8], strides = [1, 1]} : vector<80x96xbf16> to vector<80x8xbf16>
    %53 = vector.extract_strided_slice %11 {offsets = [0, 48], sizes = [80, 8], strides = [1, 1]} : vector<80x96xbf16> to vector<80x8xbf16>
    %54 = vector.extract_strided_slice %11 {offsets = [0, 80], sizes = [80, 8], strides = [1, 1]} : vector<80x96xbf16> to vector<80x8xbf16>
    %cst_25 = arith.constant dense<0.000000e+00> : vector<80x80xf32>
    %55 = tpu.matmul %52, %53, %cst_25 {dimension_numbers = #tpu.dot_dimension_numbers<[1], [1], [0], [0], [0, 0, 1, 0], [], []>} : vector<80x8xbf16>, vector<80x8xbf16>, vector<80x80xf32> -> vector<80x80xf32>
    %cst_26 = arith.constant 0.353553385 : f32
    %56 = vector.broadcast %cst_26 : f32 to vector<80x80xf32>
    %57 = arith.mulf %55, %56 : vector<80x80xf32>
    %58 = arith.addf %57, %5 : vector<80x80xf32>
    %cst_27 = arith.constant dense<0xFF800000> : vector<80xf32>
    %59 = vector.multi_reduction <maximumf>, %58, %cst_27 [1] : vector<80x80xf32> to vector<80xf32>
    %60 = vector.shape_cast %59 : vector<80xf32> to vector<80x1xf32>
    %61 = vector.broadcast %60 : vector<80x1xf32> to vector<80x80xf32>
    %62 = arith.subf %58, %61 : vector<80x80xf32>
    %63 = math.exp %62 : vector<80x80xf32>
    %cst_28 = arith.constant dense<0.000000e+00> : vector<80xf32>
    %64 = vector.multi_reduction <add>, %63, %cst_28 [1] : vector<80x80xf32> to vector<80xf32>
    %65 = vector.shape_cast %64 : vector<80xf32> to vector<80x1xf32>
    %66 = tpu.reciprocal %65 {approx = true} : vector<80x1xf32> -> vector<80x1xf32>
    %67 = vector.broadcast %66 : vector<80x1xf32> to vector<80x80xf32>
    %68 = arith.mulf %63, %67 : vector<80x80xf32>
    %69 = arith.truncf %68 : vector<80x80xf32> to vector<80x80xbf16>
    %cst_29 = arith.constant dense<0.000000e+00> : vector<80x8xf32>
    %70 = tpu.matmul %69, %54, %cst_29 {dimension_numbers = #tpu.dot_dimension_numbers<[1], [0], [0], [1], [0, 0, 1, 1], [], []>} : vector<80x80xbf16>, vector<80x8xbf16>, vector<80x8xf32> -> vector<80x8xf32>
    %71 = vector.extract_strided_slice %11 {offsets = [0, 24], sizes = [80, 8], strides = [1, 1]} : vector<80x96xbf16> to vector<80x8xbf16>
    %72 = vector.extract_strided_slice %11 {offsets = [0, 56], sizes = [80, 8], strides = [1, 1]} : vector<80x96xbf16> to vector<80x8xbf16>
    %73 = vector.extract_strided_slice %11 {offsets = [0, 88], sizes = [80, 8], strides = [1, 1]} : vector<80x96xbf16> to vector<80x8xbf16>
    %cst_30 = arith.constant dense<0.000000e+00> : vector<80x80xf32>
    %74 = tpu.matmul %71, %72, %cst_30 {dimension_numbers = #tpu.dot_dimension_numbers<[1], [1], [0], [0], [0, 0, 1, 0], [], []>} : vector<80x8xbf16>, vector<80x8xbf16>, vector<80x80xf32> -> vector<80x80xf32>
    %cst_31 = arith.constant 0.353553385 : f32
    %75 = vector.broadcast %cst_31 : f32 to vector<80x80xf32>
    %76 = arith.mulf %74, %75 : vector<80x80xf32>
    %77 = arith.addf %76, %5 : vector<80x80xf32>
    %cst_32 = arith.constant dense<0xFF800000> : vector<80xf32>
    %78 = vector.multi_reduction <maximumf>, %77, %cst_32 [1] : vector<80x80xf32> to vector<80xf32>
    %79 = vector.shape_cast %78 : vector<80xf32> to vector<80x1xf32>
    %80 = vector.broadcast %79 : vector<80x1xf32> to vector<80x80xf32>
    %81 = arith.subf %77, %80 : vector<80x80xf32>
    %82 = math.exp %81 : vector<80x80xf32>
    %cst_33 = arith.constant dense<0.000000e+00> : vector<80xf32>
    %83 = vector.multi_reduction <add>, %82, %cst_33 [1] : vector<80x80xf32> to vector<80xf32>
    %84 = vector.shape_cast %83 : vector<80xf32> to vector<80x1xf32>
    %85 = tpu.reciprocal %84 {approx = true} : vector<80x1xf32> -> vector<80x1xf32>
    %86 = vector.broadcast %85 : vector<80x1xf32> to vector<80x80xf32>
    %87 = arith.mulf %82, %86 : vector<80x80xf32>
    %88 = arith.truncf %87 : vector<80x80xf32> to vector<80x80xbf16>
    %cst_34 = arith.constant dense<0.000000e+00> : vector<80x8xf32>
    %89 = tpu.matmul %88, %73, %cst_34 {dimension_numbers = #tpu.dot_dimension_numbers<[1], [0], [0], [1], [0, 0, 1, 1], [], []>} : vector<80x80xbf16>, vector<80x8xbf16>, vector<80x8xf32> -> vector<80x8xf32>
    %90 = tpu.concatenate %32, %51, %70, %89 in 1 : vector<80x8xf32>, vector<80x8xf32>, vector<80x8xf32>, vector<80x8xf32> -> vector<80x32xf32>
    %91 = arith.truncf %90 : vector<80x32xf32> to vector<80x32xbf16>
    %cst_35 = arith.constant dense<0.000000e+00> : vector<12x32xf32>
    %92 = tpu.matmul %4, %91, %cst_35 {dimension_numbers = #tpu.dot_dimension_numbers<[1], [0], [0], [1], [0, 0, 1, 1], [], []>} : vector<12x80xbf16>, vector<80x32xbf16>, vector<12x32xf32> -> vector<12x32xf32>
    %93 = arith.truncf %92 : vector<12x32xf32> to vector<12x32xbf16>
    %94 = vector.extract_strided_slice %13 {offsets = [0, 0], sizes = [12, 8], strides = [1, 1]} : vector<12x96xbf16> to vector<12x8xbf16>
    %95 = vector.extract_strided_slice %13 {offsets = [0, 32], sizes = [12, 8], strides = [1, 1]} : vector<12x96xbf16> to vector<12x8xbf16>
    %cst_36 = arith.constant dense<0.000000e+00> : vector<12x12xf32>
    %96 = tpu.matmul %94, %95, %cst_36 {dimension_numbers = #tpu.dot_dimension_numbers<[1], [1], [0], [0], [0, 0, 1, 0], [], []>} : vector<12x8xbf16>, vector<12x8xbf16>, vector<12x12xf32> -> vector<12x12xf32>
    %cst_37 = arith.constant 0.353553385 : f32
    %97 = vector.broadcast %cst_37 : f32 to vector<12x12xf32>
    %98 = arith.mulf %96, %97 : vector<12x12xf32>
    %99 = arith.addf %98, %6 : vector<12x12xf32>
    %cst_38 = arith.constant dense<0xFF800000> : vector<12xf32>
    %100 = vector.multi_reduction <maximumf>, %99, %cst_38 [1] : vector<12x12xf32> to vector<12xf32>
    %101 = vector.shape_cast %100 : vector<12xf32> to vector<12x1xf32>
    %102 = vector.broadcast %101 : vector<12x1xf32> to vector<12x12xf32>
    %103 = arith.subf %99, %102 : vector<12x12xf32>
    %104 = math.exp %103 : vector<12x12xf32>
    %cst_39 = arith.constant dense<0.000000e+00> : vector<12xf32>
    %105 = vector.multi_reduction <add>, %104, %cst_39 [1] : vector<12x12xf32> to vector<12xf32>
    %106 = vector.shape_cast %105 : vector<12xf32> to vector<12x1xf32>
    %107 = tpu.reciprocal %106 {approx = true} : vector<12x1xf32> -> vector<12x1xf32>
    %108 = vector.broadcast %107 : vector<12x1xf32> to vector<12x12xf32>
    %109 = arith.mulf %104, %108 : vector<12x12xf32>
    %110 = arith.truncf %109 : vector<12x12xf32> to vector<12x12xbf16>
    %111 = vector.extract_strided_slice %93 {offsets = [0, 0], sizes = [12, 8], strides = [1, 1]} : vector<12x32xbf16> to vector<12x8xbf16>
    %cst_40 = arith.constant dense<0.000000e+00> : vector<12x8xf32>
    %112 = tpu.matmul %110, %111, %cst_40 {dimension_numbers = #tpu.dot_dimension_numbers<[1], [0], [0], [1], [0, 0, 1, 1], [], []>} : vector<12x12xbf16>, vector<12x8xbf16>, vector<12x8xf32> -> vector<12x8xf32>
    %113 = vector.extract_strided_slice %13 {offsets = [0, 8], sizes = [12, 8], strides = [1, 1]} : vector<12x96xbf16> to vector<12x8xbf16>
    %114 = vector.extract_strided_slice %13 {offsets = [0, 40], sizes = [12, 8], strides = [1, 1]} : vector<12x96xbf16> to vector<12x8xbf16>
    %cst_41 = arith.constant dense<0.000000e+00> : vector<12x12xf32>
    %115 = tpu.matmul %113, %114, %cst_41 {dimension_numbers = #tpu.dot_dimension_numbers<[1], [1], [0], [0], [0, 0, 1, 0], [], []>} : vector<12x8xbf16>, vector<12x8xbf16>, vector<12x12xf32> -> vector<12x12xf32>
    %cst_42 = arith.constant 0.353553385 : f32
    %116 = vector.broadcast %cst_42 : f32 to vector<12x12xf32>
    %117 = arith.mulf %115, %116 : vector<12x12xf32>
    %118 = arith.addf %117, %6 : vector<12x12xf32>
    %cst_43 = arith.constant dense<0xFF800000> : vector<12xf32>
    %119 = vector.multi_reduction <maximumf>, %118, %cst_43 [1] : vector<12x12xf32> to vector<12xf32>
    %120 = vector.shape_cast %119 : vector<12xf32> to vector<12x1xf32>
    %121 = vector.broadcast %120 : vector<12x1xf32> to vector<12x12xf32>
    %122 = arith.subf %118, %121 : vector<12x12xf32>
    %123 = math.exp %122 : vector<12x12xf32>
    %cst_44 = arith.constant dense<0.000000e+00> : vector<12xf32>
    %124 = vector.multi_reduction <add>, %123, %cst_44 [1] : vector<12x12xf32> to vector<12xf32>
    %125 = vector.shape_cast %124 : vector<12xf32> to vector<12x1xf32>
    %126 = tpu.reciprocal %125 {approx = true} : vector<12x1xf32> -> vector<12x1xf32>
    %127 = vector.broadcast %126 : vector<12x1xf32> to vector<12x12xf32>
    %128 = arith.mulf %123, %127 : vector<12x12xf32>
    %129 = arith.truncf %128 : vector<12x12xf32> to vector<12x12xbf16>
    %130 = vector.extract_strided_slice %93 {offsets = [0, 8], sizes = [12, 8], strides = [1, 1]} : vector<12x32xbf16> to vector<12x8xbf16>
    %cst_45 = arith.constant dense<0.000000e+00> : vector<12x8xf32>
    %131 = tpu.matmul %129, %130, %cst_45 {dimension_numbers = #tpu.dot_dimension_numbers<[1], [0], [0], [1], [0, 0, 1, 1], [], []>} : vector<12x12xbf16>, vector<12x8xbf16>, vector<12x8xf32> -> vector<12x8xf32>
    %132 = vector.extract_strided_slice %13 {offsets = [0, 16], sizes = [12, 8], strides = [1, 1]} : vector<12x96xbf16> to vector<12x8xbf16>
    %133 = vector.extract_strided_slice %13 {offsets = [0, 48], sizes = [12, 8], strides = [1, 1]} : vector<12x96xbf16> to vector<12x8xbf16>
    %cst_46 = arith.constant dense<0.000000e+00> : vector<12x12xf32>
    %134 = tpu.matmul %132, %133, %cst_46 {dimension_numbers = #tpu.dot_dimension_numbers<[1], [1], [0], [0], [0, 0, 1, 0], [], []>} : vector<12x8xbf16>, vector<12x8xbf16>, vector<12x12xf32> -> vector<12x12xf32>
    %cst_47 = arith.constant 0.353553385 : f32
    %135 = vector.broadcast %cst_47 : f32 to vector<12x12xf32>
    %136 = arith.mulf %134, %135 : vector<12x12xf32>
    %137 = arith.addf %136, %6 : vector<12x12xf32>
    %cst_48 = arith.constant dense<0xFF800000> : vector<12xf32>
    %138 = vector.multi_reduction <maximumf>, %137, %cst_48 [1] : vector<12x12xf32> to vector<12xf32>
    %139 = vector.shape_cast %138 : vector<12xf32> to vector<12x1xf32>
    %140 = vector.broadcast %139 : vector<12x1xf32> to vector<12x12xf32>
    %141 = arith.subf %137, %140 : vector<12x12xf32>
    %142 = math.exp %141 : vector<12x12xf32>
    %cst_49 = arith.constant dense<0.000000e+00> : vector<12xf32>
    %143 = vector.multi_reduction <add>, %142, %cst_49 [1] : vector<12x12xf32> to vector<12xf32>
    %144 = vector.shape_cast %143 : vector<12xf32> to vector<12x1xf32>
    %145 = tpu.reciprocal %144 {approx = true} : vector<12x1xf32> -> vector<12x1xf32>
    %146 = vector.broadcast %145 : vector<12x1xf32> to vector<12x12xf32>
    %147 = arith.mulf %142, %146 : vector<12x12xf32>
    %148 = arith.truncf %147 : vector<12x12xf32> to vector<12x12xbf16>
    %149 = vector.extract_strided_slice %93 {offsets = [0, 16], sizes = [12, 8], strides = [1, 1]} : vector<12x32xbf16> to vector<12x8xbf16>
    %cst_50 = arith.constant dense<0.000000e+00> : vector<12x8xf32>
    %150 = tpu.matmul %148, %149, %cst_50 {dimension_numbers = #tpu.dot_dimension_numbers<[1], [0], [0], [1], [0, 0, 1, 1], [], []>} : vector<12x12xbf16>, vector<12x8xbf16>, vector<12x8xf32> -> vector<12x8xf32>
    %151 = vector.extract_strided_slice %13 {offsets = [0, 24], sizes = [12, 8], strides = [1, 1]} : vector<12x96xbf16> to vector<12x8xbf16>
    %152 = vector.extract_strided_slice %13 {offsets = [0, 56], sizes = [12, 8], strides = [1, 1]} : vector<12x96xbf16> to vector<12x8xbf16>
    %cst_51 = arith.constant dense<0.000000e+00> : vector<12x12xf32>
    %153 = tpu.matmul %151, %152, %cst_51 {dimension_numbers = #tpu.dot_dimension_numbers<[1], [1], [0], [0], [0, 0, 1, 0], [], []>} : vector<12x8xbf16>, vector<12x8xbf16>, vector<12x12xf32> -> vector<12x12xf32>
    %cst_52 = arith.constant 0.353553385 : f32
    %154 = vector.broadcast %cst_52 : f32 to vector<12x12xf32>
    %155 = arith.mulf %153, %154 : vector<12x12xf32>
    %156 = arith.addf %155, %6 : vector<12x12xf32>
    %cst_53 = arith.constant dense<0xFF800000> : vector<12xf32>
    %157 = vector.multi_reduction <maximumf>, %156, %cst_53 [1] : vector<12x12xf32> to vector<12xf32>
    %158 = vector.shape_cast %157 : vector<12xf32> to vector<12x1xf32>
    %159 = vector.broadcast %158 : vector<12x1xf32> to vector<12x12xf32>
    %160 = arith.subf %156, %159 : vector<12x12xf32>
    %161 = math.exp %160 : vector<12x12xf32>
    %cst_54 = arith.constant dense<0.000000e+00> : vector<12xf32>
    %162 = vector.multi_reduction <add>, %161, %cst_54 [1] : vector<12x12xf32> to vector<12xf32>
    %163 = vector.shape_cast %162 : vector<12xf32> to vector<12x1xf32>
    %164 = tpu.reciprocal %163 {approx = true} : vector<12x1xf32> -> vector<12x1xf32>
    %165 = vector.broadcast %164 : vector<12x1xf32> to vector<12x12xf32>
    %166 = arith.mulf %161, %165 : vector<12x12xf32>
    %167 = arith.truncf %166 : vector<12x12xf32> to vector<12x12xbf16>
    %168 = vector.extract_strided_slice %93 {offsets = [0, 24], sizes = [12, 8], strides = [1, 1]} : vector<12x32xbf16> to vector<12x8xbf16>
    %cst_55 = arith.constant dense<0.000000e+00> : vector<12x8xf32>
    %169 = tpu.matmul %167, %168, %cst_55 {dimension_numbers = #tpu.dot_dimension_numbers<[1], [0], [0], [1], [0, 0, 1, 1], [], []>} : vector<12x12xbf16>, vector<12x8xbf16>, vector<12x8xf32> -> vector<12x8xf32>
    %170 = tpu.concatenate %112, %131, %150, %169 in 1 : vector<12x8xf32>, vector<12x8xf32>, vector<12x8xf32>, vector<12x8xf32> -> vector<12x32xf32>
    %171 = vector.extract_strided_slice %12 {offsets = [0, 0], sizes = [12, 64], strides = [1, 1]} : vector<12x96xf32> to vector<12x64xf32>
    %172 = tpu.concatenate %171, %170 in 1 : vector<12x64xf32>, vector<12x32xf32> -> vector<12x96xf32>
    %c0_56 = arith.constant 0 : index
    %c0_57 = arith.constant 0 : index
    %c0_58 = arith.constant 0 : index
    %173 = vector.load %arg10[%c0_56, %c0_57, %c0_58] : memref<1x12x96xf32, #tpu.memory_space<vmem>>, vector<1x12x96xf32>
    %174 = vector.shape_cast %173 : vector<1x12x96xf32> to vector<12x96xf32>
    %175 = vector.shape_cast %172 : vector<12x96xf32> to vector<1x12x96xf32>
    tpu.vector_store %arg10[%c0_56, %c0_57, %c0_58], %175 {strides = array<i32>} : memref<1x12x96xf32, #tpu.memory_space<vmem>>, vector<1x12x96xf32>,
    %cst_59 = arith.constant dense<0.000000e+00> : vector<64x32xf32>
    %176 = tpu.matmul %3, %91, %cst_59 {dimension_numbers = #tpu.dot_dimension_numbers<[1], [0], [0], [1], [0, 0, 1, 1], [], []>} : vector<64x80xbf16>, vector<80x32xbf16>, vector<64x32xf32> -> vector<64x32xf32>
    %177 = arith.truncf %176 : vector<64x32xf32> to vector<64x32xbf16>
    %c0_60 = arith.constant 0 : index
    %c0_61 = arith.constant 0 : index
    %178 = vector.load %arg3[%c0_60, %c0_61] : memref<32x32xbf16, #tpu.memory_space<vmem>>, vector<32x32xbf16>
    %cst_62 = arith.constant dense<0.000000e+00> : vector<64x32xf32>
    %179 = tpu.matmul %177, %178, %cst_62 {dimension_numbers = #tpu.dot_dimension_numbers<[1], [0], [0], [1], [0, 0, 1, 1], [], []>} : vector<64x32xbf16>, vector<32x32xbf16>, vector<64x32xf32> -> vector<64x32xf32>
    %c0_63 = arith.constant 0 : index
    %c0_64 = arith.constant 0 : index
    %180 = vector.load %arg9[%c0_63, %c0_64] : memref<64x32xf32, #tpu.memory_space<vmem>>, vector<64x32xf32>
    tpu.vector_store %arg9[%c0_63, %c0_64], %179 {strides = array<i32>} : memref<64x32xf32, #tpu.memory_space<vmem>>, vector<64x32xf32>,
    return
  }
  func.func @transform_0(%arg0: i32) -> (i32, i32) {
    %c0_i32 = arith.constant 0 : i32
    %c0_i32_0 = arith.constant 0 : i32
    return %arg0, %c0_i32 : i32, i32
  }
  func.func @transform_1(%arg0: i32) -> (i32, i32) {
    %c0_i32 = arith.constant 0 : i32
    %c0_i32_0 = arith.constant 0 : i32
    %c0_i32_1 = arith.constant 0 : i32
    return %c0_i32, %c0_i32_0 : i32, i32
  }
  func.func @transform_2(%arg0: i32) -> (i32, i32) {
    %c0_i32 = arith.constant 0 : i32
    %c0_i32_0 = arith.constant 0 : i32
    %c0_i32_1 = arith.constant 0 : i32
    return %c0_i32, %c0_i32_0 : i32, i32
  }
  func.func @transform_3(%arg0: i32) -> (i32, i32) {
    %c0_i32 = arith.constant 0 : i32
    %c0_i32_0 = arith.constant 0 : i32
    %c0_i32_1 = arith.constant 0 : i32
    return %c0_i32, %c0_i32_0 : i32, i32
  }
  func.func @transform_4(%arg0: i32) -> (i32, i32) {
    %c0_i32 = arith.constant 0 : i32
    %c0_i32_0 = arith.constant 0 : i32
    %c0_i32_1 = arith.constant 0 : i32
    return %c0_i32, %c0_i32_0 : i32, i32
  }
  func.func @transform_5(%arg0: i32) -> (i32, i32) {
    %c0_i32 = arith.constant 0 : i32
    %c0_i32_0 = arith.constant 0 : i32
    %c0_i32_1 = arith.constant 0 : i32
    return %c0_i32, %c0_i32_0 : i32, i32
  }
  func.func @transform_6(%arg0: i32) -> (i32, i32) {
    %c0_i32 = arith.constant 0 : i32
    %c0_i32_0 = arith.constant 0 : i32
    %c0_i32_1 = arith.constant 0 : i32
    return %c0_i32, %c0_i32_0 : i32, i32
  }
  func.func @transform_7(%arg0: i32) -> (i32, i32) {
    %c0_i32 = arith.constant 0 : i32
    %c0_i32_0 = arith.constant 0 : i32
    %c0_i32_1 = arith.constant 0 : i32
    return %c0_i32, %c0_i32_0 : i32, i32
  }
  func.func @transform_8(%arg0: i32) -> (i32, i32) {
    %c0_i32 = arith.constant 0 : i32
    %c0_i32_0 = arith.constant 0 : i32
    return %arg0, %c0_i32 : i32, i32
  }
  func.func @transform_9(%arg0: i32) -> (i32, i32, i32) {
    %c0_i32 = arith.constant 0 : i32
    %c0_i32_0 = arith.constant 0 : i32
    %c0_i32_1 = arith.constant 0 : i32
    return %arg0, %c0_i32, %c0_i32_0 : i32, i32, i32
  }
}

</mosaic_0001>

<bundles_post_ra>
// kernel: tpu_custom_call.1
= control target key start
LH: loop header
LB: loop body
LE: loop exit
PB: predicated region body
PF: predicated region fallthrough
CT: control target
= control target key end

     0   :  { %s4170_s30 = smov 0   ;;  %s5459_s0 = inlined_call_operand.vmem [shape: f32[256,32], index: 0, kind: input, shape index: {}]   ;;  %s5460_s1 = inlined_call_operand.vmem [shape: bf16[32,96], index: 1, kind: input, shape index: {}]   ;;  %s5461_s2 = inlined_call_operand.vmem [shape: bf16[32,32], index: 2, kind: input, shape index: {}]   ;;  %s5462_s3 = inlined_call_operand.vmem [shape: bf16[80,64], index: 3, kind: input, shape index: {}]   ;;  %s5463_s4 = inlined_call_operand.vmem [shape: bf16[64,80], index: 4, kind: input, shape index: {}]   ;;  %s5464_s5 = inlined_call_operand.vmem [shape: bf16[12,80], index: 5, kind: input, shape index: {}]   ;;  %s5465_s6 = inlined_call_operand.vmem [shape: f32[80,80], index: 6, kind: input, shape index: {}]   ;;  %s5466_s7 = inlined_call_operand.vmem [shape: f32[12,12], index: 7, kind: input, shape index: {}]   ;;  %s5467_s8 = inlined_call_operand.vmem [shape: f32[256,32], index: 8, kind: output, shape index: {0}]   ;;  %s5468_s9 = inlined_call_operand.vmem [shape: f32[4,12,96], index: 9, kind: output, shape index: {1}]  }
   0x1 LB: > { %s4176_s10 = sadd.s32 4294967295, %s4102_s30   ;;  %p3161_p0 = scmp.ge.s32.totalorder %s4102_s30, 1  ;;  %s4102_s30 = sphi %s4170_s30, %s20_s30  }
   0x2   : > { %p291_p1 = scmp.lt.s32.totalorder %s4102_s30, 5 }
   0x4   : > { %p292_p2 = pnand %p3161_p0, %p291_p1 }
   0x6   : > { %295 = sbr.rel (%p292_p2) target bundleno = 2788 (0xae4), region = 52 }
   0xd   : > { %s3162_s11 = sshll.u32 %s4176_s10, 3  ;;  %v5469_v0 = vmov 0.0   ;;  %vm4105_vm0 = vmmov 0   ;;  %v3894_v1 = vld [vmem:[%s5460_s1] sm:$0xff]   ;;  %vm419_vm1 = vcmask 523264   ;;  %v3890_v15 = vld [vmem:[%s5462_s3 + $0x8] sm:$0xff]  }
   0xe   : > { %3392 = vmatprep.subr.bf16.mxu0 %v5469_v0  ;;  %p333_p3 = scmp.lt.s32.totalorder %s3162_s11, 31  ;;  %3400 = vmatprep.mubr.msk.bf16.mxu0 %vm4105_vm0, %v5469_v0  ;;  %v3889_v14 = vld [vmem:[%s5462_s3] sm:$0xff]   ;;  %v3891_v16 = vld [vmem:[%s5462_s3 + $0x10] sm:$0xff]   ;;  %v3892_v17 = vld [vmem:[%s5462_s3 + $0x18] sm:$0xff]   ;;  %vm529_vm2 = vcmask 261120   ;;  %s4106_s13 = smov 96  }
   0xf   : > { %3420 = vmatprep.subr.bf16.mxu1 %v5469_v0  ;;  %3424 = vmatprep.mubr.msk.bf16.mxu1 %vm4105_vm0, %v5469_v0  ;;  %v3893_v18 = vld [vmem:[%s5462_s3 + $0x20] sm:$0xff]   ;;  %v3895_v19 = vld [vmem:[%s5460_s1 + $0x8] sm:$0xff]   ;;  %s4107_s14 = smov 88   ;;  %s4109_s16 = smov 120   ;;  %vm628_vm3 = vcmask 654336   ;;  %vm689_vm4 = vcmask 64512  }
  0x10   : > { %s5496_s11 = smov (!%p333_p3, %s3162_s11), 31  ;;  %3421 = vmatpush3.bf16.msra.mxu1 %v3894_v1  ;;  %s4110_s17 = smov 72   ;;  %vm2244_vm5 = vcmask 130048   ;;  %vm2255_vm6 = vcmask 195584   ;;  %vm2395_vm7 = vcmask 1045504   ;;  %vm2367_vm8 = vcmask 97280  }
  0x11   : > { %s3163_s12 = sshll.u32 %s5496_s11, 3  ;;  %3422 = vmatprep.subr.bf16.mxu1 %v5469_v0  ;;  %s4111_s18 = smov 112   ;;  %vm2371_vm9 = vcmask 93184   ;;  %vm2862_vm10 = vcmask 785408   ;;  %vm2864_vm11 = vcmask 781312  }
  0x12   : > { %s336_s15 = scalar_lea.vmem %s5459_s0, %s3163_s12  ;;  %s4112_s19 = smov 104  }
  0x13   : > { %v350_v2 = vld [vmem:[%s336_s15] sm:$0xff]  ;;  %v351_v3 = vld [vmem:[%s336_s15 + $0x8] sm:$0xff]  ;;  %v352_v4 = vld [vmem:[%s336_s15 + $0x10] sm:$0xff]  ;;  %s4113_s22 = smov 64   ;;  %s4114_s23 = smov 56  }
  0x14   : > { %v358_v5 = vpack.c.bf16 %v351_v3, %v350_v2  ;;  %v353_v6 = vld [vmem:[%s336_s15 + $0x18] sm:$0xff]  ;;  %v354_v7 = vld [vmem:[%s336_s15 + $0x20] sm:$0xff]  ;;  %v355_v8 = vld [vmem:[%s336_s15 + $0x28] sm:$0xff]  ;;  %3423 = vmatpush3.bf16.msra.mxu1 %v3895_v19  ;;  %s4115_s24 = smov 48   ;;  %s4116_s29 = smov 40  }
  0x15   : > { %v359_v9 = vpack.c.bf16 %v353_v6, %v352_v4  ;;  %v360_v10 = vpack.c.bf16 %v355_v8, %v354_v7  ;;  %v356_v11 = vld [vmem:[%s336_s15 + $0x30] sm:$0xff]  ;;  %v357_v12 = vld [vmem:[%s336_s15 + $0x38] sm:$0xff]  ;;  %3444 = vmatprep.subr.bf16.mxu1 %v5469_v0  ;;  %s4108_s15 = smov 80   ;;  %v3896_v7 = vld [vmem:[%s5464_s5] sm:$0x3f]   ;;  %s4118_s20 = smov 16  }
  0x16   : > { %3393 = vmatpush3.bf16.msra.mxu0 %v358_v5  ;;  %v361_v13 = vpack.c.bf16 %v357_v12, %v356_v11  ;;  %s4119_s21 = smov 24   ;;  %p344_p4 = scmp.lt.s32.totalorder %s4176_s10, 3 }
  0x17   : > { %3394 = vmatprep.subr.bf16.mxu0 %v5469_v0 }
  0x18   : > { %s5498_s10 = smov (!%p344_p4, %s4176_s10), 3 }
  0x19   : > { %s3252_s11 = sshll.u32 %s5498_s10, 4 }
  0x1a   : > { %3395 = vmatpush3.bf16.msra.mxu0 %v359_v9 }
  0x1b   : > { %3396 = vmatprep.subr.bf16.mxu0 %v5469_v0 }
  0x1e   : > { %3397 = vmatpush3.bf16.msra.mxu0 %v360_v10 }
  0x1f   : > { %3398 = vmatprep.subr.bf16.mxu0 %v5469_v0 }
  0x22   : > { %3399 = vmatpush3.bf16.msra.mxu0 %v361_v13 }
  0x23   : > { %3458 = vmatprep.subr.bf16.mxu0 %v5469_v0 }
  0x25   : > { %3401 = vmatmul.mubr.msk.bf16.vlgmr.msra.gmra.mrb[0].mxu0 %vm419_vm1, %v3889_v14 }
  0x26   : > { %3404 = vmatprep.mubr.msk.bf16.mxu0 %vm4105_vm0, %v5469_v0 }
  0x2d   : > { %3405 = vmatmul.mubr.msk.bf16.gmra.mrb[4].mxu0 %vm419_vm1, %v3890_v15 }
  0x2e   : > { %3408 = vmatprep.mubr.msk.bf16.mxu0 %vm4105_vm0, %v5469_v0 }
  0x35   : > { %3409 = vmatmul.mubr.msk.bf16.gmra.mrb[8].mxu0 %vm419_vm1, %v3891_v16 }
  0x36   : > { %3412 = vmatprep.mubr.msk.bf16.mxu0 %vm4105_vm0, %v5469_v0 }
  0x3d   : > { %3413 = vmatmul.mubr.msk.bf16.gmra.mrb[12].mxu0 %vm419_vm1, %v3892_v17 }
  0x3e   : > { %3416 = vmatprep.mubr.msk.bf16.mxu0 %vm4105_vm0, %v5469_v0 }
  0x45   : > { %3417 = vmatmul.mubr.msk.bf16.gmra.mrb[16].mxu0 %vm419_vm1, %v3893_v18 }
  0x46   : > { %3468 = vmatprep.mubr.msk.bf16.mxu0 %vm4105_vm0, %v5469_v0 }
  0xf8   : > { %v469_v20 = vpop.f32.mrb[0].mxu0 }
  0xf9   : > { %v3402_v21 = vpop.f32.mrb[1].mxu0 }
  0xfa   : > { %v472_v22 = vpop.f32.mrb[2].mxu0 }
  0xfb   : > { %v508_v23 = vpack.c.bf16 %v472_v22, %v469_v20  ;;  %v3403_v24 = vpop.f32.mrb[3].mxu0 }
  0xfd   : > { %3425 = vmatmul.mubr.msk.bf16.vlgmr.msra.gmra.mrb[0].mxu1 %vm529_vm2, %v508_v23 }
  0xfe   : > { %3428 = vmatprep.mubr.msk.bf16.mxu1 %vm4105_vm0, %v5469_v0 }
 0x100   : > { %v477_v25 = vpop.f32.mrb[4].mxu0 }
 0x101   : > { %v3406_v26 = vpop.f32.mrb[5].mxu0 }
 0x102   : > { %v480_v27 = vpop.f32.mrb[6].mxu0 }
 0x103   : > { %v509_v28 = vpack.c.bf16 %v480_v27, %v477_v25  ;;  %v3407_v29 = vpop.f32.mrb[7].mxu0 }
 0x105   : > { %3429 = vmatmul.mubr.msk.bf16.gmra.mrb[4].mxu1 %vm529_vm2, %v509_v28 }
 0x106   : > { %3432 = vmatprep.mubr.msk.bf16.mxu1 %vm4105_vm0, %v5469_v0 }
 0x108   : > { %v485_v30 = vpop.f32.mrb[8].mxu0 }
 0x109   : > { %v3410_v31 = vpop.f32.mrb[9].mxu0 }
 0x10a   : > { %v488_v32 = vpop.f32.mrb[10].mxu0 }
 0x10b   : > { %v510_v33 = vpack.c.bf16 %v488_v32, %v485_v30  ;;  %v3411_v34 = vpop.f32.mrb[11].mxu0 }
 0x10d   : > { %3433 = vmatmul.mubr.msk.bf16.gmra.mrb[8].mxu1 %vm529_vm2, %v510_v33 }
 0x10e   : > { %3436 = vmatprep.mubr.msk.bf16.mxu1 %vm4105_vm0, %v5469_v0 }
 0x110   : > { %v493_v35 = vpop.f32.mrb[12].mxu0 }
 0x111   : > { %v3414_v36 = vpop.f32.mrb[13].mxu0 }
 0x112   : > { %v496_v37 = vpop.f32.mrb[14].mxu0 }
 0x113   : > { %v511_v38 = vpack.c.bf16 %v496_v37, %v493_v35  ;;  %v3415_v39 = vpop.f32.mrb[15].mxu0 }
 0x115   : > { %3437 = vmatmul.mubr.msk.bf16.gmra.mrb[12].mxu1 %vm529_vm2, %v511_v38 }
 0x116   : > { %3440 = vmatprep.mubr.msk.bf16.mxu1 %vm4105_vm0, %v5469_v0 }
 0x118   : > { %v501_v40 = vpop.f32.mrb[16].mxu0 }
 0x119   : > { %v3418_v41 = vpop.f32.mrb[17].mxu0 }
 0x11a   : > { %v504_v42 = vpop.f32.mrb[18].mxu0 }
 0x11b   : > { %v512_v43 = vpack.c.bf16 %v504_v42, %v501_v40  ;;  %v3419_v44 = vpop.f32.mrb[19].mxu0 }
 0x11d   : > { %3441 = vmatmul.mubr.msk.bf16.gmra.mrb[16].mxu1 %vm529_vm2, %v512_v43 }
 0x11e   : > { %3454 = vmatprep.mubr.msk.bf16.mxu1 %vm4105_vm0, %v5469_v0 }
 0x1d0   : > { %v579_v45 = vpop.f32.mrb[0].mxu1 }
 0x1d1   : > { %v3426_v46 = vpop.f32.mrb[1].mxu1 }
 0x1d2   : > { %v582_v47 = vpop.f32.mrb[2].mxu1 }
 0x1d3   : > { %v4252_v48 = vpack.c.bf16 %v582_v47, %v579_v45  ;;  %v3427_v49 = vpop.f32.mrb[3].mxu1 }
 0x1d5   : > { %679 = vrot.lane.b32.xlu0 %v4252_v48, %s4106_s13  ;;  %3445 = vmatpush3.bf16.msra.mxu1 %v4252_v48 }
 0x1d6   : > { %3446 = vmatprep.subr.bf16.mxu1 %v5469_v0 }
 0x1d8   : > { %v587_v50 = vpop.f32.mrb[4].mxu1 }
 0x1d9   : > { %v3430_v51 = vpop.f32.mrb[5].mxu1 }
 0x1da   : > { %v590_v52 = vpop.f32.mrb[6].mxu1 }
 0x1db   : > { %v4258_v53 = vpack.c.bf16 %v590_v52, %v587_v50  ;;  %v3431_v54 = vpop.f32.mrb[7].mxu1 }
 0x1dd   : > { %681 = vrot.lane.b32.xlu0 %v4258_v53, %s4106_s13  ;;  %3447 = vmatpush3.bf16.msra.mxu1 %v4258_v53 }
 0x1de   : > { %3448 = vmatprep.subr.bf16.mxu1 %v5469_v0 }
 0x1e0   : > { %v595_v55 = vpop.f32.mrb[8].mxu1 }
 0x1e1   : > { %v3434_v56 = vpop.f32.mrb[9].mxu1 }
 0x1e2   : > { %v598_v57 = vpop.f32.mrb[10].mxu1 }
 0x1e3   : > { %v4264_v58 = vpack.c.bf16 %v598_v57, %v595_v55  ;;  %v3435_v59 = vpop.f32.mrb[11].mxu1 }
 0x1e5   : > { %683 = vrot.lane.b32.xlu1 %v4264_v58, %s4106_s13  ;;  %3449 = vmatpush3.bf16.msra.mxu1 %v4264_v58 }
 0x1e6   : > { %3450 = vmatprep.subr.bf16.mxu1 %v5469_v0 }
 0x1e8   : > { %v603_v60 = vpop.f32.mrb[12].mxu1 }
 0x1e9   : > { %v3438_v61 = vpop.f32.mrb[13].mxu1 }
 0x1ea   : > { %v606_v62 = vpop.f32.mrb[14].mxu1 }
 0x1eb   : > { %v4270_v63 = vpack.c.bf16 %v606_v62, %v603_v60  ;;  %v3439_v1 = vpop.f32.mrb[15].mxu1 }
 0x1ed   : > { %685 = vrot.lane.b32.xlu1 %v4270_v63, %s4106_s13  ;;  %3451 = vmatpush3.bf16.msra.mxu1 %v4270_v63 }
 0x1ee   : > { %3452 = vmatprep.subr.bf16.mxu1 %v5469_v0 }
 0x1f0   : > { %v611_v2 = vpop.f32.mrb[16].mxu1 }
 0x1f1   : > { %1041 = vrot.lane.b32.xlu1 %v4252_v48, %s4107_s14  ;;  %v3442_v3 = vpop.f32.mrb[17].mxu1 }
 0x1f2   : > { %v614_v4 = vpop.f32.mrb[18].mxu1 }
 0x1f3   : > { %v4278_v5 = vpack.c.bf16 %v614_v4, %v611_v2  ;;  %v3443_v6 = vpop.f32.mrb[19].mxu1 }
 0x1f5   : > { %5476 = vst [vmem:[#allocation2_spill] sm:$0xff] %v4278_v5  ;;  %1045 = vrot.lane.b32.xlu1 %v4264_v58, %s4107_s14  ;;  %687 = vrot.lane.b32.xlu0 %v4278_v5, %s4106_s13 }
 0x1f6   : > { %3453 = vmatpush3.bf16.msra.mxu1 %v4278_v5 }
 0x1f7   : > { %3488 = vmatprep.subr.bf16.mxu1 %v5469_v0 }
 0x1f9   : > { %1049 = vrot.lane.b32.xlu1 %v4278_v5, %s4107_s14  ;;  %1043 = vrot.lane.b32.xlu0 %v4258_v53, %s4107_s14 }
 0x1fa   : > { %3455 = vmatmul.mubr.msk.bf16.vlgmr.msra.gmra.mrb[20].mxu1 %vm628_vm3, %v3896_v7 }
 0x1fb   : > { %3498 = vmatprep.mubr.msk.bf16.mxu1 %vm4105_vm0, %v5469_v0 }
 0x1fd   : > { %1402 = vrot.lane.b32.xlu1 %v4252_v48, %s4108_s15  ;;  %1047 = vrot.lane.b32.xlu0 %v4270_v63, %s4107_s14 }
 0x201   : > { %1404 = vrot.lane.b32.xlu1 %v4258_v53, %s4108_s15  ;;  %1031 = vrot.lane.b32.xlu0 %v4252_v48, %s4109_s16 }
 0x205   : > { %1406 = vrot.lane.b32.xlu1 %v4264_v58, %s4108_s15  ;;  %1033 = vrot.lane.b32.xlu0 %v4258_v53, %s4109_s16 }
 0x209   : > { %1408 = vrot.lane.b32.xlu1 %v4270_v63, %s4108_s15  ;;  %1035 = vrot.lane.b32.xlu0 %v4264_v58, %s4109_s16 }
 0x20d   : > { %1410 = vrot.lane.b32.xlu1 %v4278_v5, %s4108_s15  ;;  %1037 = vrot.lane.b32.xlu0 %v4270_v63, %s4109_s16 }
 0x211   : > { %1763 = vrot.lane.b32.xlu1 %v4252_v48, %s4110_s17  ;;  %1039 = vrot.lane.b32.xlu0 %v4278_v5, %s4109_s16 }
 0x215   : > { %1765 = vrot.lane.b32.xlu1 %v4258_v53, %s4110_s17  ;;  %1392 = vrot.lane.b32.xlu0 %v4252_v48, %s4111_s18 }
 0x219   : > { %1767 = vrot.lane.b32.xlu1 %v4264_v58, %s4110_s17  ;;  %1394 = vrot.lane.b32.xlu0 %v4258_v53, %s4111_s18 }
 0x21d   : > { %1769 = vrot.lane.b32.xlu1 %v4270_v63, %s4110_s17  ;;  %1396 = vrot.lane.b32.xlu0 %v4264_v58, %s4111_s18 }
 0x221   : > { %1771 = vrot.lane.b32.xlu1 %v4278_v5, %s4110_s17  ;;  %1398 = vrot.lane.b32.xlu0 %v4270_v63, %s4111_s18 }
 0x225   : > { %1755 = vrot.lane.b32.xlu1 %v4258_v53, %s4112_s19  ;;  %1400 = vrot.lane.b32.xlu0 %v4278_v5, %s4111_s18 }
 0x229   : > { %1759 = vrot.lane.b32.xlu1 %v4270_v63, %s4112_s19  ;;  %1753 = vrot.lane.b32.xlu0 %v4252_v48, %s4112_s19 }
 0x22d   : > { %930 = vrot.lane.b32.xlu1 %v4258_v53, %s4113_s22  ;;  %1757 = vrot.lane.b32.xlu0 %v4264_v58, %s4112_s19 }
 0x231   : > { %934 = vrot.lane.b32.xlu1 %v4270_v63, %s4113_s22  ;;  %1761 = vrot.lane.b32.xlu0 %v4278_v5, %s4112_s19 }
 0x235   : > { %1289 = vrot.lane.b32.xlu1 %v4252_v48, %s4114_s23  ;;  %928 = vrot.lane.b32.xlu0 %v4252_v48, %s4113_s22 }
 0x239   : > { %1295 = vrot.lane.b32.xlu1 %v4270_v63, %s4114_s23  ;;  %932 = vrot.lane.b32.xlu0 %v4264_v58, %s4113_s22 }
 0x23d   : > { %1652 = vrot.lane.b32.xlu1 %v4258_v53, %s4115_s24  ;;  %1291 = vrot.lane.b32.xlu0 %v4258_v53, %s4114_s23 }
 0x241   : > { %1656 = vrot.lane.b32.xlu1 %v4270_v63, %s4115_s24  ;;  %1293 = vrot.lane.b32.xlu0 %v4264_v58, %s4114_s23 }
 0x245   : > { %1650 = vrot.lane.b32.xlu0 %v4252_v48, %s4115_s24 }
 0x247   : > { %v680_v8 = vpop.permute.xlu0 %679 }
 0x248   : > { %v706_v9 = vsel %vm689_vm4, %v680_v8, 0 }
 0x249   : > { %3459 = vmatpush3.bf16.xpose.msra.mxu0 %v706_v9  ;;  %1654 = vrot.lane.b32.xlu0 %v4264_v58, %s4115_s24 }
 0x24a   : > { %3460 = vmatprep.subr.bf16.mxu0 %v5469_v0 }
 0x24d   : > { %936 = vrot.lane.b32.xlu0 %v4278_v5, %s4113_s22 }
 0x24f   : > { %v682_v10 = vpop.permute.xlu0 %681 }
 0x250   : > { %v709_v11 = vsel %vm689_vm4, %v682_v10, 0 }
 0x251   : > { %3461 = vmatpush3.bf16.xpose.msra.mxu0 %v709_v11  ;;  %1297 = vrot.lane.b32.xlu0 %v4278_v5, %s4114_s23 }
 0x252   : > { %3462 = vmatprep.subr.bf16.mxu0 %v5469_v0 }
 0x257   : > { %v684_v12 = vpop.permute.xlu1 %683 }
 0x258   : > { %v712_v13 = vsel %vm689_vm4, %v684_v12, 0 }
 0x259   : > { %3463 = vmatpush3.bf16.xpose.msra.mxu0 %v712_v13 }
 0x25a   : > { %3464 = vmatprep.subr.bf16.mxu0 %v5469_v0 }
 0x25f   : > { %v686_v14 = vpop.permute.xlu1 %685 }
 0x260   : > { %v715_v15 = vsel %vm689_vm4, %v686_v14, 0 }
 0x261   : > { %3465 = vmatpush3.bf16.xpose.msra.mxu0 %v715_v15  ;;  %v4540_v15 = vld [vmem:[%s5465_s6] sm:$0xff] }
 0x262   : > { %3466 = vmatprep.subr.bf16.mxu0 %v5469_v0 }
 0x263   : > { %v1042_v16 = vpop.permute.xlu1 %1041 }
 0x264   : > { %v1067_v24 = vsel %vm689_vm4, %v1042_v16, 0 }
 0x267   : > { %v1046_v17 = vpop.permute.xlu1 %1045  ;;  %v688_v18 = vpop.permute.xlu0 %687 }
 0x268   : > { %v718_v19 = vsel %vm689_vm4, %v688_v18, 0  ;;  %v1073_v34 = vsel %vm689_vm4, %v1046_v17, 0 }
 0x269   : > { %3467 = vmatpush3.bf16.xpose.msra.mxu0 %v718_v19  ;;  %v4545_v19 = vld [vmem:[%s5465_s6 + $0x8] sm:$0xff] }
 0x26a   : > { %3518 = vmatprep.subr.bf16.mxu0 %v5469_v0 }
 0x26b   : > { %v1050_v20 = vpop.permute.xlu1 %1049  ;;  %v1044_v21 = vpop.permute.xlu0 %1043 }
 0x26c   : > { %v1070_v29 = vsel %vm689_vm4, %v1044_v21, 0  ;;  %v1079_v43 = vsel %vm689_vm4, %v1050_v20, 0 }
 0x26f   : > { %v1403_v22 = vpop.permute.xlu1 %1402  ;;  %v1048_v23 = vpop.permute.xlu0 %1047 }
 0x270   : > { %3469 = vmatmul.mubr.msk.bf16.vlgmr.msra.gmra.mrb[20].mxu0 %vm689_vm4, %v4252_v48  ;;  %v1076_v39 = vsel %vm689_vm4, %v1048_v23, 0  ;;  %v1428_v47 = vsel %vm689_vm4, %v1403_v22, 0 }
 0x271   : > { %3519 = vmatpush3.bf16.xpose.msra.mxu0 %v1067_v24  ;;  %3472 = vmatprep.mubr.msk.bf16.mxu0 %vm4105_vm0, %v5469_v0 }
 0x272   : > { %3520 = vmatprep.subr.bf16.mxu0 %v5469_v0 }
 0x273   : > { %v1405_v25 = vpop.permute.xlu1 %1404  ;;  %v1032_v26 = vpop.permute.xlu0 %1031 }
 0x274   : > { %v1431_v54 = vsel %vm689_vm4, %v1405_v25, 0 }
 0x277   : > { %v1407_v27 = vpop.permute.xlu1 %1406  ;;  %v1034_v28 = vpop.permute.xlu0 %1033 }
 0x278   : > { %3473 = vmatmul.mubr.msk.bf16.gmra.mrb[24].mxu0 %vm689_vm4, %v4258_v53  ;;  %v1434_v59 = vsel %vm689_vm4, %v1407_v27, 0  ;;  %v4560_v27 = vld [vmem:[%s5465_s6 + $0x10] sm:$0xff] }
 0x279   : > { %3521 = vmatpush3.bf16.xpose.msra.mxu0 %v1070_v29  ;;  %3476 = vmatprep.mubr.msk.bf16.mxu0 %vm4105_vm0, %v5469_v0 }
 0x27a   : > { %3522 = vmatprep.subr.bf16.mxu0 %v5469_v0 }
 0x27b   : > { %v1409_v30 = vpop.permute.xlu1 %1408  ;;  %v1036_v31 = vpop.permute.xlu0 %1035 }
 0x27c   : > { %v1437_v1 = vsel %vm689_vm4, %v1409_v30, 0 }
 0x27f   : > { %v4393_v32 = vpop.permute.xlu1 %1410  ;;  %v1038_v33 = vpop.permute.xlu0 %1037 }
 0x280   : > { %3477 = vmatmul.mubr.msk.bf16.gmra.mrb[28].mxu0 %vm689_vm4, %v4264_v58  ;;  %v1440_v6 = vsel %vm689_vm4, %v4393_v32, 0 }
 0x281   : > { %3523 = vmatpush3.bf16.xpose.msra.mxu0 %v1073_v34  ;;  %3480 = vmatprep.mubr.msk.bf16.mxu0 %vm4105_vm0, %v5469_v0 }
 0x282   : > { %3524 = vmatprep.subr.bf16.mxu0 %v5469_v0 }
 0x283   : > { %v4401_v35 = vpop.permute.xlu1 %1763  ;;  %v1040_v36 = vpop.permute.xlu0 %1039 }
 0x284   : > { %v1789_v9 = vsel %vm689_vm4, %v4401_v35, 0 }
 0x287   : > { %v4403_v37 = vpop.permute.xlu1 %1765  ;;  %v4405_v38 = vpop.permute.xlu0 %1392 }
 0x288   : > { %3481 = vmatmul.mubr.msk.bf16.gmra.mrb[32].mxu0 %vm689_vm4, %v4270_v63  ;;  %v1792_v10 = vsel %vm689_vm4, %v4403_v37, 0 }
 0x289   : > { %3525 = vmatpush3.bf16.xpose.msra.mxu0 %v1076_v39  ;;  %3484 = vmatprep.mubr.msk.bf16.mxu0 %vm4105_vm0, %v5469_v0  ;;  %v4580_v39 = vld [vmem:[%s5465_s6 + $0x20] sm:$0xff] }
 0x28a   : > { %3526 = vmatprep.subr.bf16.mxu0 %v5469_v0 }
 0x28b   : > { %v4413_v40 = vpop.permute.xlu0 %1394  ;;  %v4415_v41 = vpop.permute.xlu1 %1767 }
 0x28c   : > { %v1795_v11 = vsel %vm689_vm4, %v4415_v41, 0 }
 0x28f   : > { %v4417_v42 = vpop.permute.xlu0 %1396  ;;  %v4425_v44 = vpop.permute.xlu1 %1769 }
 0x290   : > { %3485 = vmatmul.mubr.msk.bf16.gmra.mrb[36].mxu0 %vm689_vm4, %v4278_v5  ;;  %v1798_v12 = vsel %vm689_vm4, %v4425_v44, 0 }
 0x291   : > { %3527 = vmatpush3.bf16.xpose.msra.mxu0 %v1079_v43  ;;  %3528 = vmatprep.mubr.msk.bf16.mxu0 %vm4105_vm0, %v5469_v0  ;;  %v4585_v43 = vld [vmem:[%s5465_s6 + $0x28] sm:$0xff] }
 0x292   : > { %3578 = vmatprep.subr.bf16.mxu0 %v5469_v0 }
 0x293   : > { %v4427_v45 = vpop.permute.xlu0 %1398  ;;  %v4433_v49 = vpop.permute.xlu1 %1771 }
 0x294   : > { %v1801_v13 = vsel %vm689_vm4, %v4433_v49, 0 }
 0x297   : > { %v4429_v46 = vpop.permute.xlu0 %1400  ;;  %v4440_v51 = vpop.permute.xlu1 %1755 }
 0x298   : > { %3529 = vmatmul.mubr.msk.bf16.vlgmr.msra.gmra.mrb[40].mxu0 %vm689_vm4, %v1032_v26 }
 0x299   : > { %3579 = vmatpush3.bf16.xpose.msra.mxu0 %v1428_v47  ;;  %3532 = vmatprep.mubr.msk.bf16.mxu0 %vm4105_vm0, %v5469_v0 }
 0x29a   : > { %3580 = vmatprep.subr.bf16.mxu0 %v5469_v0 }
 0x29b   : > { %v4438_v50 = vpop.permute.xlu0 %1753  ;;  %v4451_v56 = vpop.permute.xlu1 %1759 }
 0x29f   : > { %v4442_v52 = vpop.permute.xlu0 %1757  ;;  %v931_v60 = vpop.permute.xlu1 %930 }
 0x2a0   : > { %3533 = vmatmul.mubr.msk.bf16.gmra.mrb[44].mxu0 %vm689_vm4, %v1034_v28 }
 0x2a1   : > { %3581 = vmatpush3.bf16.xpose.msra.mxu0 %v1431_v54  ;;  %3536 = vmatprep.mubr.msk.bf16.mxu0 %vm4105_vm0, %v5469_v0 }
 0x2a2   : > { %3582 = vmatprep.subr.bf16.mxu0 %v5469_v0 }
 0x2a3   : > { %v4449_v55 = vpop.permute.xlu0 %1761  ;;  %v935_v2 = vpop.permute.xlu1 %934 }
 0x2a7   : > { %v929_v57 = vpop.permute.xlu0 %928 }
 0x2a8   : > { %3489 = vmatpush3.bf16.msra.mxu1 %v929_v57  ;;  %3537 = vmatmul.mubr.msk.bf16.gmra.mrb[48].mxu0 %vm689_vm4, %v1036_v31  ;;  %v4565_v31 = vld [vmem:[%s5465_s6 + $0x18] sm:$0xff] }
 0x2a9   : > { %3583 = vmatpush3.bf16.xpose.msra.mxu0 %v1434_v59  ;;  %3490 = vmatprep.subr.bf16.mxu1 %v5469_v0  ;;  %v4605_v57 = vld [vmem:[%s5465_s6 + $0x38] sm:$0xff] }
 0x2aa   : > { %3540 = vmatprep.mubr.msk.bf16.mxu0 %vm4105_vm0, %v5469_v0  ;;  %3584 = vmatprep.subr.bf16.mxu0 %v5469_v0 }
 0x2ab   : > { %v933_v61 = vpop.permute.xlu0 %932 }
 0x2ac   : > { %3491 = vmatpush3.bf16.msra.mxu1 %v931_v60 }
 0x2ad   : > { %3492 = vmatprep.subr.bf16.mxu1 %v5469_v0 }
 0x2af   : > { %v4460_v62 = vpop.permute.xlu0 %1291 }
 0x2b0   : > { %3493 = vmatpush3.bf16.msra.mxu1 %v933_v61  ;;  %3541 = vmatmul.mubr.msk.bf16.gmra.mrb[52].mxu0 %vm689_vm4, %v1038_v33 }
 0x2b1   : > { %3585 = vmatpush3.bf16.xpose.msra.mxu0 %v1437_v1  ;;  %3494 = vmatprep.subr.bf16.mxu1 %v5469_v0 }
 0x2b2   : > { %3544 = vmatprep.mubr.msk.bf16.mxu0 %vm4105_vm0, %v5469_v0  ;;  %3586 = vmatprep.subr.bf16.mxu0 %v5469_v0 }
 0x2b3   : > { %v4468_v3 = vpop.permute.xlu0 %1293 }
 0x2b4   : > { %3495 = vmatpush3.bf16.msra.mxu1 %v935_v2 }
 0x2b5   : > { %3496 = vmatprep.subr.bf16.mxu1 %v5469_v0 }
 0x2b7   : > { %v4471_v4 = vpop.permute.xlu0 %1650 }
 0x2b8   : > { %5477 = vst [vmem:[#allocation3_spill] sm:$0xff] %v4471_v4  ;;  %3545 = vmatmul.mubr.msk.bf16.gmra.mrb[56].mxu0 %vm689_vm4, %v1040_v36 }
 0x2b9   : > { %3587 = vmatpush3.bf16.xpose.msra.mxu0 %v1440_v6  ;;  %3588 = vmatprep.mubr.msk.bf16.mxu0 %vm4105_vm0, %v5469_v0 }
 0x2ba   : > { %3638 = vmatprep.subr.bf16.mxu0 %v5469_v0 }
 0x2bb   : > { %v4479_v7 = vpop.permute.xlu0 %1654 }
 0x2bc   : > { %5478 = vst [vmem:[#allocation4_spill] sm:$0xff] %v4479_v7 }
 0x2bf   : > { %v937_v8 = vpop.permute.xlu0 %936 }
 0x2c0   : > { %3497 = vmatpush3.bf16.msra.mxu1 %v937_v8  ;;  %3589 = vmatmul.mubr.msk.bf16.vlgmr.msra.gmra.mrb[60].mxu0 %vm689_vm4, %v4405_v38 }
 0x2c1   : > { %3639 = vmatpush3.bf16.xpose.msra.mxu0 %v1789_v9  ;;  %3592 = vmatprep.mubr.msk.bf16.mxu0 %vm4105_vm0, %v5469_v0  ;;  %v4620_v9 = vld [vmem:[%s5465_s6 + $0x40] sm:$0xff] }
 0x2c2   : > { %3640 = vmatprep.subr.bf16.mxu0 %v5469_v0  ;;  %3548 = vmatprep.subr.bf16.mxu1 %v5469_v0 }
 0x2c8   : > { %3593 = vmatmul.mubr.msk.bf16.gmra.mrb[64].mxu0 %vm689_vm4, %v4413_v40 }
 0x2c9   : > { %3641 = vmatpush3.bf16.xpose.msra.mxu0 %v1792_v10  ;;  %3596 = vmatprep.mubr.msk.bf16.mxu0 %vm4105_vm0, %v5469_v0 }
 0x2ca   : > { %3642 = vmatprep.subr.bf16.mxu0 %v5469_v0 }
 0x2d0   : > { %3597 = vmatmul.mubr.msk.bf16.gmra.mrb[68].mxu0 %vm689_vm4, %v4417_v42 }
 0x2d1   : > { %3643 = vmatpush3.bf16.xpose.msra.mxu0 %v1795_v11  ;;  %3600 = vmatprep.mubr.msk.bf16.mxu0 %vm4105_vm0, %v5469_v0 }
 0x2d2   : > { %3644 = vmatprep.subr.bf16.mxu0 %v5469_v0 }
 0x2d8   : > { %3601 = vmatmul.mubr.msk.bf16.gmra.mrb[72].mxu0 %vm689_vm4, %v4427_v45 }
 0x2d9   : > { %3645 = vmatpush3.bf16.xpose.msra.mxu0 %v1798_v12  ;;  %3604 = vmatprep.mubr.msk.bf16.mxu0 %vm4105_vm0, %v5469_v0 }
 0x2da   : > { %3646 = vmatprep.subr.bf16.mxu0 %v5469_v0 }
 0x2e0   : > { %3605 = vmatmul.mubr.msk.bf16.gmra.mrb[76].mxu0 %vm689_vm4, %v4429_v46 }
 0x2e1   : > { %3647 = vmatpush3.bf16.xpose.msra.mxu0 %v1801_v13  ;;  %3648 = vmatprep.mubr.msk.bf16.mxu0 %vm4105_vm0, %v5469_v0  ;;  %v4625_v13 = vld [vmem:[%s5465_s6 + $0x48] sm:$0xff] }
 0x2e2   : > { %3698 = vmatprep.subr.bf16.mxu0 %v5469_v0 }
 0x2e8   : > { %3649 = vmatmul.mubr.msk.bf16.vlgmr.msra.gmra.mrb[80].mxu0 %vm689_vm4, %v4438_v50 }
 0x2e9   : > { %3652 = vmatprep.mubr.msk.bf16.mxu0 %vm4105_vm0, %v5469_v0 }
 0x2f0   : > { %3653 = vmatmul.mubr.msk.bf16.gmra.mrb[84].mxu0 %vm689_vm4, %v4440_v51 }
 0x2f1   : > { %3656 = vmatprep.mubr.msk.bf16.mxu0 %vm4105_vm0, %v5469_v0 }
 0x2f8   : > { %3657 = vmatmul.mubr.msk.bf16.gmra.mrb[88].mxu0 %vm689_vm4, %v4442_v52  ;;  %v4600_v52 = vld [vmem:[%s5465_s6 + $0x30] sm:$0xff] }
 0x2f9   : > { %3660 = vmatprep.mubr.msk.bf16.mxu0 %vm4105_vm0, %v5469_v0 }
 0x300   : > { %3661 = vmatmul.mubr.msk.bf16.gmra.mrb[92].mxu0 %vm689_vm4, %v4451_v56 }
 0x301   : > { %3664 = vmatprep.mubr.msk.bf16.mxu0 %vm4105_vm0, %v5469_v0 }
 0x308   : > { %3665 = vmatmul.mubr.msk.bf16.gmra.mrb[96].mxu0 %vm689_vm4, %v4449_v55 }
 0x309   : > { %3708 = vmatprep.mubr.msk.bf16.mxu0 %vm4105_vm0, %v5469_v0  ;;  %v4773_v0 = vpop.permute.xlu0 %1297 }
 0x343   : > { %v754_v14 = vpop.f32.mrb[20].mxu0 }
 0x344   : > { %v793_v16 = vmul.f32 0.35355338, %v754_v14  ;;  %v3470_v17 = vpop.f32.mrb[21].mxu0 }
 0x345   : > { %v757_v18 = vpop.f32.mrb[22].mxu0 }
 0x346   : > { %v794_v20 = vmul.f32 0.35355338, %v757_v18  ;;  %v3471_v21 = vpop.f32.mrb[23].mxu0  ;;  %v4548_v22 = vadd.f32 %v793_v16, %v4540_v15 }
 0x348   : > { %v813_v23 = vsel %vm628_vm3, %v4548_v22, -inf  ;;  %v4553_v24 = vadd.f32 %v794_v20, %v4545_v19 }
 0x349   : > { %814 = vmax.xlane.f32.xlu1 %v813_v23 }
 0x34a   : > { %v816_v25 = vsel %vm628_vm3, %v4553_v24, -inf }
 0x34b   : > { %817 = vmax.xlane.f32.xlu0 %v816_v25  ;;  %v762_v26 = vpop.f32.mrb[24].mxu0 }
 0x34c   : > { %v795_v28 = vmul.f32 0.35355338, %v762_v26  ;;  %v3474_v29 = vpop.f32.mrb[25].mxu0 }
 0x34d   : > { %v765_v30 = vpop.f32.mrb[26].mxu0 }
 0x34e   : > { %v796_v32 = vmul.f32 0.35355338, %v765_v30  ;;  %v3475_v33 = vpop.f32.mrb[27].mxu0  ;;  %v4568_v34 = vadd.f32 %v795_v28, %v4560_v27 }
 0x350   : > { %v819_v35 = vsel %vm628_vm3, %v4568_v34, -inf  ;;  %v4573_v36 = vadd.f32 %v796_v32, %v4565_v31 }
 0x351   : > { %820 = vmax.xlane.f32.xlu0 %v819_v35 }
 0x352   : > { %v822_v37 = vsel %vm628_vm3, %v4573_v36, -inf }
 0x353   : > { %823 = vmax.xlane.f32.xlu1 %v822_v37  ;;  %v770_v38 = vpop.f32.mrb[28].mxu0 }
 0x354   : > { %v797_v40 = vmul.f32 0.35355338, %v770_v38  ;;  %v3478_v41 = vpop.f32.mrb[29].mxu0 }
 0x355   : > { %v773_v42 = vpop.f32.mrb[30].mxu0 }
 0x356   : > { %v798_v44 = vmul.f32 0.35355338, %v773_v42  ;;  %v3479_v45 = vpop.f32.mrb[31].mxu0  ;;  %v4588_v46 = vadd.f32 %v797_v40, %v4580_v39 }
 0x358   : > { %v825_v47 = vsel %vm628_vm3, %v4588_v46, -inf  ;;  %v4593_v49 = vadd.f32 %v798_v44, %v4585_v43 }
 0x359   : > { %826 = vmax.xlane.f32.xlu0 %v825_v47 }
 0x35a   : > { %v828_v50 = vsel %vm628_vm3, %v4593_v49, -inf }
 0x35b   : > { %829 = vmax.xlane.f32.xlu1 %v828_v50  ;;  %v778_v51 = vpop.f32.mrb[32].mxu0 }
 0x35c   : > { %v799_v54 = vmul.f32 0.35355338, %v778_v51  ;;  %v3482_v55 = vpop.f32.mrb[33].mxu0 }
 0x35d   : > { %v781_v56 = vpop.f32.mrb[34].mxu0 }
 0x35e   : > { %v800_v59 = vmul.f32 0.35355338, %v781_v56  ;;  %v3483_v60 = vpop.f32.mrb[35].mxu0  ;;  %v4608_v61 = vadd.f32 %v799_v54, %v4600_v52 }
 0x360   : > { %v831_v1 = vsel %vm628_vm3, %v4608_v61, -inf  ;;  %v4613_v2 = vadd.f32 %v800_v59, %v4605_v57 }
 0x361   : > { %832 = vmax.xlane.f32.xlu0 %v831_v1 }
 0x362   : > { %v834_v6 = vsel %vm628_vm3, %v4613_v2, -inf }
 0x363   : > { %835 = vmax.xlane.f32.xlu1 %v834_v6  ;;  %v786_v8 = vpop.f32.mrb[36].mxu0 }
 0x364   : > { %v801_v10 = vmul.f32 0.35355338, %v786_v8  ;;  %v3486_v11 = vpop.f32.mrb[37].mxu0 }
 0x365   : > { %v789_v12 = vpop.f32.mrb[38].mxu0 }
 0x366   : > { %v802_v14 = vmul.f32 0.35355338, %v789_v12  ;;  %v3487_v16 = vpop.f32.mrb[39].mxu0  ;;  %v4628_v17 = vadd.f32 %v801_v10, %v4620_v9 }
 0x368   : > { %v837_v18 = vsel %vm628_vm3, %v4628_v17, -inf  ;;  %v4633_v20 = vadd.f32 %v802_v14, %v4625_v13 }
 0x369   : > { %838 = vmax.xlane.f32.xlu0 %v837_v18 }
 0x36a   : > { %v840_v21 = vsel %vm628_vm3, %v4633_v20, -inf }
 0x36b   : > { %841 = vmax.xlane.f32.xlu1 %v840_v21  ;;  %v1115_v23 = vpop.f32.mrb[40].mxu0 }
 0x36c   : > { %v1154_v25 = vmul.f32 0.35355338, %v1115_v23  ;;  %v3530_v26 = vpop.f32.mrb[41].mxu0 }
 0x36d   : > { %v1118_v28 = vpop.f32.mrb[42].mxu0 }
 0x36e   : > { %v1155_v29 = vmul.f32 0.35355338, %v1118_v28  ;;  %v3531_v30 = vpop.f32.mrb[43].mxu0  ;;  %v4638_v32 = vadd.f32 %v1154_v25, %v4540_v15 }
 0x370   : > { %v1174_v33 = vsel %vm628_vm3, %v4638_v32, -inf  ;;  %v4643_v35 = vadd.f32 %v1155_v29, %v4545_v19 }
 0x371   : > { %1175 = vmax.xlane.f32.xlu0 %v1174_v33 }
 0x372   : > { %v1177_v37 = vsel %vm628_vm3, %v4643_v35, -inf }
 0x373   : > { %1178 = vmax.xlane.f32.xlu1 %v1177_v37  ;;  %v1123_v38 = vpop.f32.mrb[44].mxu0 }
 0x374   : > { %v1156_v40 = vmul.f32 0.35355338, %v1123_v38  ;;  %v3534_v41 = vpop.f32.mrb[45].mxu0 }
 0x375   : > { %v1126_v42 = vpop.f32.mrb[46].mxu0 }
 0x376   : > { %v1157_v44 = vmul.f32 0.35355338, %v1126_v42  ;;  %v3535_v45 = vpop.f32.mrb[47].mxu0  ;;  %v4648_v47 = vadd.f32 %v1156_v40, %v4560_v27 }
 0x378   : > { %v1180_v50 = vsel %vm628_vm3, %v4648_v47, -inf  ;;  %v4653_v51 = vadd.f32 %v1157_v44, %v4565_v31 }
 0x379   : > { %1181 = vmax.xlane.f32.xlu0 %v1180_v50 }
 0x37a   : > { %v1183_v54 = vsel %vm628_vm3, %v4653_v51, -inf }
 0x37b   : > { %1184 = vmax.xlane.f32.xlu1 %v1183_v54  ;;  %v1131_v55 = vpop.f32.mrb[48].mxu0 }
 0x37c   : > { %v1158_v56 = vmul.f32 0.35355338, %v1131_v55  ;;  %v3538_v59 = vpop.f32.mrb[49].mxu0 }
 0x37d   : > { %v1134_v60 = vpop.f32.mrb[50].mxu0 }
 0x37e   : > { %v1159_v1 = vmul.f32 0.35355338, %v1134_v60  ;;  %v3539_v6 = vpop.f32.mrb[51].mxu0  ;;  %v4658_v8 = vadd.f32 %v1158_v56, %v4580_v39 }
 0x380   : > { %v1186_v10 = vsel %vm628_vm3, %v4658_v8, -inf  ;;  %v4663_v11 = vadd.f32 %v1159_v1, %v4585_v43 }
 0x381   : > { %1187 = vmax.xlane.f32.xlu0 %v1186_v10 }
 0x382   : > { %v1189_v12 = vsel %vm628_vm3, %v4663_v11, -inf }
 0x383   : > { %1190 = vmax.xlane.f32.xlu1 %v1189_v12  ;;  %v1139_v14 = vpop.f32.mrb[52].mxu0 }
 0x384   : > { %v1160_v16 = vmul.f32 0.35355338, %v1139_v14  ;;  %v3542_v18 = vpop.f32.mrb[53].mxu0 }
 0x385   : > { %v1142_v21 = vpop.f32.mrb[54].mxu0 }
 0x386   : > { %v1161_v23 = vmul.f32 0.35355338, %v1142_v21  ;;  %v3543_v25 = vpop.f32.mrb[55].mxu0  ;;  %v4668_v26 = vadd.f32 %v1160_v16, %v4600_v52 }
 0x388   : > { %v1192_v28 = vsel %vm628_vm3, %v4668_v26, -inf  ;;  %v4673_v29 = vadd.f32 %v1161_v23, %v4605_v57 }
 0x389   : > { %1193 = vmax.xlane.f32.xlu0 %v1192_v28 }
 0x38a   : > { %v1195_v30 = vsel %vm628_vm3, %v4673_v29, -inf }
 0x38b   : > { %1196 = vmax.xlane.f32.xlu1 %v1195_v30  ;;  %v1147_v33 = vpop.f32.mrb[56].mxu0 }
 0x38c   : > { %v1162_v37 = vmul.f32 0.35355338, %v1147_v33  ;;  %v3546_v38 = vpop.f32.mrb[57].mxu0 }
 0x38d   : > { %v1150_v40 = vpop.f32.mrb[58].mxu0 }
 0x38e   : > { %v1163_v41 = vmul.f32 0.35355338, %v1150_v40  ;;  %v3547_v42 = vpop.f32.mrb[59].mxu0  ;;  %v4678_v44 = vadd.f32 %v1162_v37, %v4620_v9 }
 0x390   : > { %v1198_v45 = vsel %vm628_vm3, %v4678_v44, -inf  ;;  %v4683_v50 = vadd.f32 %v1163_v41, %v4625_v13 }
 0x391   : > { %1199 = vmax.xlane.f32.xlu0 %v1198_v45 }
 0x392   : > { %v1201_v54 = vsel %vm628_vm3, %v4683_v50, -inf }
 0x393   : > { %1202 = vmax.xlane.f32.xlu1 %v1201_v54  ;;  %v1476_v55 = vpop.f32.mrb[60].mxu0 }
 0x394   : > { %v1515_v56 = vmul.f32 0.35355338, %v1476_v55  ;;  %v3590_v59 = vpop.f32.mrb[61].mxu0 }
 0x395   : > { %v1479_v60 = vpop.f32.mrb[62].mxu0 }
 0x396   : > { %v1516_v1 = vmul.f32 0.35355338, %v1479_v60  ;;  %v3591_v6 = vpop.f32.mrb[63].mxu0  ;;  %v4688_v10 = vadd.f32 %v1515_v56, %v4540_v15 }
 0x398   : > { %v1535_v12 = vsel %vm628_vm3, %v4688_v10, -inf  ;;  %v4693_v14 = vadd.f32 %v1516_v1, %v4545_v19 }
 0x399   : > { %1536 = vmax.xlane.f32.xlu0 %v1535_v12 }
 0x39a   : > { %v1538_v16 = vsel %vm628_vm3, %v4693_v14, -inf }
 0x39b   : > { %1539 = vmax.xlane.f32.xlu1 %v1538_v16  ;;  %v1484_v18 = vpop.f32.mrb[64].mxu0 }
 0x39c   : > { %v1517_v21 = vmul.f32 0.35355338, %v1484_v18  ;;  %v3594_v23 = vpop.f32.mrb[65].mxu0 }
 0x39d   : > { %v1487_v25 = vpop.f32.mrb[66].mxu0 }
 0x39e   : > { %v1518_v28 = vmul.f32 0.35355338, %v1487_v25  ;;  %v3595_v30 = vpop.f32.mrb[67].mxu0  ;;  %v4698_v33 = vadd.f32 %v1517_v21, %v4560_v27 }
 0x3a0   : > { %v1541_v37 = vsel %vm628_vm3, %v4698_v33, -inf  ;;  %v4703_v38 = vadd.f32 %v1518_v28, %v4565_v31 }
 0x3a1   : > { %1542 = vmax.xlane.f32.xlu0 %v1541_v37 }
 0x3a2   : > { %v1544_v40 = vsel %vm628_vm3, %v4703_v38, -inf }
 0x3a3   : > { %1545 = vmax.xlane.f32.xlu1 %v1544_v40  ;;  %v1492_v41 = vpop.f32.mrb[68].mxu0 }
 0x3a4   : > { %v1519_v42 = vmul.f32 0.35355338, %v1492_v41  ;;  %v3598_v45 = vpop.f32.mrb[69].mxu0 }
 0x3a5   : > { %v1495_v54 = vpop.f32.mrb[70].mxu0 }
 0x3a6   : > { %v1520_v55 = vmul.f32 0.35355338, %v1495_v54  ;;  %v3599_v56 = vpop.f32.mrb[71].mxu0  ;;  %v4708_v59 = vadd.f32 %v1519_v42, %v4580_v39 }
 0x3a8   : > { %v1547_v60 = vsel %vm628_vm3, %v4708_v59, -inf  ;;  %v4713_v1 = vadd.f32 %v1520_v55, %v4585_v43 }
 0x3a9   : > { %1548 = vmax.xlane.f32.xlu0 %v1547_v60 }
 0x3aa   : > { %v1550_v6 = vsel %vm628_vm3, %v4713_v1, -inf }
 0x3ab   : > { %1551 = vmax.xlane.f32.xlu1 %v1550_v6  ;;  %v1500_v12 = vpop.f32.mrb[72].mxu0 }
 0x3ac   : > { %v1521_v16 = vmul.f32 0.35355338, %v1500_v12  ;;  %v3602_v18 = vpop.f32.mrb[73].mxu0 }
 0x3ad   : > { %v1503_v21 = vpop.f32.mrb[74].mxu0 }
 0x3ae   : > { %v1522_v23 = vmul.f32 0.35355338, %v1503_v21  ;;  %v3603_v25 = vpop.f32.mrb[75].mxu0  ;;  %v4718_v28 = vadd.f32 %v1521_v16, %v4600_v52 }
 0x3b0   : > { %v1553_v30 = vsel %vm628_vm3, %v4718_v28, -inf  ;;  %v4723_v37 = vadd.f32 %v1522_v23, %v4605_v57 }
 0x3b1   : > { %1554 = vmax.xlane.f32.xlu0 %v1553_v30 }
 0x3b2   : > { %v1556_v40 = vsel %vm628_vm3, %v4723_v37, -inf }
 0x3b3   : > { %1557 = vmax.xlane.f32.xlu1 %v1556_v40  ;;  %v1508_v41 = vpop.f32.mrb[76].mxu0 }
 0x3b4   : > { %v1523_v42 = vmul.f32 0.35355338, %v1508_v41  ;;  %v3606_v45 = vpop.f32.mrb[77].mxu0 }
 0x3b5   : > { %v1511_v54 = vpop.f32.mrb[78].mxu0 }
 0x3b6   : > { %v1524_v55 = vmul.f32 0.35355338, %v1511_v54  ;;  %v3607_v56 = vpop.f32.mrb[79].mxu0  ;;  %v4728_v60 = vadd.f32 %v1523_v42, %v4620_v9  ;;  %v4740_v42 = vpop.permute.xlu1 %1289 }
 0x3b8   : > { %v1559_v6 = vsel %vm628_vm3, %v4728_v60, -inf  ;;  %v4733_v12 = vadd.f32 %v1524_v55, %v4625_v13 }
 0x3b9   : > { %1560 = vmax.xlane.f32.xlu0 %v1559_v6 }
 0x3ba   : > { %v1562_v16 = vsel %vm628_vm3, %v4733_v12, -inf }
 0x3bb   : > { %1563 = vmax.xlane.f32.xlu1 %v1562_v16  ;;  %v1837_v18 = vpop.f32.mrb[80].mxu0 }
 0x3bc   : > { %v1876_v21 = vmul.f32 0.35355338, %v1837_v18  ;;  %v3650_v23 = vpop.f32.mrb[81].mxu0 }
 0x3bd   : > { %v1840_v25 = vpop.f32.mrb[82].mxu0  ;;  %v4749_v23 = vpop.permute.xlu1 %1295 }
 0x3be   : > { %v1877_v30 = vmul.f32 0.35355338, %v1840_v25  ;;  %v3651_v40 = vpop.f32.mrb[83].mxu0  ;;  %v4738_v41 = vadd.f32 %v1876_v21, %v4540_v15 }
 0x3c0   : > { %v1896_v45 = vsel %vm628_vm3, %v4738_v41, -inf  ;;  %v4745_v54 = vadd.f32 %v1877_v30, %v4545_v19 }
 0x3c1   : > { %1897 = vmax.xlane.f32.xlu1 %v1896_v45 }
 0x3c2   : > { %v1899_v16 = vsel %vm628_vm3, %v4745_v54, -inf }
 0x3c3   : > { %v1845_v55 = vpop.f32.mrb[84].mxu0 }
 0x3c4   : > { %v1878_v56 = vmul.f32 0.35355338, %v1845_v55  ;;  %v3654_v6 = vpop.f32.mrb[85].mxu0  ;;  %v4761_v55 = vpop.permute.xlu1 %1652 }
 0x3c5   : > { %1900 = vmax.xlane.f32.xlu1 %v1899_v16  ;;  %v1848_v18 = vpop.f32.mrb[86].mxu0  ;;  %5479 = vst [vmem:[#allocation5_spill] sm:$0xff] %v4761_v55 }
 0x3c6   : > { %v1879_v15 = vmul.f32 0.35355338, %v1848_v18  ;;  %v3655_v21 = vpop.f32.mrb[87].mxu0  ;;  %v4752_v25 = vadd.f32 %v1878_v56, %v4560_v27 }
 0x3c8   : > { %v1902_v19 = vsel %vm628_vm3, %v4752_v25, -inf  ;;  %v4757_v30 = vadd.f32 %v1879_v15, %v4565_v31 }
 0x3c9   : > { %1903 = vmax.xlane.f32.xlu0 %v1902_v19  ;;  %v4771_v19 = vpop.permute.xlu1 %1656 }
 0x3ca   : > { %v1905_v40 = vsel %vm628_vm3, %v4757_v30, -inf  ;;  %5480 = vst [vmem:[#allocation6_spill] sm:$0xff] %v4771_v19 }
 0x3cb   : > { %1906 = vmax.xlane.f32.xlu1 %v1905_v40  ;;  %v1853_v45 = vpop.f32.mrb[88].mxu0 }
 0x3cc   : > { %v1880_v6 = vmul.f32 0.35355338, %v1853_v45  ;;  %v3658_v16 = vpop.f32.mrb[89].mxu0 }
 0x3cd   : > { %v1856_v18 = vpop.f32.mrb[90].mxu0 }
 0x3ce   : > { %v1881_v21 = vmul.f32 0.35355338, %v1856_v18  ;;  %v3659_v27 = vpop.f32.mrb[91].mxu0  ;;  %v4764_v56 = vadd.f32 %v1880_v6, %v4580_v39 }
 0x3d0   : > { %v1908_v31 = vsel %vm628_vm3, %v4764_v56, -inf  ;;  %v4769_v15 = vadd.f32 %v1881_v21, %v4585_v43 }
 0x3d1   : > { %1909 = vmax.xlane.f32.xlu1 %v1908_v31 }
 0x3d2   : > { %v1911_v18 = vsel %vm628_vm3, %v4769_v15, -inf }
 0x3d3   : > { %v1861_v40 = vpop.f32.mrb[92].mxu0 }
 0x3d4   : > { %v1882_v45 = vmul.f32 0.35355338, %v1861_v40  ;;  %v3662_v16 = vpop.f32.mrb[93].mxu0 }
 0x3d5   : > { %1912 = vmax.xlane.f32.xlu1 %v1911_v18  ;;  %v1864_v39 = vpop.f32.mrb[94].mxu0 }
 0x3d6   : > { %v1883_v6 = vmul.f32 0.35355338, %v1864_v39  ;;  %v815_v27 = vpop.xlane.xlu1 %814  ;;  %v3663_v7 = vpop.f32.mrb[95].mxu0  ;;  %v4778_v55 = vadd.f32 %v1882_v45, %v4600_v52 }
 0x3d7   : > { %v843_v43 = vsub.f32 %v4548_v22, %v815_v27 }
 0x3d8   : > { %5481 = vst [vmem:[#allocation7_spill] sm:$0xff] %v4778_v55  ;;  %v818_v21 = vpop.xlane.xlu0 %817  ;;  %v1914_v31 = vsel %vm628_vm3, %v4778_v55, -inf  ;;  %v4784_v40 = vadd.f32 %v1883_v6, %v4605_v57 }
 0x3d9   : > { %v853_v16 = vmul.f32 1.442695, %v843_v43  ;;  %v844_v19 = vsub.f32 %v4553_v24, %v818_v21  ;;  %1915 = vmax.xlane.f32.xlu1 %v1914_v31 }
 0x3da   : > { %v1917_v52 = vsel %vm628_vm3, %v4784_v40, -inf }
 0x3db   : > { %3903 = vpow2.f32 %v853_v16  ;;  %v855_v18 = vmul.f32 1.442695, %v844_v19  ;;  %v1869_v39 = vpop.f32.mrb[96].mxu0 }
 0x3dc   : > { %v1884_v7 = vmul.f32 0.35355338, %v1869_v39  ;;  %v3666_v4 = vpop.f32.mrb[97].mxu0 }
 0x3dd   : > { %3905 = vpow2.f32 %v855_v18  ;;  %1918 = vmax.xlane.f32.xlu1 %v1917_v52  ;;  %v1872_v22 = vpop.f32.mrb[98].mxu0 }
 0x3de   : > { %v1885_v45 = vmul.f32 0.35355338, %v1872_v22  ;;  %v821_v27 = vpop.xlane.xlu0 %820  ;;  %v3667_v55 = vpop.f32.mrb[99].mxu0  ;;  %v4790_v57 = vadd.f32 %v1884_v7, %v4620_v9 }
 0x3df   : > { %v845_v24 = vsub.f32 %v4568_v34, %v821_v27 }
 0x3e0   : > { %v1920_v19 = vsel %vm628_vm3, %v4790_v57, -inf  ;;  %v4796_v6 = vadd.f32 %v1885_v45, %v4625_v13  ;;  %v824_v16 = vpop.xlane.xlu1 %823 }
 0x3e1   : > { %v857_v4 = vmul.f32 1.442695, %v845_v24  ;;  %1921 = vmax.xlane.f32.xlu0 %v1920_v19  ;;  %v846_v52 = vsub.f32 %v4573_v36, %v824_v16 }
 0x3e2   : > { %v1923_v43 = vsel %vm628_vm3, %v4796_v6, -inf }
 0x3e3   : > { %3907 = vpow2.f32 %v857_v4  ;;  %1924 = vmax.xlane.f32.xlu1 %v1923_v43  ;;  %v859_v27 = vmul.f32 1.442695, %v846_v52 }
 0x3e5   : > { %v4800_v21 = vpop.eup %3903  ;;  %3909 = vpow2.f32 %v859_v27 }
 0x3e6   : > { %v873_v9 = vsel %vm628_vm3, %v4800_v21, 0.0  ;;  %v827_v22 = vpop.xlane.xlu0 %826 }
 0x3e7   : > { %v4804_v55 = vpop.eup %3905  ;;  %874 = vadd.xlane.f32.xlu0 %v873_v9  ;;  %v847_v24 = vsub.f32 %v4588_v46, %v827_v22 }
 0x3e8   : > { %v876_v34 = vsel %vm628_vm3, %v4804_v55, 0.0  ;;  %v830_v18 = vpop.xlane.xlu1 %829 }
 0x3e9   : > { %877 = vadd.xlane.f32.xlu1 %v876_v34  ;;  %v848_v4 = vsub.f32 %v4593_v49, %v830_v18 }
 0x3ed   : > { %v4808_v13 = vpop.eup %3907 }
 0x3ee   : > { %5482 = vst [vmem:[#allocation8_spill] sm:$0xff] %v4808_v13  ;;  %v879_v31 = vsel %vm628_vm3, %v4808_v13, 0.0  ;;  %v833_v19 = vpop.xlane.xlu0 %832 }
 0x3ef   : > { %880 = vadd.xlane.f32.xlu0 %v879_v31  ;;  %v849_v9 = vsub.f32 %v4608_v61, %v833_v19  ;;  %v863_v31 = vmul.f32 1.442695, %v848_v4  ;;  %v4824_v61 = vpop.eup %3909 }
 0x3f0   : > { %v836_v39 = vpop.xlane.xlu1 %835 }
 0x3f1   : > { %v865_v36 = vmul.f32 1.442695, %v849_v9 }
 0x3f6   : > { %v839_v34 = vpop.xlane.xlu0 %838 }
 0x3f7   : > { %v851_v16 = vsub.f32 %v4628_v17, %v839_v34 }
 0x3f8   : > { %v842_v7 = vpop.xlane.xlu1 %841 }
 0x3f9   : > { %v869_v49 = vmul.f32 1.442695, %v851_v16  ;;  %v852_v18 = vsub.f32 %v4633_v20, %v842_v7 }
 0x3fa   : > { %2011 = vrot.lane.b32.xlu1 %v4252_v48, %s4116_s29  ;;  %v861_v48 = vmul.f32 1.442695, %v847_v24 }
 0x3fc   : > { %3911 = vpow2.f32 %v861_v48 }
 0x3fd   : > { %3913 = vpow2.f32 %v863_v31 }
 0x3fe   : > { %3915 = vpow2.f32 %v865_v36  ;;  %v1176_v27 = vpop.xlane.xlu0 %1175 }
 0x3ff   : > { %v1204_v17 = vsub.f32 %v4638_v32, %v1176_v27 }
 0x400   : > { %v1179_v45 = vpop.xlane.xlu1 %1178 }
 0x401   : > { %v1214_v7 = vmul.f32 1.442695, %v1204_v17  ;;  %v1205_v19 = vsub.f32 %v4643_v35, %v1179_v45 }
 0x403   : > { %v1216_v34 = vmul.f32 1.442695, %v1205_v19 }
 0x405   : > { %1658 = vrot.lane.b32.xlu0 %v4278_v5, %s4115_s24  ;;  %v850_v5 = vsub.f32 %v4613_v2, %v836_v39  ;;  %v871_v39 = vmul.f32 1.442695, %v852_v18  ;;  %s4117_s24 = smov 8  }
 0x406   : > { %v1182_v4 = vpop.xlane.xlu0 %1181 }
 0x407   : > { %v867_v52 = vmul.f32 1.442695, %v850_v5  ;;  %v882_v5 = vsel %vm628_vm3, %v4824_v61, 0.0  ;;  %v1206_v31 = vsub.f32 %v4648_v47, %v1182_v4 }
 0x408   : > { %v1185_v43 = vpop.xlane.xlu1 %1184 }
 0x409   : > { %3917 = vpow2.f32 %v867_v52  ;;  %v1218_v52 = vmul.f32 1.442695, %v1206_v31 }
 0x40a   : > { %3919 = vpow2.f32 %v869_v49 }
 0x40e   : > { %v1188_v49 = vpop.xlane.xlu0 %1187 }
 0x410   : > { %v1191_v13 = vpop.xlane.xlu1 %1190 }
 0x411   : > { %v1209_v46 = vsub.f32 %v4663_v11, %v1191_v13  ;;  %v4830_v11 = vpop.eup %3911 }
 0x412   : > { %v4832_v20 = vpop.eup %3913 }
 0x413   : > { %v1224_v24 = vmul.f32 1.442695, %v1209_v46  ;;  %v4837_v48 = vpop.eup %3915  ;;  %v888_v32 = vsel %vm628_vm3, %v4832_v20, 0.0  ;;  %v1207_v46 = vsub.f32 %v4653_v51, %v1185_v43 }
 0x414   : > { %v4841_v9 = vpop.eup %3917  ;;  %v891_v35 = vsel %vm628_vm3, %v4837_v48, 0.0 }
 0x415   : > { %3921 = vpow2.f32 %v1224_v24  ;;  %v4846_v45 = vpop.eup %3919  ;;  %v894_v36 = vsel %vm628_vm3, %v4841_v9, 0.0  ;;  %v1220_v24 = vmul.f32 1.442695, %v1207_v46 }
 0x416   : > { %3923 = vpow2.f32 %v871_v39  ;;  %v897_v47 = vsel %vm628_vm3, %v4846_v45, 0.0  ;;  %v1194_v39 = vpop.xlane.xlu0 %1193 }
 0x418   : > { %v1197_v22 = vpop.xlane.xlu1 %1196 }
 0x419   : > { %v1211_v2 = vsub.f32 %v4673_v29, %v1197_v22  ;;  %v885_v29 = vsel %vm628_vm3, %v4830_v11, 0.0 }
 0x41b   : > { %v1228_v13 = vmul.f32 1.442695, %v1211_v2  ;;  %v1208_v2 = vsub.f32 %v4658_v8, %v1188_v49 }
 0x41d   : > { %3925 = vpow2.f32 %v1228_v13  ;;  %v1210_v13 = vsub.f32 %v4668_v26, %v1194_v39 }
 0x41e   : > { %883 = vadd.xlane.f32.xlu1 %v882_v5  ;;  %3927 = vpow2.f32 %v1214_v7  ;;  %v1222_v5 = vmul.f32 1.442695, %v1208_v2 }
 0x41f   : > { %v4850_v16 = vpop.eup %3921  ;;  %3929 = vpow2.f32 %v1216_v34  ;;  %v1226_v19 = vmul.f32 1.442695, %v1210_v13 }
 0x420   : > { %v4855_v18 = vpop.eup %3923  ;;  %v1249_v22 = vsel %vm628_vm3, %v4850_v16, 0.0  ;;  %3931 = vpow2.f32 %v1218_v52  ;;  %v1200_v52 = vpop.xlane.xlu0 %1199 }
 0x421   : > { %v900_v51 = vsel %vm628_vm3, %v4855_v18, 0.0  ;;  %3933 = vpow2.f32 %v1220_v24 }
 0x422   : > { %886 = vadd.xlane.f32.xlu1 %v885_v29  ;;  %3935 = vpow2.f32 %v1222_v5 }
 0x423   : > { %3937 = vpow2.f32 %v1226_v19 }
 0x424   : > { %889 = vadd.xlane.f32.xlu0 %v888_v32  ;;  %v1203_v32 = vpop.xlane.xlu1 %1202 }
 0x426   : > { %892 = vadd.xlane.f32.xlu1 %v891_v35 }
 0x427   : > { %v4859_v27 = vpop.eup %3925 }
 0x428   : > { %895 = vadd.xlane.f32.xlu0 %v894_v36  ;;  %5483 = vst [vmem:[#allocation9_spill] sm:$0xff] %v4859_v27  ;;  %v4864_v43 = vpop.eup %3927  ;;  %v1255_v17 = vsel %vm628_vm3, %v4859_v27, 0.0  ;;  %v4881_v31 = vpop.xlane.xlu1 %1539 }
 0x429   : > { %v1234_v7 = vsel %vm628_vm3, %v4864_v43, 0.0  ;;  %v4871_v8 = vpop.eup %3929 }
 0x42a   : > { %898 = vadd.xlane.f32.xlu1 %v897_v47  ;;  %v1237_v4 = vsel %vm628_vm3, %v4871_v8, 0.0  ;;  %v4875_v29 = vpop.eup %3931 }
 0x42b   : > { %v1240_v26 = vsel %vm628_vm3, %v4875_v29, 0.0  ;;  %v4879_v34 = vpop.eup %3933 }
 0x42c   : > { %1250 = vadd.xlane.f32.xlu0 %v1249_v22  ;;  %v1243_v35 = vsel %vm628_vm3, %v4879_v34, 0.0  ;;  %v4885_v36 = vpop.eup %3935  ;;  %v1537_v22 = vpop.xlane.xlu0 %1536 }
 0x42d   : > { %v1246_v49 = vsel %vm628_vm3, %v4885_v36, 0.0  ;;  %v4891_v47 = vpop.eup %3937 }
 0x42e   : > { %901 = vadd.xlane.f32.xlu1 %v900_v51  ;;  %v1252_v2 = vsel %vm628_vm3, %v4891_v47, 0.0 }
 0x430   : > { %1256 = vadd.xlane.f32.xlu0 %v1255_v17  ;;  %v4887_v46 = vpop.xlane.xlu1 %1545  ;;  %v1543_v39 = vpop.xlane.xlu0 %1542 }
 0x432   : > { %1235 = vadd.xlane.f32.xlu1 %v1234_v7 }
 0x436   : > { %1238 = vadd.xlane.f32.xlu1 %v1237_v4  ;;  %v1549_v17 = vpop.xlane.xlu0 %1548 }
 0x437   : > { %v1569_v13 = vsub.f32 %v4708_v59, %v1549_v17 }
 0x438   : > { %v4893_v24 = vpop.xlane.xlu1 %1551 }
 0x439   : > { %v1583_v4 = vmul.f32 1.442695, %v1569_v13 }
 0x43a   : > { %1241 = vadd.xlane.f32.xlu1 %v1240_v26 }
 0x43b   : > { %3939 = vpow2.f32 %v1583_v4 }
 0x43e   : > { %1244 = vadd.xlane.f32.xlu1 %v1243_v35  ;;  %v1555_v7 = vpop.xlane.xlu0 %1554 }
 0x43f   : > { %v1571_v26 = vsub.f32 %v4718_v28, %v1555_v7 }
 0x440   : > { %v4899_v51 = vpop.xlane.xlu1 %1557 }
 0x442   : > { %1247 = vadd.xlane.f32.xlu1 %v1246_v49  ;;  %v1587_v49 = vmul.f32 1.442695, %v1571_v26 }
 0x444   : > { %3941 = vpow2.f32 %v1587_v49 }
 0x445   : > { %v4914_v17 = vpop.eup %3939 }
 0x446   : > { %2013 = vrot.lane.b32.xlu0 %v4258_v53, %s4116_s29  ;;  %1253 = vadd.xlane.f32.xlu1 %v1252_v2  ;;  %v1607_v7 = vsel %vm628_vm3, %v4914_v17, 0.0 }
 0x448   : > { %v1564_v5 = vpop.xlane.xlu1 %1563 }
 0x449   : > { %v1574_v53 = vsub.f32 %v4733_v12, %v1564_v5  ;;  %v1212_v12 = vsub.f32 %v4678_v44, %v1200_v52  ;;  %v4922_v5 = vpop.xlane.xlu0 %1560 }
 0x44b   : > { %v1593_v27 = vmul.f32 1.442695, %v1574_v53  ;;  %v1213_v53 = vsub.f32 %v4683_v50, %v1203_v32  ;;  %v1566_v50 = vsub.f32 %v4693_v14, %v4881_v31  ;;  %v1568_v14 = vsub.f32 %v4703_v38, %v4887_v46 }
 0x44c   : > { %v1572_v46 = vsub.f32 %v4723_v37, %v4899_v51 }
 0x44d   : > { %3943 = vpow2.f32 %v1593_v27  ;;  %v1232_v52 = vmul.f32 1.442695, %v1213_v53 }
 0x44e   : > { %v4902_v19 = vpop.xlane.xlu1 %1897  ;;  %v4919_v4 = vpop.eup %3941 }
 0x44f   : > { %5484 = vst [vmem:[#allocation10_spill] sm:$0xff] %v4919_v4  ;;  %v1613_v27 = vsel %vm628_vm3, %v4919_v4, 0.0 }
 0x452   : > { %v4905_v35 = vpop.xlane.xlu1 %1900 }
 0x457   : > { %2015 = vrot.lane.b32.xlu1 %v4264_v58, %s4116_s29  ;;  %v4928_v49 = vpop.eup %3943 }
 0x458   : > { %v4910_v2 = vpop.xlane.xlu1 %1906  ;;  %v1622_v44 = vsel %vm628_vm3, %v4928_v49, 0.0 }
 0x45e   : > { %v4912_v59 = vpop.xlane.xlu1 %1909 }
 0x462   : > { %v1913_v13 = vpop.xlane.xlu1 %1912 }
 0x463   : > { %v1931_v28 = vsub.f32 %v4769_v15, %v1913_v13  ;;  %v1230_v15 = vmul.f32 1.442695, %v1212_v12  ;;  %v4931_v13 = vpop.xlane.xlu0 %1903 }
 0x465   : > { %v1946_v58 = vmul.f32 1.442695, %v1931_v28  ;;  %1608 = vadd.xlane.f32.xlu0 %v1607_v7  ;;  %v1565_v28 = vsub.f32 %v4688_v10, %v1537_v22  ;;  %v1577_v10 = vmul.f32 1.442695, %v1566_v50  ;;  %v1567_v22 = vsub.f32 %v4698_v33, %v1543_v39 }
 0x466   : > { %v4924_v26 = vpop.xlane.xlu1 %1915  ;;  %v1570_v33 = vsub.f32 %v4713_v1, %v4893_v24 }
 0x467   : > { %3945 = vpow2.f32 %v1946_v58  ;;  %v1575_v12 = vmul.f32 1.442695, %v1565_v28 }
 0x468   : > { %3947 = vpow2.f32 %v1230_v15  ;;  %v1585_v38 = vmul.f32 1.442695, %v1570_v33 }
 0x469   : > { %1614 = vadd.xlane.f32.xlu0 %v1613_v27  ;;  %3949 = vpow2.f32 %v1232_v52  ;;  %v1579_v52 = vmul.f32 1.442695, %v1567_v22 }
 0x46a   : > { %v4936_v7 = vpop.xlane.xlu1 %1918  ;;  %3951 = vpow2.f32 %v1575_v12  ;;  %v1581_v12 = vmul.f32 1.442695, %v1568_v14  ;;  %v1573_v14 = vsub.f32 %v4728_v60, %v4922_v5  ;;  %v1926_v60 = vsub.f32 %v4738_v41, %v4902_v19 }
 0x46b   : > { %v1933_v33 = vsub.f32 %v4784_v40, %v4936_v7  ;;  %v1930_v7 = vsub.f32 %v4764_v56, %v4912_v59 }
 0x46c   : > { %v1591_v51 = vmul.f32 1.442695, %v1573_v14 }
 0x46d   : > { %1623 = vadd.xlane.f32.xlu0 %v1622_v44 }
 0x46e   : > { %v4938_v58 = vpop.xlane.xlu0 %1921 }
 0x470   : > { %v4944_v32 = vpop.xlane.xlu1 %1924 }
 0x471   : > { %v4940_v4 = vpop.eup %3945 }
 0x472   : > { %v1971_v27 = vsel %vm628_vm3, %v4940_v4, 0.0  ;;  %v4949_v44 = vpop.eup %3947 }
 0x473   : > { %1972 = vadd.xlane.f32.xlu0 %v1971_v27  ;;  %v1258_v31 = vsel %vm628_vm3, %v4949_v44, 0.0  ;;  %v4955_v28 = vpop.eup %3949 }
 0x474   : > { %v875_v15 = vpop.xlane.xlu0 %874  ;;  %v1261_v39 = vsel %vm628_vm3, %v4955_v28, 0.0  ;;  %v4961_v50 = vpop.eup %3951 }
 0x475   : > { %3953 = vrcp.f32 %v875_v15  ;;  %v1595_v1 = vsel %vm628_vm3, %v4961_v50, 0.0 }
 0x476   : > { %v878_v53 = vpop.xlane.xlu1 %877 }
 0x477   : > { %3955 = vrcp.f32 %v878_v53 }
 0x478   : > { %3957 = vpow2.f32 %v1577_v10 }
 0x479   : > { %3959 = vpow2.f32 %v1579_v52  ;;  %v1589_v52 = vmul.f32 1.442695, %v1572_v46 }
 0x47a   : > { %3961 = vpow2.f32 %v1581_v12  ;;  %v1927_v12 = vsub.f32 %v4745_v54, %v4905_v35 }
 0x47b   : > { %1259 = vadd.xlane.f32.xlu1 %v1258_v31  ;;  %3963 = vpow2.f32 %v1585_v38 }
 0x47c   : > { %3965 = vpow2.f32 %v1589_v52  ;;  %v881_v52 = vpop.xlane.xlu0 %880 }
 0x47d   : > { %3967 = vpow2.f32 %v1591_v51 }
 0x47f   : > { %1262 = vadd.xlane.f32.xlu1 %v1261_v39  ;;  %v3954_v27 = vpop.eup %3953  ;;  %v1929_v39 = vsub.f32 %v4757_v30, %v4910_v2 }
 0x480   : > { %v913_v10 = vmul.f32 %v3954_v27, %v4800_v21  ;;  %v1950_v27 = vmul.f32 1.442695, %v1933_v33 }
 0x481   : > { %v3956_v15 = vpop.eup %3955 }
 0x482   : > { %v914_v22 = vmul.f32 %v3956_v15, %v4804_v55  ;;  %v4969_v24 = vpop.eup %3957  ;;  %v5485_v55 = vmov 0.0   ;;  %v5486_v15 = vld [vmem:[#allocation7_spill] sm:$0xff] }
 0x483   : > { %1596 = vadd.xlane.f32.xlu1 %v1595_v1  ;;  %v1598_v37 = vsel %vm628_vm3, %v4969_v24, 0.0  ;;  %v4976_v21 = vpop.eup %3959  ;;  %v1932_v38 = vsub.f32 %v5486_v15, %v4924_v26 }
 0x484   : > { %v923_v53 = vpack.c.bf16 %v914_v22, %v913_v10  ;;  %v1601_v5 = vsel %vm628_vm3, %v4976_v21, 0.0  ;;  %v4988_v31 = vpop.eup %3961 }
 0x485   : > { %v1604_v41 = vsel %vm628_vm3, %v4988_v31, 0.0  ;;  %v4996_v19 = vpop.eup %3963 }
 0x486   : > { %3499 = vmatmul.mubr.msk.bf16.vlgmr.msra.gmra.mrb[24].mxu1 %vm628_vm3, %v923_v53  ;;  %v1610_v54 = vsel %vm628_vm3, %v4996_v19, 0.0  ;;  %v5006_v35 = vpop.eup %3965  ;;  %v5044_v53 = vpop.permute.xlu1 %2011 }
 0x487   : > { %3549 = vmatpush3.bf16.msra.mxu1 %v4740_v42  ;;  %1599 = vadd.xlane.f32.xlu1 %v1598_v37  ;;  %v1936_v42 = vmul.f32 1.442695, %v1926_v60  ;;  %v1616_v40 = vsel %vm628_vm3, %v5006_v35, 0.0 }
 0x488   : > { %3550 = vmatprep.subr.bf16.mxu1 %v5485_v55  ;;  %3502 = vmatprep.mubr.msk.bf16.mxu1 %vm4105_vm0, %v5485_v55 }
 0x489   : > { %2017 = vrot.lane.b32.xlu0 %v4270_v63, %s4116_s29  ;;  %3969 = vpow2.f32 %v1936_v42  ;;  %v1938_v63 = vmul.f32 1.442695, %v1927_v12 }
 0x48b   : > { %3551 = vmatpush3.bf16.msra.mxu1 %v4460_v62  ;;  %1602 = vadd.xlane.f32.xlu1 %v1601_v5  ;;  %v1928_v62 = vsub.f32 %v4752_v25, %v4931_v13  ;;  %3971 = vpow2.f32 %v1938_v63  ;;  %v1934_v25 = vsub.f32 %v4790_v57, %v4938_v58  ;;  %v5016_v13 = vpop.eup %3967  ;;  %v1935_v57 = vsub.f32 %v4796_v6, %v4944_v32 }
 0x48c   : > { %3552 = vmatprep.subr.bf16.mxu1 %v5485_v55  ;;  %v1619_v2 = vsel %vm628_vm3, %v5016_v13, 0.0  ;;  %v1948_v6 = vmul.f32 1.442695, %v1932_v38 }
 0x48d   : > { %v1952_v30 = vmul.f32 1.442695, %v1934_v25  ;;  %v1954_v46 = vmul.f32 1.442695, %v1935_v57 }
 0x48f   : > { %3553 = vmatpush3.bf16.msra.mxu1 %v4468_v3  ;;  %1605 = vadd.xlane.f32.xlu1 %v1604_v41  ;;  %v1940_v3 = vmul.f32 1.442695, %v1928_v62  ;;  %v5058_v41 = vpop.permute.xlu0 %1658 }
 0x490   : > { %3554 = vmatprep.subr.bf16.mxu1 %v5485_v55 }
 0x491   : > { %3973 = vpow2.f32 %v1940_v3 }
 0x492   : > { %3975 = vpow2.f32 %v1950_v27 }
 0x493   : > { %3555 = vmatpush3.bf16.msra.mxu1 %v4749_v23  ;;  %1611 = vadd.xlane.f32.xlu1 %v1610_v54  ;;  %v1942_v23 = vmul.f32 1.442695, %v1929_v39  ;;  %v5026_v58 = vpop.eup %3969 }
 0x494   : > { %3556 = vmatprep.subr.bf16.mxu1 %v5485_v55  ;;  %v1956_v56 = vsel %vm628_vm3, %v5026_v58, 0.0 }
 0x495   : > { %3977 = vpow2.f32 %v1942_v23  ;;  %v5032_v59 = vpop.eup %3971 }
 0x496   : > { %3979 = vpow2.f32 %v1952_v30  ;;  %v1959_v32 = vsel %vm628_vm3, %v5032_v59, 0.0  ;;  %v5487_v30 = vld [vmem:[#allocation8_spill] sm:$0xff] }
 0x497   : > { %3557 = vmatpush3.bf16.msra.mxu1 %v4773_v0  ;;  %1617 = vadd.xlane.f32.xlu1 %v1616_v40  ;;  %v1944_v0 = vmul.f32 1.442695, %v1930_v7 }
 0x498   : > { %3608 = vmatprep.subr.bf16.mxu1 %v5485_v55 }
 0x499   : > { %3981 = vpow2.f32 %v1944_v0 }
 0x49a   : > { %3983 = vpow2.f32 %v1954_v46 }
 0x49b   : > { %1620 = vadd.xlane.f32.xlu1 %v1619_v2  ;;  %v5036_v10 = vpop.eup %3973  ;;  %3985 = vpow2.f32 %v1948_v6 }
 0x49c   : > { %v5038_v22 = vpop.eup %3975  ;;  %v1962_v26 = vsel %vm628_vm3, %v5036_v10, 0.0  ;;  %3987 = vrcp.f32 %v881_v52 }
 0x49d   : > { %v1977_v14 = vsel %vm628_vm3, %v5038_v22, 0.0 }
 0x49f   : > { %1957 = vadd.xlane.f32.xlu1 %v1956_v56  ;;  %v5042_v1 = vpop.eup %3977 }
 0x4a0   : > { %v5048_v37 = vpop.eup %3979  ;;  %v1965_v51 = vsel %vm628_vm3, %v5042_v1, 0.0 }
 0x4a1   : > { %v1980_v42 = vsel %vm628_vm3, %v5048_v37, 0.0 }
 0x4a3   : > { %1960 = vadd.xlane.f32.xlu1 %v1959_v32  ;;  %v5052_v60 = vpop.eup %3981 }
 0x4a4   : > { %v5056_v12 = vpop.eup %3983  ;;  %v1968_v63 = vsel %vm628_vm3, %v5052_v60, 0.0 }
 0x4a5   : > { %v5062_v62 = vpop.eup %3985  ;;  %v1983_v54 = vsel %vm628_vm3, %v5056_v12, 0.0 }
 0x4a6   : > { %v1974_v39 = vsel %vm628_vm3, %v5062_v62, 0.0  ;;  %v3988_v25 = vpop.eup %3987 }
 0x4a7   : > { %1963 = vadd.xlane.f32.xlu1 %v1962_v26  ;;  %v915_v57 = vmul.f32 %v3988_v25, %v5487_v30  ;;  %v5090_v25 = vpop.f32.mrb[20].mxu1 }
 0x4a8   : > { %1978 = vadd.xlane.f32.xlu0 %v1977_v14 }
 0x4ab   : > { %1966 = vadd.xlane.f32.xlu1 %v1965_v51  ;;  %v884_v5 = vpop.xlane.xlu1 %883  ;;  %v5488_v51 = vld [vmem:[#allocation2_spill] sm:$0xff] }
 0x4ac   : > { %3989 = vrcp.f32 %v884_v5  ;;  %1981 = vadd.xlane.f32.xlu0 %v1980_v42 }
 0x4af   : > { %1969 = vadd.xlane.f32.xlu1 %v1968_v63  ;;  %v887_v33 = vpop.xlane.xlu1 %886 }
 0x4b0   : > { %1984 = vadd.xlane.f32.xlu0 %v1983_v54  ;;  %3991 = vrcp.f32 %v887_v33 }
 0x4b1   : > { %v890_v3 = vpop.xlane.xlu0 %889 }
 0x4b2   : > { %3993 = vrcp.f32 %v890_v3 }
 0x4b3   : > { %1975 = vadd.xlane.f32.xlu1 %v1974_v39  ;;  %v893_v27 = vpop.xlane.xlu1 %892 }
 0x4b5   : > { %v896_v40 = vpop.xlane.xlu0 %895 }
 0x4b6   : > { %v3990_v23 = vpop.eup %3989  ;;  %3995 = vrcp.f32 %v896_v40 }
 0x4b7   : > { %v899_v7 = vpop.xlane.xlu1 %898  ;;  %v916_v2 = vmul.f32 %v3990_v23, %v4824_v61  ;;  %3997 = vrcp.f32 %v893_v27 }
 0x4b9   : > { %v924_v0 = vpack.c.bf16 %v916_v2, %v915_v57 }
 0x4ba   : > { %v3992_v15 = vpop.eup %3991 }
 0x4bb   : > { %3503 = vmatmul.mubr.msk.bf16.gmra.mrb[28].mxu1 %vm628_vm3, %v924_v0  ;;  %v902_v38 = vpop.xlane.xlu1 %901  ;;  %v917_v32 = vmul.f32 %v3992_v15, %v4830_v11 }
 0x4bc   : > { %v3994_v46 = vpop.eup %3993  ;;  %3506 = vmatprep.mubr.msk.bf16.mxu1 %vm4105_vm0, %v5485_v55  ;;  %3999 = vrcp.f32 %v902_v38 }
 0x4bd   : > { %v918_v56 = vmul.f32 %v3994_v46, %v4832_v20  ;;  %4001 = vrcp.f32 %v899_v7  ;;  %v3456_v7 = vpop.f32.mrb[21].mxu1 }
 0x4be   : > { %v5093_v30 = vpop.f32.mrb[22].mxu1 }
 0x4bf   : > { %v1236_v6 = vpop.xlane.xlu1 %1235  ;;  %v925_v26 = vpack.c.bf16 %v918_v56, %v917_v32  ;;  %v5098_v57 = vpack.c.bf16 %v5093_v30, %v5090_v25  ;;  %v3457_v2 = vpop.f32.mrb[23].mxu1  ;;  %v5490_v32 = vld [vmem:[#allocation5_spill] sm:$0xff] }
 0x4c0   : > { %v3996_v52 = vpop.eup %3995 }
 0x4c1   : > { %v3998_v14 = vpop.eup %3997  ;;  %v920_v5 = vmul.f32 %v3996_v52, %v4841_v9 }
 0x4c2   : > { %v919_v42 = vmul.f32 %v3998_v14, %v4837_v48  ;;  %v5491_v14 = vld [vmem:[#allocation4_spill] sm:$0xff] }
 0x4c3   : > { %3507 = vmatmul.mubr.msk.bf16.gmra.mrb[32].mxu1 %vm628_vm3, %v925_v26  ;;  %v1239_v61 = vpop.xlane.xlu1 %1238 }
 0x4c4   : > { %2019 = vrot.lane.b32.xlu1 %v5488_v51, %s4116_s29  ;;  %3510 = vmatprep.mubr.msk.bf16.mxu1 %vm4105_vm0, %v5485_v55  ;;  %4003 = vrcp.f32 %v1239_v61  ;;  %v926_v11 = vpack.c.bf16 %v920_v5, %v919_v42  ;;  %v5492_v51 = vld [vmem:[#allocation6_spill] sm:$0xff] }
 0x4c5   : > { %4005 = vrcp.f32 %v1236_v6 }
 0x4c6   : > { %v4000_v63 = vpop.eup %3999 }
 0x4c7   : > { %v1242_v20 = vpop.xlane.xlu1 %1241  ;;  %v4002_v33 = vpop.eup %4001  ;;  %v922_v3 = vmul.f32 %v4000_v63, %v4855_v18 }
 0x4c8   : > { %v921_v39 = vmul.f32 %v4002_v33, %v4846_v45  ;;  %v1251_v18 = vpop.xlane.xlu0 %1250 }
 0x4ca   : > { %v927_v9 = vpack.c.bf16 %v922_v3, %v921_v39 }
 0x4cb   : > { %3511 = vmatmul.mubr.msk.bf16.gmra.mrb[36].mxu1 %vm628_vm3, %v926_v11  ;;  %v1245_v54 = vpop.xlane.xlu1 %1244 }
 0x4cc   : > { %3514 = vmatprep.mubr.msk.bf16.mxu1 %vm4105_vm0, %v5485_v55  ;;  %4007 = vrcp.f32 %v1245_v54  ;;  %v1257_v56 = vpop.xlane.xlu0 %1256 }
 0x4cd   : > { %4009 = vrcp.f32 %v1242_v20 }
 0x4ce   : > { %v4004_v27 = vpop.eup %4003 }
 0x4cf   : > { %v4006_v48 = vpop.eup %4005  ;;  %v1275_v40 = vmul.f32 %v4004_v27, %v4871_v8  ;;  %v1248_v23 = vpop.xlane.xlu1 %1247  ;;  %v5489_v8 = vld [vmem:[#allocation3_spill] sm:$0xff] }
 0x4d0   : > { %v1274_v45 = vmul.f32 %v4006_v48, %v4864_v43  ;;  %4011 = vrcp.f32 %v1248_v23 }
 0x4d1   : > { %4013 = vrcp.f32 %v1251_v18 }
 0x4d2   : > { %v1284_v0 = vpack.c.bf16 %v1275_v40, %v1274_v45 }
 0x4d3   : > { %3515 = vmatmul.mubr.msk.bf16.gmra.mrb[40].mxu1 %vm628_vm3, %v927_v9  ;;  %v1254_v46 = vpop.xlane.xlu1 %1253 }
 0x4d4   : > { %3558 = vmatprep.mubr.msk.bf16.mxu1 %vm4105_vm0, %v5485_v55  ;;  %4015 = vrcp.f32 %v1254_v46 }
 0x4d5   : > { %4017 = vrcp.f32 %v1257_v56 }
 0x4d6   : > { %v4008_v15 = vpop.eup %4007 }
 0x4d7   : > { %v4010_v38 = vpop.eup %4009  ;;  %v1277_v43 = vmul.f32 %v4008_v15, %v4879_v34  ;;  %v2016_v33 = vpop.permute.xlu1 %2015 }
 0x4d8   : > { %v1276_v6 = vmul.f32 %v4010_v38, %v4875_v29 }
 0x4da   : > { %v1285_v26 = vpack.c.bf16 %v1277_v43, %v1276_v6  ;;  %v4012_v52 = vpop.eup %4011 }
 0x4db   : > { %3559 = vmatmul.mubr.msk.bf16.vlgmr.msra.gmra.mrb[44].mxu1 %vm628_vm3, %v1284_v0  ;;  %v4014_v61 = vpop.eup %4013  ;;  %v1278_v29 = vmul.f32 %v4012_v52, %v4885_v36  ;;  %v5493_v36 = vld [vmem:[#allocation9_spill] sm:$0xff] }
 0x4dc   : > { %3609 = vmatpush3.bf16.msra.mxu1 %v5489_v8  ;;  %3562 = vmatprep.mubr.msk.bf16.mxu1 %vm4105_vm0, %v5485_v55  ;;  %v1279_v34 = vmul.f32 %v4014_v61, %v4850_v16 }
 0x4dd   : > { %3610 = vmatprep.subr.bf16.mxu1 %v5485_v55 }
 0x4de   : > { %v1286_v5 = vpack.c.bf16 %v1279_v34, %v1278_v29  ;;  %v4016_v20 = vpop.eup %4015 }
 0x4df   : > { %v4018_v42 = vpop.eup %4017  ;;  %v1280_v11 = vmul.f32 %v4016_v20, %v4891_v47  ;;  %v2014_v47 = vpop.permute.xlu0 %2013 }
 0x4e0   : > { %3611 = vmatpush3.bf16.msra.mxu1 %v5490_v32  ;;  %v1281_v16 = vmul.f32 %v4018_v42, %v5493_v36  ;;  %v5494_v36 = vld [vmem:[#allocation10_spill] sm:$0xff] }
 0x4e1   : > { %3612 = vmatprep.subr.bf16.mxu1 %v5485_v55 }
 0x4e2   : > { %v1287_v63 = vpack.c.bf16 %v1281_v16, %v1280_v11 }
 0x4e3   : > { %3563 = vmatmul.mubr.msk.bf16.gmra.mrb[48].mxu1 %vm628_vm3, %v1285_v26 }
 0x4e4   : > { %3613 = vmatpush3.bf16.msra.mxu1 %v5491_v14  ;;  %3566 = vmatprep.mubr.msk.bf16.mxu1 %vm4105_vm0, %v5485_v55 }
 0x4e5   : > { %3614 = vmatprep.subr.bf16.mxu1 %v5485_v55 }
 0x4e8   : > { %3615 = vmatpush3.bf16.msra.mxu1 %v5492_v51 }
 0x4e9   : > { %3616 = vmatprep.subr.bf16.mxu1 %v5485_v55 }
 0x4eb   : > { %3567 = vmatmul.mubr.msk.bf16.gmra.mrb[52].mxu1 %vm628_vm3, %v1286_v5 }
 0x4ec   : > { %3617 = vmatpush3.bf16.msra.mxu1 %v5058_v41  ;;  %3570 = vmatprep.mubr.msk.bf16.mxu1 %vm4105_vm0, %v5485_v55 }
 0x4ed   : > { %3668 = vmatprep.subr.bf16.mxu1 %v5485_v55 }
 0x4f2   : > { %v1609_v7 = vpop.xlane.xlu0 %1608 }
 0x4f3   : > { %3571 = vmatmul.mubr.msk.bf16.gmra.mrb[56].mxu1 %vm628_vm3, %v1287_v63 }
 0x4f4   : > { %3574 = vmatprep.mubr.msk.bf16.mxu1 %vm4105_vm0, %v5485_v55 }
 0x4f6   : > { %v1615_v15 = vpop.xlane.xlu0 %1614 }
 0x4fa   : > { %v1624_v56 = vpop.xlane.xlu0 %1623 }
 0x500   : > { %v1973_v26 = vpop.xlane.xlu0 %1972 }
 0x508   : > { %v1260_v54 = vpop.xlane.xlu1 %1259 }
 0x509   : > { %4019 = vrcp.f32 %v1260_v54 }
 0x50c   : > { %v1263_v3 = vpop.xlane.xlu1 %1262 }
 0x50d   : > { %4021 = vrcp.f32 %v1263_v3 }
 0x510   : > { %v1597_v41 = vpop.xlane.xlu1 %1596 }
 0x511   : > { %4023 = vrcp.f32 %v1597_v41 }
 0x513   : > { %v4020_v9 = vpop.eup %4019 }
 0x514   : > { %v1600_v39 = vpop.xlane.xlu1 %1599  ;;  %v1282_v40 = vmul.f32 %v4020_v9, %v4949_v44 }
 0x515   : > { %4025 = vrcp.f32 %v1600_v39 }
 0x517   : > { %v4022_v27 = vpop.eup %4021 }
 0x518   : > { %v1603_v48 = vpop.xlane.xlu1 %1602  ;;  %v1283_v23 = vmul.f32 %v4022_v27, %v4955_v28 }
 0x519   : > { %4027 = vrcp.f32 %v1603_v48 }
 0x51a   : > { %v1288_v18 = vpack.c.bf16 %v1283_v23, %v1282_v40 }
 0x51b   : > { %v4024_v2 = vpop.eup %4023 }
 0x51c   : > { %3575 = vmatmul.mubr.msk.bf16.gmra.mrb[60].mxu1 %vm628_vm3, %v1288_v18  ;;  %v1606_v45 = vpop.xlane.xlu1 %1605  ;;  %v1635_v38 = vmul.f32 %v4024_v2, %v4961_v50 }
 0x51d   : > { %4029 = vrcp.f32 %v1606_v45  ;;  %3618 = vmatprep.mubr.msk.bf16.mxu1 %vm4105_vm0, %v5485_v55 }
 0x51f   : > { %v4026_v0 = vpop.eup %4025 }
 0x520   : > { %v1636_v8 = vmul.f32 %v4026_v0, %v4969_v24  ;;  %v1612_v44 = vpop.xlane.xlu1 %1611 }
 0x521   : > { %4031 = vrcp.f32 %v1612_v44 }
 0x522   : > { %v1645_v28 = vpack.c.bf16 %v1636_v8, %v1635_v38  ;;  %4033 = vrcp.f32 %v1609_v7 }
 0x523   : > { %v4028_v43 = vpop.eup %4027 }
 0x524   : > { %3619 = vmatmul.mubr.msk.bf16.vlgmr.msra.gmra.mrb[64].mxu1 %vm628_vm3, %v1645_v28  ;;  %v1618_v46 = vpop.xlane.xlu1 %1617  ;;  %v1637_v24 = vmul.f32 %v4028_v43, %v4976_v21 }
 0x525   : > { %3669 = vmatpush3.bf16.msra.mxu1 %v5044_v53  ;;  %3622 = vmatprep.mubr.msk.bf16.mxu1 %vm4105_vm0, %v5485_v55  ;;  %4035 = vrcp.f32 %v1618_v46 }
 0x526   : > { %3670 = vmatprep.subr.bf16.mxu1 %v5485_v55  ;;  %4037 = vrcp.f32 %v1615_v15 }
 0x527   : > { %v4030_v6 = vpop.eup %4029 }
 0x528   : > { %v1621_v50 = vpop.xlane.xlu1 %1620  ;;  %v1638_v32 = vmul.f32 %v4030_v6, %v4988_v31  ;;  %v2018_v31 = vpop.permute.xlu0 %2017 }
 0x529   : > { %3671 = vmatpush3.bf16.msra.mxu1 %v2014_v47  ;;  %4039 = vrcp.f32 %v1621_v50 }
 0x52a   : > { %3672 = vmatprep.subr.bf16.mxu1 %v5485_v55  ;;  %v1646_v52 = vpack.c.bf16 %v1638_v32, %v1637_v24  ;;  %4041 = vrcp.f32 %v1624_v56 }
 0x52b   : > { %v4032_v61 = vpop.eup %4031 }
 0x52c   : > { %3623 = vmatmul.mubr.msk.bf16.gmra.mrb[68].mxu1 %vm628_vm3, %v1646_v52  ;;  %v1958_v53 = vpop.xlane.xlu1 %1957  ;;  %v4034_v14 = vpop.eup %4033  ;;  %v1640_v21 = vmul.f32 %v4032_v61, %v4996_v19 }
 0x52d   : > { %3673 = vmatpush3.bf16.msra.mxu1 %v2016_v33  ;;  %3626 = vmatprep.mubr.msk.bf16.mxu1 %vm4105_vm0, %v5485_v55  ;;  %v1639_v34 = vmul.f32 %v4034_v14, %v4914_v17 }
 0x52e   : > { %3674 = vmatprep.subr.bf16.mxu1 %v5485_v55 }
 0x52f   : > { %v1647_v51 = vpack.c.bf16 %v1640_v21, %v1639_v34  ;;  %v4036_v5 = vpop.eup %4035 }
 0x530   : > { %v1961_v29 = vpop.xlane.xlu1 %1960  ;;  %v4038_v42 = vpop.eup %4037  ;;  %v1642_v19 = vmul.f32 %v4036_v5, %v5006_v35 }
 0x531   : > { %3675 = vmatpush3.bf16.msra.mxu1 %v2018_v31  ;;  %v1641_v16 = vmul.f32 %v4038_v42, %v5494_v36  ;;  %4043 = vrcp.f32 %v1961_v29 }
 0x532   : > { %3676 = vmatprep.subr.bf16.mxu1 %v5485_v55  ;;  %4045 = vrcp.f32 %v1958_v53 }
 0x533   : > { %v1648_v17 = vpack.c.bf16 %v1642_v19, %v1641_v16  ;;  %v4040_v63 = vpop.eup %4039 }
 0x534   : > { %3627 = vmatmul.mubr.msk.bf16.gmra.mrb[72].mxu1 %vm628_vm3, %v1647_v51  ;;  %v1964_v20 = vpop.xlane.xlu1 %1963  ;;  %v4042_v54 = vpop.eup %4041  ;;  %v1643_v3 = vmul.f32 %v4040_v63, %v5016_v13 }
 0x535   : > { %3630 = vmatprep.mubr.msk.bf16.mxu1 %vm4105_vm0, %v5485_v55  ;;  %v1644_v39 = vmul.f32 %v4042_v54, %v4928_v49  ;;  %v1979_v40 = vpop.xlane.xlu0 %1978 }
 0x537   : > { %v1649_v35 = vpack.c.bf16 %v1644_v39, %v1643_v3 }
 0x538   : > { %v1967_v11 = vpop.xlane.xlu1 %1966 }
 0x539   : > { %4047 = vrcp.f32 %v1967_v11  ;;  %v1982_v45 = vpop.xlane.xlu0 %1981 }
 0x53a   : > { %4049 = vrcp.f32 %v1964_v20 }
 0x53b   : > { %v4044_v9 = vpop.eup %4043 }
 0x53c   : > { %3631 = vmatmul.mubr.msk.bf16.gmra.mrb[76].mxu1 %vm628_vm3, %v1648_v17  ;;  %v1970_v33 = vpop.xlane.xlu1 %1969  ;;  %v4046_v27 = vpop.eup %4045  ;;  %v1997_v48 = vmul.f32 %v4044_v9, %v5032_v59 }
 0x53d   : > { %3634 = vmatprep.mubr.msk.bf16.mxu1 %vm4105_vm0, %v5485_v55  ;;  %v1996_v13 = vmul.f32 %v4046_v27, %v5026_v58  ;;  %4051 = vrcp.f32 %v1970_v33  ;;  %v1985_v15 = vpop.xlane.xlu0 %1984 }
 0x53e   : > { %4053 = vrcp.f32 %v1973_v26 }
 0x53f   : > { %v2006_v49 = vpack.c.bf16 %v1997_v48, %v1996_v13 }
 0x540   : > { %v1976_v41 = vpop.xlane.xlu1 %1975 }
 0x541   : > { %4055 = vrcp.f32 %v1976_v41 }
 0x542   : > { %4057 = vrcp.f32 %v1979_v40 }
 0x543   : > { %v4048_v23 = vpop.eup %4047  ;;  %4059 = vrcp.f32 %v1985_v15 }
 0x544   : > { %3635 = vmatmul.mubr.msk.bf16.gmra.mrb[80].mxu1 %vm628_vm3, %v1649_v35  ;;  %v2020_v47 = vpop.permute.xlu1 %2019  ;;  %v4050_v7 = vpop.eup %4049  ;;  %v1999_v18 = vmul.f32 %v4048_v23, %v5042_v1  ;;  %4061 = vrcp.f32 %v1982_v45 }
 0x545   : > { %3677 = vmatpush3.bf16.msra.mxu1 %v2020_v47  ;;  %3678 = vmatprep.mubr.msk.bf16.mxu1 %vm4105_vm0, %v5485_v55  ;;  %v1998_v59 = vmul.f32 %v4050_v7, %v5036_v10 }
 0x546   : > { %3718 = vmatprep.subr.bf16.mxu1 %v5485_v55 }
 0x547   : > { %v2007_v2 = vpack.c.bf16 %v1999_v18, %v1998_v59  ;;  %v4052_v0 = vpop.eup %4051 }
 0x548   : > { %v4054_v58 = vpop.eup %4053  ;;  %v2000_v38 = vmul.f32 %v4052_v0, %v5052_v60 }
 0x549   : > { %v2001_v8 = vmul.f32 %v4054_v58, %v4940_v4 }
 0x54b   : > { %v2008_v10 = vpack.c.bf16 %v2001_v8, %v2000_v38  ;;  %v4056_v28 = vpop.eup %4055 }
 0x54c   : > { %3679 = vmatmul.mubr.msk.bf16.vlgmr.msra.gmra.mrb[84].mxu1 %vm628_vm3, %v2006_v49  ;;  %v4058_v56 = vpop.eup %4057  ;;  %v2002_v60 = vmul.f32 %v4056_v28, %v5062_v62 }
 0x54d   : > { %3682 = vmatprep.mubr.msk.bf16.mxu1 %vm4105_vm0, %v5485_v55  ;;  %v2003_v4 = vmul.f32 %v4058_v56, %v5038_v22  ;;  %v4060_v50 = vpop.eup %4059 }
 0x54e   : > { %v4062_v24 = vpop.eup %4061  ;;  %v2005_v32 = vmul.f32 %v4060_v50, %v5056_v12 }
 0x54f   : > { %v2009_v6 = vpack.c.bf16 %v2003_v4, %v2002_v60  ;;  %v2004_v26 = vmul.f32 %v4062_v24, %v5048_v37 }
 0x551   : > { %v2010_v52 = vpack.c.bf16 %v2005_v32, %v2004_v26 }
 0x554   : > { %3683 = vmatmul.mubr.msk.bf16.gmra.mrb[88].mxu1 %vm628_vm3, %v2007_v2 }
 0x555   : > { %3686 = vmatprep.mubr.msk.bf16.mxu1 %vm4105_vm0, %v5485_v55 }
 0x559   : > { %v5176_v1 = vpop.f32.mrb[24].mxu1 }
 0x55a   : > { %v3500_v44 = vpop.f32.mrb[25].mxu1 }
 0x55b   : > { %v5178_v46 = vpop.f32.mrb[26].mxu1 }
 0x55c   : > { %v3501_v43 = vpop.f32.mrb[27].mxu1  ;;  %3687 = vmatmul.mubr.msk.bf16.gmra.mrb[92].mxu1 %vm628_vm3, %v2008_v10 }
 0x55d   : > { %3690 = vmatprep.mubr.msk.bf16.mxu1 %vm4105_vm0, %v5485_v55 }
 0x564   : > { %3691 = vmatmul.mubr.msk.bf16.gmra.mrb[96].mxu1 %vm628_vm3, %v2009_v6 }
 0x565   : > { %3694 = vmatprep.mubr.msk.bf16.mxu1 %vm4105_vm0, %v5485_v55 }
 0x56c   : > { %3695 = vmatmul.mubr.msk.bf16.gmra.mrb[100].mxu1 %vm628_vm3, %v2010_v52 }
 0x56d   : > { %3720 = vmatprep.mubr.msk.bf16.mxu1 %vm4105_vm0, %v5485_v55 }
 0x58e   : > { %v5193_v62 = vpop.f32.mrb[28].mxu1 }
 0x58f   : > { %v3504_v22 = vpop.f32.mrb[29].mxu1 }
 0x590   : > { %v5195_v61 = vpop.f32.mrb[30].mxu1 }
 0x591   : > { %v3505_v53 = vpop.f32.mrb[31].mxu1 }
 0x596   : > { %v5197_v14 = vpop.f32.mrb[32].mxu1 }
 0x597   : > { %v3508_v21 = vpop.f32.mrb[33].mxu1 }
 0x598   : > { %v5199_v31 = vpop.f32.mrb[34].mxu1 }
 0x599   : > { %v3509_v12 = vpop.f32.mrb[35].mxu1 }
 0x59e   : > { %v5201_v29 = vpop.f32.mrb[36].mxu1 }
 0x59f   : > { %v3512_v37 = vpop.f32.mrb[37].mxu1 }
 0x5a0   : > { %v5203_v34 = vpop.f32.mrb[38].mxu1 }
 0x5a1   : > { %v3513_v51 = vpop.f32.mrb[39].mxu1 }
 0x5a6   : > { %v5205_v5 = vpop.f32.mrb[40].mxu1 }
 0x5a7   : > { %v3516_v20 = vpop.f32.mrb[41].mxu1 }
 0x5a8   : > { %v5207_v42 = vpop.f32.mrb[42].mxu1 }
 0x5a9   : > { %v3517_v19 = vpop.f32.mrb[43].mxu1 }
 0x5ae   : > { %v1353_v11 = vpop.f32.mrb[44].mxu1 }
 0x5af   : > { %v3560_v36 = vpop.f32.mrb[45].mxu1 }
 0x5b0   : > { %v1356_v16 = vpop.f32.mrb[46].mxu1 }
 0x5b1   : > { %v3814_v17 = vpack.i.bf16 %v1356_v16, %v1353_v11  ;;  %v3561_v63 = vpop.f32.mrb[47].mxu1 }
 0x5b3   : > { %3815 = vrot.lane.b32.xlu1 %v3814_v17, %s4117_s24 }
 0x5b6   : > { %v1361_v33 = vpop.f32.mrb[48].mxu1 }
 0x5b7   : > { %v3564_v54 = vpop.f32.mrb[49].mxu1 }
 0x5b8   : > { %v1364_v3 = vpop.f32.mrb[50].mxu1 }
 0x5b9   : > { %v3824_v41 = vpack.i.bf16 %v1364_v3, %v1361_v33  ;;  %v3565_v39 = vpop.f32.mrb[51].mxu1 }
 0x5bb   : > { %3825 = vrot.lane.b32.xlu1 %v3824_v41, %s4117_s24 }
 0x5be   : > { %v1369_v35 = vpop.f32.mrb[52].mxu1 }
 0x5bf   : > { %v3568_v9 = vpop.f32.mrb[53].mxu1 }
 0x5c0   : > { %v1372_v47 = vpop.f32.mrb[54].mxu1 }
 0x5c1   : > { %v3829_v27 = vpack.i.bf16 %v1372_v47, %v1369_v35  ;;  %v3569_v48 = vpop.f32.mrb[55].mxu1 }
 0x5c3   : > { %3830 = vrot.lane.b32.xlu1 %v3829_v27, %s4117_s24 }
 0x5c6   : > { %v1377_v13 = vpop.f32.mrb[56].mxu1 }
 0x5c7   : > { %v3572_v49 = vpop.f32.mrb[57].mxu1 }
 0x5c8   : > { %v1380_v40 = vpop.f32.mrb[58].mxu1 }
 0x5c9   : > { %v3854_v23 = vpack.i.bf16 %v1380_v40, %v1377_v13  ;;  %v3573_v7 = vpop.f32.mrb[59].mxu1 }
 0x5ef   : > { %v1385_v18 = vpop.f32.mrb[60].mxu1 }
 0x5f0   : > { %v3576_v45 = vpop.f32.mrb[61].mxu1 }
 0x5f1   : > { %v1388_v59 = vpop.f32.mrb[62].mxu1 }
 0x5f2   : > { %v3869_v2 = vpack.i.bf16 %v1388_v59, %v1385_v18  ;;  %v3577_v0 = vpop.f32.mrb[63].mxu1 }
 0x5f7   : > { %v1714_v58 = vpop.f32.mrb[64].mxu1 }
 0x5f8   : > { %v3620_v15 = vpop.f32.mrb[65].mxu1 }
 0x5f9   : > { %v1717_v38 = vpop.f32.mrb[66].mxu1 }
 0x5fa   : > { %v3819_v8 = vpack.i.bf16 %v1717_v38, %v1714_v58  ;;  %v3621_v44 = vpop.f32.mrb[67].mxu1 }
 0x5fc   : > { %3820 = vrot.lane.b32.xlu0 %v3819_v8, %s4118_s20 }
 0x5ff   : > { %v1722_v10 = vpop.f32.mrb[68].mxu1 }
 0x600   : > { %v3624_v28 = vpop.f32.mrb[69].mxu1 }
 0x601   : > { %v1725_v43 = vpop.f32.mrb[70].mxu1 }
 0x602   : > { %v3834_v56 = vpack.i.bf16 %v1725_v43, %v1722_v10  ;;  %v3625_v60 = vpop.f32.mrb[71].mxu1 }
 0x604   : > { %3835 = vrot.lane.b32.xlu1 %v3834_v56, %s4118_s20 }
 0x607   : > { %v1730_v4 = vpop.f32.mrb[72].mxu1 }
 0x608   : > { %v3628_v6 = vpop.f32.mrb[73].mxu1 }
 0x609   : > { %v1733_v50 = vpop.f32.mrb[74].mxu1 }
 0x60a   : > { %v3839_v24 = vpack.i.bf16 %v1733_v50, %v1730_v4  ;;  %v3629_v32 = vpop.f32.mrb[75].mxu1 }
 0x60c   : > { %3840 = vrot.lane.b32.xlu1 %v3839_v24, %s4118_s20 }
 0x60f   : > { %v1738_v26 = vpop.f32.mrb[76].mxu1 }
 0x610   : > { %v3632_v52 = vpop.f32.mrb[77].mxu1 }
 0x611   : > { %v1741_v22 = vpop.f32.mrb[78].mxu1 }
 0x612   : > { %v3859_v53 = vpack.i.bf16 %v1741_v22, %v1738_v26  ;;  %v3633_v21 = vpop.f32.mrb[79].mxu1 }
 0x614   : > { %3860 = vrot.lane.b32.xlu0 %v3859_v53, %s4118_s20 }
 0x617   : > { %v1746_v12 = vpop.f32.mrb[80].mxu1 }
 0x618   : > { %v3636_v37 = vpop.f32.mrb[81].mxu1 }
 0x619   : > { %v1749_v51 = vpop.f32.mrb[82].mxu1 }
 0x61a   : > { %v3879_v20 = vpack.i.bf16 %v1749_v51, %v1746_v12  ;;  %v3637_v19 = vpop.f32.mrb[83].mxu1 }
 0x61f   : > { %v2075_v11 = vpop.f32.mrb[84].mxu1 }
 0x620   : > { %v3680_v36 = vpop.f32.mrb[85].mxu1 }
 0x621   : > { %v2078_v16 = vpop.f32.mrb[86].mxu1 }
 0x622   : > { %v3844_v17 = vpack.i.bf16 %v2078_v16, %v2075_v11  ;;  %v3681_v63 = vpop.f32.mrb[87].mxu1 }
 0x624   : > { %3845 = vrot.lane.b32.xlu1 %v3844_v17, %s4119_s21 }
 0x627   : > { %v2083_v33 = vpop.f32.mrb[88].mxu1 }
 0x628   : > { %v3684_v54 = vpop.f32.mrb[89].mxu1 }
 0x629   : > { %v2086_v3 = vpop.f32.mrb[90].mxu1 }
 0x62a   : > { %v3849_v41 = vpack.i.bf16 %v2086_v3, %v2083_v33  ;;  %v3685_v39 = vpop.f32.mrb[91].mxu1 }
 0x62c   : > { %3850 = vrot.lane.b32.xlu1 %v3849_v41, %s4119_s21 }
 0x62f   : > { %v2091_v35 = vpop.f32.mrb[92].mxu1 }
 0x630   : > { %3855 = vrot.lane.b32.xlu1 %v3854_v23, %s4117_s24  ;;  %v3688_v9 = vpop.f32.mrb[93].mxu1 }
 0x631   : > { %v2094_v47 = vpop.f32.mrb[94].mxu1 }
 0x632   : > { %v3864_v27 = vpack.i.bf16 %v2094_v47, %v2091_v35  ;;  %v3689_v48 = vpop.f32.mrb[95].mxu1 }
 0x634   : > { %3865 = vrot.lane.b32.xlu0 %v3864_v27, %s4119_s21 }
 0x637   : > { %v2099_v13 = vpop.f32.mrb[96].mxu1 }
 0x638   : > { %3870 = vrot.lane.b32.xlu0 %v3869_v2, %s4117_s24  ;;  %v3692_v49 = vpop.f32.mrb[97].mxu1  ;;  %v3816_v2 = vpop.permute.xlu1 %3815 }
 0x639   : > { %v2102_v40 = vpop.f32.mrb[98].mxu1  ;;  %v3818_v28 = vunpack.i.h.bf16 %v3816_v2  ;;  %v3817_v43 = vunpack.i.l.bf16 %v3816_v2 }
 0x63a   : > { %v3874_v7 = vpack.i.bf16 %v2102_v40, %v2099_v13  ;;  %v3693_v18 = vpop.f32.mrb[99].mxu1 }
 0x63b   : > { %v2235_v6 = vsel %vm689_vm4, %v5178_v46, %v3818_v28  ;;  %v2234_v50 = vsel %vm689_vm4, %v5176_v1, %v3817_v43 }
 0x63c   : > { %3875 = vrot.lane.b32.xlu1 %v3874_v7, %s4119_s21  ;;  %v3826_v15 = vpop.permute.xlu1 %3825 }
 0x63d   : > { %v3828_v12 = vunpack.i.h.bf16 %v3826_v15  ;;  %v3827_v37 = vunpack.i.l.bf16 %v3826_v15 }
 0x63f   : > { %v2107_v45 = vpop.f32.mrb[100].mxu1  ;;  %v2237_v46 = vsel %vm689_vm4, %v5195_v61, %v3828_v12  ;;  %v2236_v19 = vsel %vm689_vm4, %v5193_v62, %v3827_v37 }
 0x640   : > { %3880 = vrot.lane.b32.xlu1 %v3879_v20, %s4118_s20  ;;  %v3696_v59 = vpop.f32.mrb[101].mxu1  ;;  %v3831_v38 = vpop.permute.xlu1 %3830 }
 0x641   : > { %v2110_v23 = vpop.f32.mrb[102].mxu1  ;;  %v3833_v41 = vunpack.i.h.bf16 %v3831_v38  ;;  %v3832_v39 = vunpack.i.l.bf16 %v3831_v38 }
 0x642   : > { %v3884_v0 = vpack.i.bf16 %v2110_v23, %v2107_v45  ;;  %v3697_v58 = vpop.f32.mrb[103].mxu1 }
 0x643   : > { %v2239_v47 = vsel %vm689_vm4, %v5199_v31, %v3833_v41  ;;  %v2238_v27 = vsel %vm689_vm4, %v5197_v14, %v3832_v39 }
 0x644   : > { %2314 = vrot.lane.b32.xlu1 %v5098_v57, %s4106_s13  ;;  %3885 = vrot.lane.b32.xlu0 %v3884_v0, %s4119_s21 }
 0x648   : > { %2440 = vrot.lane.b32.xlu1 %v5098_v57, %s4109_s16  ;;  %2442 = vrot.lane.b32.xlu0 %v5098_v57, %s4107_s14 }
 0x64c   : > { %2568 = vrot.lane.b32.xlu1 %v5098_v57, %s4111_s18  ;;  %2570 = vrot.lane.b32.xlu0 %v5098_v57, %s4108_s15 }
 0x650   : > { %2695 = vrot.lane.b32.xlu1 %v5098_v57, %s4112_s19  ;;  %2697 = vrot.lane.b32.xlu0 %v5098_v57, %s4110_s17 }
 0x66e   : > { %v3821_v44 = vpop.permute.xlu0 %3820 }
 0x66f   : > { %v3823_v56 = vunpack.i.h.bf16 %v3821_v44  ;;  %v3822_v60 = vunpack.i.l.bf16 %v3821_v44 }
 0x671   : > { %v2245_v26 = vsel %vm2244_vm5, %v2234_v50, %v3822_v60  ;;  %v2246_v52 = vsel %vm2244_vm5, %v2235_v6, %v3823_v56 }
 0x676   : > { %v3836_v8 = vpop.permute.xlu1 %3835 }
 0x677   : > { %v3838_v51 = vunpack.i.h.bf16 %v3836_v8  ;;  %v3837_v20 = vunpack.i.l.bf16 %v3836_v8 }
 0x679   : > { %v2247_v16 = vsel %vm2244_vm5, %v2236_v19, %v3837_v20  ;;  %v2248_v17 = vsel %vm2244_vm5, %v2237_v46, %v3838_v51 }
 0x67e   : > { %v3841_v10 = vpop.permute.xlu1 %3840 }
 0x67f   : > { %v3843_v35 = vunpack.i.h.bf16 %v3841_v10  ;;  %v3842_v61 = vunpack.i.l.bf16 %v3841_v10 }
 0x681   : > { %v2249_v49 = vsel %vm2244_vm5, %v2238_v27, %v3842_v61  ;;  %v2250_v40 = vsel %vm2244_vm5, %v2239_v47, %v3843_v35  ;;  %v393_v47 = vld [vmem:[%s5466_s7 + $0x8] sm:$0xf] }
 0x686   : > { %v3861_v54 = vpop.permute.xlu0 %3860 }
 0x687   : > { %v3863_v0 = vunpack.i.h.bf16 %v3861_v54  ;;  %v3862_v58 = vunpack.i.l.bf16 %v3861_v54 }
 0x696   : > { %v3846_v4 = vpop.permute.xlu1 %3845 }
 0x697   : > { %v3848_v24 = vunpack.i.h.bf16 %v3846_v4  ;;  %v3847_v32 = vunpack.i.l.bf16 %v3846_v4 }
 0x699   : > { %v2256_v22 = vsel %vm2255_vm6, %v2245_v26, %v3847_v32  ;;  %v2257_v53 = vsel %vm2255_vm6, %v2246_v52, %v3848_v24 }
 0x69a   : > { %v5246_v21 = vpack.c.bf16 %v2257_v53, %v2256_v22 }
 0x69c   : > { %3699 = vmatpush3.bf16.msra.mxu0 %v5246_v21 }
 0x69d   : > { %3700 = vmatprep.subr.bf16.mxu0 %v5485_v55 }
 0x69e   : > { %v3851_v1 = vpop.permute.xlu1 %3850 }
 0x69f   : > { %v3853_v11 = vunpack.i.h.bf16 %v3851_v1  ;;  %v3852_v36 = vunpack.i.l.bf16 %v3851_v1 }
 0x6a1   : > { %v2258_v63 = vsel %vm2255_vm6, %v2247_v16, %v3852_v36  ;;  %v2259_v33 = vsel %vm2255_vm6, %v2248_v17, %v3853_v11 }
 0x6a2   : > { %v5258_v3 = vpack.c.bf16 %v2259_v33, %v2258_v63  ;;  %v3856_v62 = vpop.permute.xlu1 %3855 }
 0x6a3   : > { %v3858_v7 = vunpack.i.h.bf16 %v3856_v62  ;;  %v3857_v18 = vunpack.i.l.bf16 %v3856_v62 }
 0x6a4   : > { %3701 = vmatpush3.bf16.msra.mxu0 %v5258_v3 }
 0x6a5   : > { %3702 = vmatprep.subr.bf16.mxu0 %v5485_v55  ;;  %v2241_v31 = vsel %vm689_vm4, %v5203_v34, %v3858_v7  ;;  %v2240_v14 = vsel %vm689_vm4, %v5201_v29, %v3857_v18 }
 0x6a6   : > { %v3866_v9 = vpop.permute.xlu0 %3865  ;;  %v2251_v44 = vsel %vm2244_vm5, %v2240_v14, %v3862_v58  ;;  %v2252_v10 = vsel %vm2244_vm5, %v2241_v31, %v3863_v0 }
 0x6a7   : > { %v3868_v48 = vunpack.i.h.bf16 %v3866_v9  ;;  %v3867_v13 = vunpack.i.l.bf16 %v3866_v9 }
 0x6a9   : > { %v2260_v45 = vsel %vm2255_vm6, %v2249_v49, %v3867_v13  ;;  %v2261_v59 = vsel %vm2255_vm6, %v2250_v40, %v3868_v48 }
 0x6aa   : > { %v5270_v23 = vpack.c.bf16 %v2261_v59, %v2260_v45  ;;  %v3871_v8 = vpop.permute.xlu0 %3870 }
 0x6ab   : > { %v3873_v60 = vunpack.i.h.bf16 %v3871_v8  ;;  %v3872_v29 = vunpack.i.l.bf16 %v3871_v8 }
 0x6ac   : > { %3703 = vmatpush3.bf16.msra.mxu0 %v5270_v23 }
 0x6ad   : > { %3704 = vmatprep.subr.bf16.mxu0 %v5485_v55  ;;  %v2243_v24 = vsel %vm689_vm4, %v5207_v42, %v3873_v60  ;;  %v2242_v32 = vsel %vm689_vm4, %v5205_v5, %v3872_v29  ;;  %v4095_v42 = vld [vmem:[%s5464_s5] sm:$0x3f]  }
 0x6ae   : > { %v3876_v2 = vpop.permute.xlu1 %3875 }
 0x6af   : > { %v3878_v15 = vunpack.i.h.bf16 %v3876_v2  ;;  %v3877_v38 = vunpack.i.l.bf16 %v3876_v2 }
 0x6b1   : > { %v2262_v28 = vsel %vm2255_vm6, %v2251_v44, %v3877_v38  ;;  %v2263_v43 = vsel %vm2255_vm6, %v2252_v10, %v3878_v15 }
 0x6b2   : > { %v2269_v34 = vpack.c.bf16 %v2263_v43, %v2262_v28  ;;  %v3881_v56 = vpop.permute.xlu1 %3880 }
 0x6b3   : > { %v3883_v4 = vunpack.i.h.bf16 %v3881_v56  ;;  %v3882_v6 = vunpack.i.l.bf16 %v3881_v56 }
 0x6b4   : > { %3705 = vmatpush3.bf16.msra.mxu0 %v2269_v34 }
 0x6b5   : > { %3706 = vmatprep.subr.bf16.mxu0 %v5485_v55  ;;  %v2254_v22 = vsel %vm2244_vm5, %v2243_v24, %v3883_v4  ;;  %v2253_v53 = vsel %vm2244_vm5, %v2242_v32, %v3882_v6 }
 0x6b6   : > { %v3886_v50 = vpop.permute.xlu0 %3885  ;;  %v2315_v5 = vpop.permute.xlu1 %2314 }
 0x6b7   : > { %v3888_v26 = vunpack.i.h.bf16 %v3886_v50  ;;  %v3887_v52 = vunpack.i.l.bf16 %v3886_v50  ;;  %v2320_v20 = vsel %vm689_vm4, %v2315_v5, 0 }
 0x6b9   : > { %v2264_v12 = vsel %vm2255_vm6, %v2253_v53, %v3887_v52  ;;  %v2265_v37 = vsel %vm2255_vm6, %v2254_v22, %v3888_v26 }
 0x6ba   : > { %v2270_v51 = vpack.c.bf16 %v2265_v37, %v2264_v12  ;;  %v2443_v1 = vpop.permute.xlu0 %2442  ;;  %v2441_v11 = vpop.permute.xlu1 %2440 }
 0x6bb   : > { %v2448_v46 = vsel %vm689_vm4, %v2443_v1, 0 }
 0x6bc   : > { %3707 = vmatpush3.bf16.msra.mxu0 %v2270_v51 }
 0x6bd   : > { %3712 = vmatprep.subr.bf16.mxu0 %v5485_v55 }
 0x6be   : > { %v2571_v19 = vpop.permute.xlu0 %2570 }
 0x6bf   : > { %3709 = vmatmul.mubr.msk.bf16.vlgmr.msra.gmra.mrb[100].mxu0 %vm628_vm3, %v4095_v42  ;;  %v2576_v36 = vsel %vm689_vm4, %v2571_v19, 0 }
 0x6c0   : > { %3714 = vmatprep.mubr.msk.bf16.mxu0 %vm4105_vm0, %v5485_v55 }
 0x6c2   : > { %v2698_v16 = vpop.permute.xlu0 %2697 }
 0x6c3   : > { %v2703_v17 = vsel %vm689_vm4, %v2698_v16, 0 }
 0x6c5   : > { %3713 = vmatpush3.bf16.xpose.msra.mxu0 %v2320_v20 }
 0x6c6   : > { %3724 = vmatprep.subr.bf16.mxu0 %v5485_v55 }
 0x6cc   : > { %3715 = vmatmul.mubr.msk.bf16.vlgmr.msra.gmra.mrb[104].mxu0 %vm689_vm4, %v5098_v57  ;;  %v2569_v57 = vpop.permute.xlu1 %2568 }
 0x6cd   : > { %3725 = vmatpush3.bf16.xpose.msra.mxu0 %v2448_v46  ;;  %3726 = vmatprep.mubr.msk.bf16.mxu0 %vm4105_vm0, %v5485_v55 }
 0x6ce   : > { %3736 = vmatprep.subr.bf16.mxu0 %v5485_v55 }
 0x6d0   : > { %v2696_v63 = vpop.permute.xlu1 %2695 }
 0x6d4   : > { %3727 = vmatmul.mubr.msk.bf16.vlgmr.msra.gmra.mrb[108].mxu0 %vm689_vm4, %v2441_v11 }
 0x6d5   : > { %3737 = vmatpush3.bf16.xpose.msra.mxu0 %v2576_v36  ;;  %3738 = vmatprep.mubr.msk.bf16.mxu0 %vm4105_vm0, %v5485_v55 }
 0x6d6   : > { %3748 = vmatprep.subr.bf16.mxu0 %v5485_v55 }
 0x6dc   : > { %3739 = vmatmul.mubr.msk.bf16.vlgmr.msra.gmra.mrb[112].mxu0 %vm689_vm4, %v2569_v57 }
 0x6dd   : > { %3749 = vmatpush3.bf16.xpose.msra.mxu0 %v2703_v17  ;;  %3750 = vmatprep.mubr.msk.bf16.mxu0 %vm4105_vm0, %v5485_v55 }
 0x6de   : > { %3760 = vmatprep.subr.bf16.mxu0 %v5246_v21 }
 0x6e4   : > { %3751 = vmatmul.mubr.msk.bf16.vlgmr.msra.gmra.mrb[116].mxu0 %vm689_vm4, %v2696_v63 }
 0x6e5   : > { %3761 = vmatpush3.bf16.msra.mxu0 %v5246_v21 }
 0x6e6   : > { %3762 = vmatprep.subr.bf16.mxu0 %v5258_v3 }
 0x6e9   : > { %3763 = vmatpush3.bf16.msra.mxu0 %v5258_v3  ;;  %v392_v3 = vld [vmem:[%s5466_s7] sm:$0xff] }
 0x6ea   : > { %3764 = vmatprep.subr.bf16.mxu0 %v5270_v23 }
 0x6ed   : > { %3765 = vmatpush3.bf16.msra.mxu0 %v5270_v23 }
 0x6ee   : > { %3766 = vmatprep.subr.bf16.mxu0 %v2269_v34 }
 0x6f1   : > { %3767 = vmatpush3.bf16.msra.mxu0 %v2269_v34 }
 0x6f2   : > { %3768 = vmatprep.subr.bf16.mxu0 %v2270_v51 }
 0x6f5   : > { %3769 = vmatpush3.bf16.msra.mxu0 %v2270_v51 }
 0x792   : > { %v2305_v33 = vpop.f32.mrb[100].mxu0 }
 0x793   : > { %v3710_v54 = vpop.f32.mrb[101].mxu0 }
 0x794   : > { %v2308_v41 = vpop.f32.mrb[102].mxu0 }
 0x795   : > { %v5322_v39 = vpack.c.bf16 %v2308_v41, %v2305_v33  ;;  %v3711_v35 = vpop.f32.mrb[103].mxu0 }
 0x797   : > { %v2397_v21 = vsel %vm2395_vm7, %v5322_v39, 0 }
 0x798   : > { %3719 = vmatpush3.bf16.msra.mxu1 %v2397_v21 }
 0x799   : > { %3730 = vmatprep.subr.bf16.mxu1 %v5485_v55 }
 0x79f   : > { %v2356_v61 = vpop.f32.mrb[104].mxu0 }
 0x7a0   : > { %v2363_v62 = vmul.f32 0.35355338, %v2356_v61  ;;  %v3716_v9 = vpop.f32.mrb[105].mxu0 }
 0x7a1   : > { %v2359_v27 = vpop.f32.mrb[106].mxu0 }
 0x7a2   : > { %v2365_v48 = vadd.f32 %v2363_v62, %v392_v3  ;;  %v2364_v13 = vmul.f32 0.35355338, %v2359_v27  ;;  %v3717_v49 = vpop.f32.mrb[107].mxu0 }
 0x7a4   : > { %v2366_v40 = vadd.f32 %v2364_v13, %v393_v47  ;;  %v2368_v7 = vsel %vm2367_vm8, %v2365_v48, -inf }
 0x7a5   : > { %2369 = vmax.xlane.f32.xlu0 %v2368_v7 }
 0x7a6   : > { %v2372_v18 = vsel %vm2371_vm9, %v2366_v40, -inf }
 0x7a7   : > { %2373 = vmax.xlane.f32.xlu1 %v2372_v18  ;;  %v2484_v45 = vpop.f32.mrb[108].mxu0 }
 0x7a8   : > { %v2491_v59 = vmul.f32 0.35355338, %v2484_v45  ;;  %v3728_v23 = vpop.f32.mrb[109].mxu0 }
 0x7a9   : > { %v2487_v31 = vpop.f32.mrb[110].mxu0 }
 0x7aa   : > { %v5335_v14 = vadd.f32 %v2491_v59, %v392_v3  ;;  %v2492_v0 = vmul.f32 0.35355338, %v2487_v31  ;;  %v3729_v58 = vpop.f32.mrb[111].mxu0 }
 0x7ac   : > { %v2494_v2 = vadd.f32 %v2492_v0, %v393_v47  ;;  %v2495_v15 = vsel %vm2367_vm8, %v5335_v14, -inf }
 0x7ad   : > { %2496 = vmax.xlane.f32.xlu0 %v2495_v15 }
 0x7ae   : > { %v2498_v10 = vsel %vm2371_vm9, %v2494_v2, -inf }
 0x7af   : > { %v2612_v38 = vpop.f32.mrb[112].mxu0 }
 0x7b0   : > { %v2619_v8 = vmul.f32 0.35355338, %v2612_v38  ;;  %v3740_v44 = vpop.f32.mrb[113].mxu0 }
 0x7b1   : > { %2499 = vmax.xlane.f32.xlu0 %v2498_v10  ;;  %v2615_v28 = vpop.f32.mrb[114].mxu0  ;;  %v3898_v44 = vld [vmem:[%s5463_s4 + $0x8] sm:$0xff]   ;;  %v3899_v10 = vld [vmem:[%s5463_s4 + $0x10] sm:$0xff]  }
 0x7b2   : > { %v5340_v43 = vadd.f32 %v2619_v8, %v392_v3  ;;  %v2620_v34 = vmul.f32 0.35355338, %v2615_v28  ;;  %v3741_v56 = vpop.f32.mrb[115].mxu0  ;;  %v3897_v8 = vld [vmem:[%s5463_s4] sm:$0xff]  }
 0x7b3   : > { %3770 = vmatprep.mubr.msk.bf16.mxu0 %vm628_vm3, %v3897_v8 }
 0x7b4   : > { %v2622_v60 = vadd.f32 %v2620_v34, %v393_v47  ;;  %v2623_v29 = vsel %vm2367_vm8, %v5340_v43, -inf  ;;  %3771 = vmatmul.mubr.msk.bf16.vlgmr.msra.gmra.mrb[120].mxu0 %vm628_vm3, %v3898_v44 }
 0x7b5   : > { %2624 = vmax.xlane.f32.xlu1 %v2623_v29  ;;  %3774 = vmatprep.mubr.msk.bf16.mxu0 %vm628_vm3, %v3899_v10 }
 0x7b6   : > { %v2626_v4 = vsel %vm2371_vm9, %v2622_v60, -inf }
 0x7b7   : > { %2627 = vmax.xlane.f32.xlu0 %v2626_v4  ;;  %v2739_v6 = vpop.f32.mrb[116].mxu0 }
 0x7b8   : > { %v2746_v50 = vmul.f32 0.35355338, %v2739_v6  ;;  %v3752_v24 = vpop.f32.mrb[117].mxu0 }
 0x7b9   : > { %v2742_v32 = vpop.f32.mrb[118].mxu0 }
 0x7ba   : > { %v2748_v26 = vadd.f32 %v2746_v50, %v392_v3  ;;  %v2747_v52 = vmul.f32 0.35355338, %v2742_v32  ;;  %v3753_v22 = vpop.f32.mrb[119].mxu0 }
 0x7bc   : > { %v2749_v53 = vadd.f32 %v2747_v52, %v393_v47  ;;  %v2750_v12 = vsel %vm2367_vm8, %v2748_v26, -inf }
 0x7bd   : > { %2751 = vmax.xlane.f32.xlu1 %v2750_v12 }
 0x7be   : > { %v2753_v37 = vsel %vm2371_vm9, %v2749_v53, -inf }
 0x7bf   : > { %2754 = vmax.xlane.f32.xlu0 %v2753_v37 }
 0x832   : > { %v2370_v51 = vpop.xlane.xlu0 %2369 }
 0x833   : > { %v2375_v42 = vsub.f32 %v2365_v48, %v2370_v51 }
 0x834   : > { %v2374_v5 = vpop.xlane.xlu1 %2373 }
 0x835   : > { %v2377_v20 = vmul.f32 1.442695, %v2375_v42  ;;  %v2376_v1 = vsub.f32 %v2366_v40, %v2374_v5 }
 0x837   : > { %4063 = vpow2.f32 %v2377_v20  ;;  %v2379_v46 = vmul.f32 1.442695, %v2376_v1 }
 0x839   : > { %4065 = vpow2.f32 %v2379_v46 }
 0x83a   : > { %v2497_v19 = vpop.xlane.xlu0 %2496 }
 0x83b   : > { %v2501_v49 = vsub.f32 %v5335_v14, %v2497_v19 }
 0x83d   : > { %v2503_v7 = vmul.f32 1.442695, %v2501_v49 }
 0x83e   : > { %v2500_v11 = vpop.xlane.xlu0 %2499 }
 0x83f   : > { %v2502_v36 = vsub.f32 %v2494_v2, %v2500_v11 }
 0x841   : > { %v4064_v16 = vpop.eup %4063  ;;  %v2505_v57 = vmul.f32 1.442695, %v2502_v36 }
 0x842   : > { %v2381_v17 = vsel %vm2367_vm8, %v4064_v16, 0.0  ;;  %v2625_v40 = vpop.xlane.xlu1 %2624 }
 0x843   : > { %v4066_v63 = vpop.eup %4065  ;;  %4067 = vpow2.f32 %v2505_v57  ;;  %2382 = vadd.xlane.f32.xlu1 %v2381_v17  ;;  %v2629_v18 = vsub.f32 %v5340_v43, %v2625_v40 }
 0x844   : > { %v2628_v33 = vpop.xlane.xlu0 %2627  ;;  %v2384_v54 = vsel %vm2371_vm9, %v4066_v63, 0.0 }
 0x845   : > { %v2630_v41 = vsub.f32 %v2622_v60, %v2628_v33  ;;  %2385 = vadd.xlane.f32.xlu0 %v2384_v54  ;;  %v2631_v59 = vmul.f32 1.442695, %v2629_v18 }
 0x847   : > { %v2633_v35 = vmul.f32 1.442695, %v2630_v41 }
 0x849   : > { %4069 = vpow2.f32 %v2633_v35 }
 0x84a   : > { %v2752_v45 = vpop.xlane.xlu1 %2751 }
 0x84b   : > { %v2756_v23 = vsub.f32 %v2748_v26, %v2752_v45 }
 0x84c   : > { %v2755_v21 = vpop.xlane.xlu0 %2754 }
 0x84d   : > { %v5349_v3 = vpop.eup %4067  ;;  %v2757_v61 = vsub.f32 %v2749_v53, %v2755_v21  ;;  %v2758_v31 = vmul.f32 1.442695, %v2756_v23  ;;  %v3901_v21 = vld [vmem:[%s5461_s2] sm:$0xff]  }
 0x84e   : > { %v2510_v62 = vsel %vm2371_vm9, %v5349_v3, 0.0 }
 0x84f   : > { %v2760_v9 = vmul.f32 1.442695, %v2757_v61  ;;  %2511 = vadd.xlane.f32.xlu0 %v2510_v62  ;;  %v3902_v62 = vld [vmem:[%s5461_s2 + $0x8] sm:$0xff]  }
 0x851   : > { %4071 = vpow2.f32 %v2760_v9 }
 0x852   : > { %4073 = vpow2.f32 %v2503_v7 }
 0x853   : > { %v5353_v47 = vpop.eup %4069  ;;  %4075 = vpow2.f32 %v2631_v59 }
 0x854   : > { %2519 = vrot.lane.b32.xlu1 %v5322_v39, %s4109_s16  ;;  %v2638_v27 = vsel %vm2371_vm9, %v5353_v47, 0.0  ;;  %4077 = vpow2.f32 %v2758_v31  ;;  %s342_s16 = scalar_lea.vmem %s5467_s8, %s3163_s12 }
 0x855   : > { %2639 = vadd.xlane.f32.xlu0 %v2638_v27 }
 0x85b   : > { %v5359_v48 = vpop.eup %4071 }
 0x85c   : > { %v2765_v13 = vsel %vm2371_vm9, %v5359_v48, 0.0  ;;  %v4074_v0 = vpop.eup %4073 }
 0x85d   : > { %2766 = vadd.xlane.f32.xlu0 %v2765_v13  ;;  %v2507_v58 = vsel %vm2367_vm8, %v4074_v0, 0.0  ;;  %v4076_v2 = vpop.eup %4075 }
 0x85e   : > { %v2635_v14 = vsel %vm2367_vm8, %v4076_v2, 0.0  ;;  %v5369_v15 = vpop.eup %4077 }
 0x85f   : > { %v2762_v38 = vsel %vm2367_vm8, %v5369_v15, 0.0 }
 0x873   : > { %2646 = vrot.lane.b32.xlu0 %v5322_v39, %s4111_s18 }
 0x878   : > { %2508 = vadd.xlane.f32.xlu1 %v2507_v58 }
 0x87c   : > { %2636 = vadd.xlane.f32.xlu1 %v2635_v14 }
 0x880   : > { %2763 = vadd.xlane.f32.xlu1 %v2762_v38 }
 0x891   : > { %2773 = vrot.lane.b32.xlu1 %v5322_v39, %s4112_s19  ;;  %v3900_v39 = vld [vmem:[%s5463_s4 + $0x18] sm:$0xff]  }
 0x892   : > { %3775 = vmatmul.mubr.msk.bf16.gmra.mrb[124].mxu0 %vm628_vm3, %v3900_v39 }
 0x8d0   : > { %v2383_v28 = vpop.xlane.xlu1 %2382 }
 0x8d1   : > { %4079 = vrcp.f32 %v2383_v28 }
 0x8d2   : > { %v2386_v43 = vpop.xlane.xlu0 %2385 }
 0x8d3   : > { %4081 = vrcp.f32 %v2386_v43 }
 0x8d4   : > { %v2520_v4 = vpop.permute.xlu1 %2519 }
 0x8d5   : > { %v2525_v50 = vsel %vm2395_vm7, %v2520_v4, 0 }
 0x8db   : > { %v4080_v34 = vpop.eup %4079 }
 0x8dc   : > { %v2389_v60 = vmul.f32 %v4080_v34, %v4064_v16  ;;  %v2512_v24 = vpop.xlane.xlu0 %2511 }
 0x8dd   : > { %v4082_v56 = vpop.eup %4081  ;;  %4083 = vrcp.f32 %v2512_v24 }
 0x8de   : > { %v2390_v29 = vmul.f32 %v4082_v56, %v4066_v63 }
 0x8e0   : > { %v2391_v6 = vpack.c.bf16 %v2390_v29, %v2389_v60 }
 0x8e2   : > { %3721 = vmatmul.mubr.msk.bf16.vlgmr.msra.gmra.mrb[104].mxu1 %vm2367_vm8, %v2391_v6  ;;  %v2640_v26 = vpop.xlane.xlu0 %2639 }
 0x8e3   : > { %3731 = vmatpush3.bf16.msra.mxu1 %v2525_v50  ;;  %3732 = vmatprep.mubr.msk.bf16.mxu1 %vm4105_vm0, %v5485_v55 }
 0x8e4   : > { %3742 = vmatprep.subr.bf16.mxu1 %v5485_v55 }
 0x8e7   : > { %v4084_v53 = vpop.eup %4083 }
 0x8e8   : > { %v2516_v51 = vmul.f32 %v4084_v53, %v5349_v3  ;;  %v3772_v3 = vpop.f32.mrb[120].mxu0 }
 0x8e9   : > { %v2932_v61 = vpop.f32.mrb[121].mxu0 }
 0x8ea   : > { %v2767_v22 = vpop.xlane.xlu0 %2766 }
 0x8ee   : > { %v2647_v5 = vpop.permute.xlu0 %2646 }
 0x8ef   : > { %v2652_v46 = vsel %vm2395_vm7, %v2647_v5, 0 }
 0x905   : > { %v2509_v32 = vpop.xlane.xlu1 %2508 }
 0x906   : > { %4085 = vrcp.f32 %v2509_v32 }
 0x909   : > { %v2637_v52 = vpop.xlane.xlu1 %2636 }
 0x90a   : > { %4087 = vrcp.f32 %v2637_v52 }
 0x90b   : > { %4089 = vrcp.f32 %v2640_v26 }
 0x90d   : > { %v2764_v12 = vpop.xlane.xlu1 %2763 }
 0x90e   : > { %4091 = vrcp.f32 %v2764_v12 }
 0x90f   : > { %4093 = vrcp.f32 %v2767_v22 }
 0x910   : > { %v4086_v37 = vpop.eup %4085 }
 0x911   : > { %v2515_v42 = vmul.f32 %v4086_v37, %v4074_v0  ;;  %v2774_v16 = vpop.permute.xlu1 %2773 }
 0x912   : > { %v2779_v63 = vsel %vm2395_vm7, %v2774_v16, 0 }
 0x913   : > { %v2517_v20 = vpack.c.bf16 %v2516_v51, %v2515_v42 }
 0x914   : > { %v4088_v1 = vpop.eup %4087 }
 0x915   : > { %3733 = vmatmul.mubr.msk.bf16.vlgmr.msra.gmra.mrb[108].mxu1 %vm2367_vm8, %v2517_v20  ;;  %v4090_v19 = vpop.eup %4089  ;;  %v2643_v11 = vmul.f32 %v4088_v1, %v4076_v2 }
 0x916   : > { %3743 = vmatpush3.bf16.msra.mxu1 %v2652_v46  ;;  %3744 = vmatprep.mubr.msk.bf16.mxu1 %vm4105_vm0, %v5485_v55  ;;  %v2644_v36 = vmul.f32 %v4090_v19, %v5353_v47 }
 0x917   : > { %3754 = vmatprep.subr.bf16.mxu1 %v5485_v55 }
 0x918   : > { %v2645_v57 = vpack.c.bf16 %v2644_v36, %v2643_v11  ;;  %v4092_v17 = vpop.eup %4091 }
 0x919   : > { %v4094_v33 = vpop.eup %4093  ;;  %v2770_v54 = vmul.f32 %v4092_v17, %v5369_v15 }
 0x91a   : > { %v2771_v41 = vmul.f32 %v4094_v33, %v5359_v48 }
 0x91c   : > { %v2772_v35 = vpack.c.bf16 %v2771_v41, %v2770_v54 }
 0x91d   : > { %3745 = vmatmul.mubr.msk.bf16.vlgmr.msra.gmra.mrb[112].mxu1 %vm2367_vm8, %v2645_v57 }
 0x91e   : > { %3755 = vmatpush3.bf16.msra.mxu1 %v2779_v63  ;;  %3756 = vmatprep.mubr.msk.bf16.mxu1 %vm4105_vm0, %v5485_v55  ;;  %v3773_v55 = vpop.f32.mrb[122].mxu0 }
 0x91f   : > { %3778 = vmatprep.subr.bf16.mxu1 %v3901_v21  ;;  %v2964_v9 = vpack.c.bf16 %v3773_v55, %v3772_v3  ;;  %v2935_v47 = vpop.f32.mrb[123].mxu0 }
 0x920   : > { %v2963_v27 = vpack.c.bf16 %v2935_v47, %v2932_v61 }
 0x925   : > { %3757 = vmatmul.mubr.msk.bf16.vlgmr.msra.gmra.mrb[116].mxu1 %vm2367_vm8, %v2772_v35 }
 0x926   : > { %3779 = vmatpush3.bf16.msra.mxu1 %v3901_v21  ;;  %3782 = vmatprep.mubr.msk.bf16.mxu1 %vm529_vm2, %v2963_v27 }
 0x927   : > { %3780 = vmatprep.subr.bf16.mxu1 %v3902_v62 }
 0x92a   : > { %3781 = vmatpush3.bf16.msra.mxu1 %v3902_v62 }
 0x92d   : > { %3783 = vmatmul.mubr.msk.bf16.vlgmr.msra.gmra.mrb[120].mxu1 %vm529_vm2, %v2964_v9 }
 0x965   : > { %v3776_v48 = vpop.f32.mrb[124].mxu0 }
 0x966   : > { %v2948_v13 = vpop.f32.mrb[125].mxu0 }
 0x967   : > { %v3777_v49 = vpop.f32.mrb[126].mxu0 }
 0x968   : > { %v2966_v40 = vpack.c.bf16 %v3777_v49, %v3776_v48  ;;  %v2951_v7 = vpop.f32.mrb[127].mxu0 }
 0x969   : > { %v2965_v18 = vpack.c.bf16 %v2951_v7, %v2948_v13 }
 0x96b   : > { %3786 = vmatprep.mubr.msk.bf16.mxu1 %vm529_vm2, %v2965_v18 }
 0x96c   : > { %3787 = vmatmul.mubr.msk.bf16.gmra.mrb[124].mxu1 %vm529_vm2, %v2966_v40 }
 0x9b5   : > { %v2433_v45 = vpop.f32.mrb[104].mxu1 }
 0x9b6   : > { %v3722_v59 = vpop.f32.mrb[105].mxu1 }
 0x9b7   : > { %v2436_v23 = vpop.f32.mrb[106].mxu1 }
 0x9b8   : > { %v3723_v31 = vpop.f32.mrb[107].mxu1 }
 0x9e8   : > { %v2561_v0 = vpop.f32.mrb[108].mxu1 }
 0x9e9   : > { %2824 = vrot.lane.b32.xlu1 %v2561_v0, %s4117_s24  ;;  %v3734_v58 = vpop.f32.mrb[109].mxu1 }
 0x9ea   : > { %v2564_v2 = vpop.f32.mrb[110].mxu1 }
 0x9eb   : > { %2826 = vrot.lane.b32.xlu0 %v2564_v2, %s4117_s24  ;;  %v3735_v14 = vpop.f32.mrb[111].mxu1 }
 0x9f0   : > { %v2688_v15 = vpop.f32.mrb[112].mxu1 }
 0x9f1   : > { %2832 = vrot.lane.b32.xlu1 %v2688_v15, %s4118_s20  ;;  %v3746_v38 = vpop.f32.mrb[113].mxu1 }
 0x9f2   : > { %v2691_v8 = vpop.f32.mrb[114].mxu1 }
 0x9f3   : > { %2834 = vrot.lane.b32.xlu0 %v2691_v8, %s4118_s20  ;;  %v3747_v44 = vpop.f32.mrb[115].mxu1 }
 0x9f8   : > { %v2815_v10 = vpop.f32.mrb[116].mxu1 }
 0x9f9   : > { %2840 = vrot.lane.b32.xlu1 %v2815_v10, %s4119_s21  ;;  %v3758_v39 = vpop.f32.mrb[117].mxu1 }
 0x9fa   : > { %v2818_v28 = vpop.f32.mrb[118].mxu1 }
 0x9fb   : > { %2842 = vrot.lane.b32.xlu0 %v2818_v28, %s4119_s21  ;;  %v3759_v43 = vpop.f32.mrb[119].mxu1  ;;  %s348_s21 = scalar_lea.vmem %s5468_s9, %s3252_s11 }
 0xa00   : > { %v3784_v34 = vpop.f32.mrb[120].mxu1 }
 0xa01   : > { %3062 = vst.msk [vmem:[%s342_s16 + $0x10] sm:$0xff] %vm529_vm2, %v3784_v34  ;;  %v3029_v56 = vpop.f32.mrb[121].mxu1 }
 0xa02   : > { %3060 = vst.msk [vmem:[%s342_s16] sm:$0xff] %vm529_vm2, %v3029_v56  ;;  %v3785_v60 = vpop.f32.mrb[122].mxu1 }
 0xa03   : > { %3063 = vst.msk [vmem:[%s342_s16 + $0x18] sm:$0xff] %vm529_vm2, %v3785_v60  ;;  %v3032_v29 = vpop.f32.mrb[123].mxu1 }
 0xa04   : > { %3061 = vst.msk [vmem:[%s342_s16 + $0x8] sm:$0xff] %vm529_vm2, %v3032_v29 }
 0xa3f   : > { %v3788_v4 = vpop.f32.mrb[124].mxu1 }
 0xa40   : > { %3066 = vst.msk [vmem:[%s342_s16 + $0x30] sm:$0xff] %vm529_vm2, %v3788_v4  ;;  %v3045_v6 = vpop.f32.mrb[125].mxu1 }
 0xa41   : > { %3064 = vst.msk [vmem:[%s342_s16 + $0x20] sm:$0xff] %vm529_vm2, %v3045_v6  ;;  %v3789_v50 = vpop.f32.mrb[126].mxu1 }
 0xa42   : > { %3067 = vst.msk [vmem:[%s342_s16 + $0x38] sm:$0xff] %vm529_vm2, %v3789_v50  ;;  %v3048_v24 = vpop.f32.mrb[127].mxu1 }
 0xa43   : > { %3065 = vst.msk [vmem:[%s342_s16 + $0x28] sm:$0xff] %vm529_vm2, %v3048_v24 }
 0xa5b   : > { %v2825_v32 = vpop.permute.xlu1 %2824 }
 0xa5c   : > { %v2846_v53 = vsel %vm689_vm4, %v2433_v45, %v2825_v32 }
 0xa5d   : > { %v2827_v26 = vpop.permute.xlu0 %2826 }
 0xa5e   : > { %v2847_v51 = vsel %vm689_vm4, %v2436_v23, %v2827_v26 }
 0xa63   : > { %v2833_v52 = vpop.permute.xlu1 %2832 }
 0xa64   : > { %v2848_v12 = vsel %vm2244_vm5, %v2846_v53, %v2833_v52 }
 0xa65   : > { %v2835_v22 = vpop.permute.xlu0 %2834 }
 0xa66   : > { %v2849_v5 = vsel %vm2244_vm5, %v2847_v51, %v2835_v22 }
 0xa6b   : > { %v2841_v37 = vpop.permute.xlu1 %2840 }
 0xa6c   : > { %v2850_v42 = vsel %vm2255_vm6, %v2848_v12, %v2841_v37 }
 0xa6d   : > { %2854 = vrot.lane.b32.xlu1 %v2850_v42, %s4113_s22  ;;  %v2843_v20 = vpop.permute.xlu0 %2842 }
 0xa6e   : > { %v2851_v1 = vsel %vm2255_vm6, %v2849_v5, %v2843_v20 }
 0xa6f   : > { %2856 = vrot.lane.b32.xlu0 %v2851_v1, %s4113_s22 }
 0xadf   : > { %v2855_v46 = vpop.permute.xlu1 %2854 }
 0xae0   : > { %v2860_v19 = vsel %vm419_vm1, %v5090_v25, %v2855_v46 }
 0xae1   : > { %2863 = vst.msk [vmem:[%s348_s21] sm:$0xff] %vm2862_vm10, %v2860_v19  ;;  %v2857_v11 = vpop.permute.xlu0 %2856 }
 0xae2   : > { %v2861_v36 = vsel %vm419_vm1, %v5093_v30, %v2857_v11 }
 0xae3   : > { %2865 = vst.msk [vmem:[%s348_s21 + $0x8] sm:$0xf] %vm2864_vm11, %v2861_v36 }
 0xae4 PF: > { %s20_s30 = sadd.s32 1, %s4102_s30  }
 0xae5   : > { %p17_p5 = scmp.ge.s32.totalorder %s20_s30, 6  }
 0xae7   :  { %19 = sbr.rel (!%p17_p5) target bundleno = 1 (0x1), region = 94 }

</bundles_post_ra>
